<compile_context>
chip_gen: v6e
topology: v6e:2x2x1
jax: 0.10.0
libtpu: 0.0.40
codegen_flags: <defaults>
</compile_context>

<pallas_src>
import jax
import jax.numpy as jnp
import numpy as np
from jax.experimental import pallas as pl
from jax.experimental.pallas import tpu as pltpu

VECTOR_DIM = 128
HIDDEN_DIM = 256
NUM_HEADS = 4
HEAD_DIM = VECTOR_DIM // NUM_HEADS
LN_EPS = 1e-5


def _layernorm(z, gamma, beta):
    mu = jnp.mean(z, axis=-1, keepdims=True)
    var = jnp.mean((z - mu) ** 2, axis=-1, keepdims=True)
    return (z - mu) * jax.lax.rsqrt(var + LN_EPS) * gamma + beta


def _attention_and_ffn(br, x, q, k, v, wo_ref, w1_ref, w2_ref, vecv_ref, vech_ref):
    """One alignment branch, given the already-projected Q/K/V.

    x: (Sq, V) residual stream, q: (Sq, V), k/v: (Sk, V).  br is a *static*
    Python int selecting the branch slice of the stacked weights:
      wo   : (2, V, V)      full output projection
      w1   : (2, 2, V, HID) [W1_updated, W1_context]  (concat-free FFN)
      w2   : (2, HID, V)
      vecv : (2, 6, V)      [bo, n1_gamma, n1_beta, b2, n2_gamma, n2_beta]
      vech : (2, 3, HID)    [b1, ln_gamma, ln_beta]
    """
    # --- multi-head attention: per head only scores + attn@V hit the MXU ---
    ctx_heads = []
    for h in range(NUM_HEADS):
        sl = slice(h * HEAD_DIM, (h + 1) * HEAD_DIM)
        qh, kh, vh = q[:, sl], k[:, sl], v[:, sl]
        # contract the head_dim axes directly -> no transpose; 1/sqrt(head_dim)
        # is already folded into the Wq / bq columns of the fused projection.
        scores = jax.lax.dot_general(
            qh, kh, (((1,), (1,)), ((), ())),
            preferred_element_type=jnp.float32)                    # (Sq, Sk)
        m = jnp.max(scores, axis=-1, keepdims=True)
        e = jnp.exp(scores - m)
        attn = e * pl.reciprocal(jnp.sum(e, axis=-1, keepdims=True), approx=True)
        ctx_heads.append(jnp.dot(attn, vh, preferred_element_type=jnp.float32))

    # lane-concat the 4 heads -> ONE full-depth (K=128) output projection.
    ctx = jnp.concatenate(ctx_heads, axis=-1)                      # (Sq, V)
    context = jnp.dot(ctx, wo_ref[br],
                      preferred_element_type=jnp.float32) + vecv_ref[br, 0]

    # --- residual + LayerNorm 1 ---
    updated = _layernorm(x + context, vecv_ref[br, 1], vecv_ref[br, 2])

    # --- alignment FFN: Linear -> LayerNorm -> ReLU -> Linear (concat-free) ---
    h1 = (jnp.dot(updated, w1_ref[br, 0], preferred_element_type=jnp.float32)
          + jnp.dot(context, w1_ref[br, 1], preferred_element_type=jnp.float32)
          + vech_ref[br, 0])
    h1 = _layernorm(h1, vech_ref[br, 1], vech_ref[br, 2])
    h1 = jnp.maximum(h1, 0.0)
    ffn = jnp.dot(h1, w2_ref[br], preferred_element_type=jnp.float32) + vecv_ref[br, 3]

    # --- residual + LayerNorm 2 ---
    return _layernorm(updated + ffn, vecv_ref[br, 4], vecv_ref[br, 5])


def _fused_kernel(text_ref, num_ref,
                  wproj_ref, bproj_ref, wo_ref, w1_ref, w2_ref, vecv_ref, vech_ref,
                  out_text_ref, out_num_ref):
    C, St, V = text_ref.shape                  # per-step batch chunk
    Sn = num_ref.shape[1]

    # ONE wide, lane-dense projection covering every chunk element, BOTH
    # branches and Q/K/V at once:  (C*(St+Sn), 128) @ (128, 768).
    xt_flat = text_ref[...].reshape(C * St, V)
    xn_flat = num_ref[...].reshape(C * Sn, V)
    stacked = jnp.concatenate([xt_flat, xn_flat], axis=0)          # rows: text then num
    proj = jnp.dot(stacked, wproj_ref[...],
                   preferred_element_type=jnp.float32) + bproj_ref[...]
    t_rows = C * St

    # Column layout of proj: [Qt | Kt | Vt | Qn | Kn | Vn], each V=128 lanes.
    for c in range(C):
        rt = slice(c * St, (c + 1) * St)                 # this element's text rows
        rn = slice(t_rows + c * Sn, t_rows + (c + 1) * Sn)   # this element's num rows

        # text -> num branch: queries from text, keys/values from num.
        q_t = proj[rt, 0 * V:1 * V]
        k_t = proj[rn, 1 * V:2 * V]
        v_t = proj[rn, 2 * V:3 * V]
        out_text_ref[c] = _attention_and_ffn(0, text_ref[c], q_t, k_t, v_t,
                                             wo_ref, w1_ref, w2_ref, vecv_ref, vech_ref)

        # num -> text branch: queries from num, keys/values from text.
        q_n = proj[rn, 3 * V:4 * V]
        k_n = proj[rt, 4 * V:5 * V]
        v_n = proj[rt, 5 * V:6 * V]
        out_num_ref[c] = _attention_and_ffn(1, num_ref[c], q_n, k_n, v_n,
                                            wo_ref, w1_ref, w2_ref, vecv_ref, vech_ref)


@jax.jit
def alignment_integration_forward(text_vectors, num_vectors, packed):
    """text_vectors: (B, St, V), num_vectors: (B, Sn, V); packed = packed weights."""
    B, St, V = text_vectors.shape
    _, Sn, _ = num_vectors.shape

    # Grid strategy: exactly 2 "parallel" steps when B is even and >= 2, so both
    # v7x TensorCores are busy while the single-TC v5e/v6e pay only 2 per-step
    # overheads regardless of B (fat steps).  Odd / B==1 falls back to (B,).
    if B >= 2 and B % 2 == 0:
        chunk = B // 2
    else:
        chunk = 1
    grid = B // chunk

    def wspec(w):
        return pl.BlockSpec(w.shape, lambda b, _n=w.ndim: (0,) * _n)

    in_specs = ([pl.BlockSpec((chunk, St, V), lambda b: (b, 0, 0)),
                 pl.BlockSpec((chunk, Sn, V), lambda b: (b, 0, 0))]
                + [wspec(w) for w in packed])
    out_specs = [pl.BlockSpec((chunk, St, V), lambda b: (b, 0, 0)),
                 pl.BlockSpec((chunk, Sn, V), lambda b: (b, 0, 0))]
    out_shape = (jax.ShapeDtypeStruct((B, St, V), jnp.float32),
                 jax.ShapeDtypeStruct((B, Sn, V), jnp.float32))

    return pl.pallas_call(
        _fused_kernel,
        out_shape=out_shape,
        grid_spec=pltpu.PrefetchScalarGridSpec(
            num_scalar_prefetch=0,
            grid=(grid,),
            in_specs=in_specs,
            out_specs=out_specs),
        compiler_params=pltpu.CompilerParams(
            dimension_semantics=("parallel",)),
    )(text_vectors, num_vectors, *packed)


# ---------------------------------------------------------------------------
# Host-side weight packing (done once, outside the kernel)
# ---------------------------------------------------------------------------
def pack_alignment_params(text_params, num_params):
    inv = 1.0 / float(np.sqrt(HEAD_DIM))

    def qkv_slab(params):
        wq, bq, wk, bk, wv, bv = params[0:6]
        w = jnp.concatenate([wq * inv, wk, wv], axis=1)            # (V, 3V)
        b = jnp.concatenate([bq * inv, bk, bv], axis=1)            # (1, 3V)
        return w, b

    wt, bt = qkv_slab(text_params)
    wn, bn = qkv_slab(num_params)
    wproj = jnp.concatenate([wt, wn], axis=1)                      # (V, 6V) = (128, 768)
    bproj = jnp.concatenate([bt, bn], axis=1)                      # (1, 6V)

    def rest(params):
        (wq, bq, wk, bk, wv, bv, wo, bo,
         n1g, n1b, w1, b1, lng, lnb, w2, b2, n2g, n2b) = params
        w1s = jnp.stack([w1[:VECTOR_DIM], w1[VECTOR_DIM:]], axis=0)    # (2, V, HID)
        vecv = jnp.concatenate([bo, n1g, n1b, b2, n2g, n2b], axis=0)   # (6, V)
        vech = jnp.concatenate([b1, lng, lnb], axis=0)                 # (3, HID)
        return wo, w1s, w2, vecv, vech

    rt = rest(text_params)
    rn = rest(num_params)
    stacked = tuple(jnp.stack([a, b], axis=0) for a, b in zip(rt, rn))
    # 7 weight refs total: wproj, bproj, wo(2,V,V), w1(2,2,V,HID), w2(2,HID,V),
    # vecv(2,6,V), vech(2,3,HID)
    return (wproj, bproj) + stacked


# ---------------------------------------------------------------------------
# Deterministic parameter initialization (synthetic, no checkpoint load)
# ---------------------------------------------------------------------------
def _init_linear(key, fan_in, fan_out):
    kw, kb = jax.random.split(key)
    w = jax.random.normal(kw, (fan_in, fan_out), jnp.float32) * 0.05
    b = jax.random.normal(kb, (1, fan_out), jnp.float32) * 0.05
    return w, b


def _init_branch_params(key):
    keys = jax.random.split(key, 8)
    wq, bq = _init_linear(keys[0], VECTOR_DIM, VECTOR_DIM)
    wk, bk = _init_linear(keys[1], VECTOR_DIM, VECTOR_DIM)
    wv, bv = _init_linear(keys[2], VECTOR_DIM, VECTOR_DIM)
    wo, bo = _init_linear(keys[3], VECTOR_DIM, VECTOR_DIM)
    w1, b1 = _init_linear(keys[4], 2 * VECTOR_DIM, HIDDEN_DIM)
    w2, b2 = _init_linear(keys[5], HIDDEN_DIM, VECTOR_DIM)
    n1g = jnp.ones((1, VECTOR_DIM), jnp.float32)
    n1b = jnp.zeros((1, VECTOR_DIM), jnp.float32)
    lng = jnp.ones((1, HIDDEN_DIM), jnp.float32)
    lnb = jnp.zeros((1, HIDDEN_DIM), jnp.float32)
    n2g = jnp.ones((1, VECTOR_DIM), jnp.float32)
    n2b = jnp.zeros((1, VECTOR_DIM), jnp.float32)
    return (wq, bq, wk, bk, wv, bv, wo, bo,
            n1g, n1b, w1, b1, lng, lnb, w2, b2, n2g, n2b)


# ---------------------------------------------------------------------------
# Pure-JAX reference for verification (mirrors the PyTorch module exactly)
# ---------------------------------------------------------------------------
def _ref_branch(x, kv, params):
    (wq, bq, wk, bk, wv, bv, wo, bo,
     n1g, n1b, w1, b1, lng, lnb, w2, b2, n2g, n2b) = params
    B, Sq, V = x.shape
    Sk = kv.shape[1]
    q = x @ wq + bq
    k = kv @ wk + bk
    v = kv @ wv + bv
    q = q.reshape(B, Sq, NUM_HEADS, HEAD_DIM).transpose(0, 2, 1, 3)
    k = k.reshape(B, Sk, NUM_HEADS, HEAD_DIM).transpose(0, 2, 1, 3)
    v = v.reshape(B, Sk, NUM_HEADS, HEAD_DIM).transpose(0, 2, 1, 3)
    scores = jnp.einsum("bhqd,bhkd->bhqk", q, k) / (HEAD_DIM ** 0.5)
    attn = jax.nn.softmax(scores, axis=-1)
    ctx = jnp.einsum("bhqk,bhkd->bhqd", attn, v)
    ctx = ctx.transpose(0, 2, 1, 3).reshape(B, Sq, V)
    context = ctx @ wo + bo
    updated = _layernorm(x + context, n1g, n1b)
    combined = jnp.concatenate([updated, context], axis=-1)
    h1 = _layernorm(combined @ w1 + b1, lng, lnb)
    h1 = jnp.maximum(h1, 0.0)
    ffn = h1 @ w2 + b2
    return _layernorm(updated + ffn, n2g, n2b)


if __name__ == "__main__":
    key = jax.random.PRNGKey(0)
    k_text, k_num, k_p1, k_p2 = jax.random.split(key, 4)

    B, SEQ_TEXT, SEQ_NUM = 2, 8, 16
    text_vectors = jax.random.normal(k_text, (B, SEQ_TEXT, VECTOR_DIM), jnp.float32)
    num_vectors = jax.random.normal(k_num, (B, SEQ_NUM, VECTOR_DIM), jnp.float32)

    text_params = _init_branch_params(k_p1)
    num_params = _init_branch_params(k_p2)
    packed = pack_alignment_params(text_params, num_params)

    aligned_text, aligned_num = alignment_integration_forward(
        text_vectors, num_vectors, packed)
    aligned_text = jax.block_until_ready(aligned_text)
    aligned_num = jax.block_until_ready(aligned_num)

    ref_text = _ref_branch(text_vectors, num_vectors, text_params)
    ref_num = _ref_branch(num_vectors, text_vectors, num_params)

    np.testing.assert_allclose(np.asarray(aligned_text), np.asarray(ref_text),
                               rtol=2e-3, atol=2e-3)
    np.testing.assert_allclose(np.asarray(aligned_num), np.asarray(ref_num),
                               rtol=2e-3, atol=2e-3)
    print("KERNEL_OK")
</pallas_src>

<mosaic_0001>
module attributes {stable_mosaic.version = 11 : i64} {
  func.func @_fused_kernel(%arg0: i32, %arg1: memref<1x8x128xf32, #tpu.memory_space<vmem>>, %arg2: memref<1x16x128xf32, #tpu.memory_space<vmem>>, %arg3: memref<128x768xf32, #tpu.memory_space<vmem>>, %arg4: memref<1x768xf32, #tpu.memory_space<vmem>>, %arg5: memref<2x128x128xf32, #tpu.memory_space<vmem>>, %arg6: memref<2x2x128x256xf32, #tpu.memory_space<vmem>>, %arg7: memref<2x256x128xf32, #tpu.memory_space<vmem>>, %arg8: memref<2x6x128xf32, #tpu.memory_space<vmem>>, %arg9: memref<2x3x256xf32, #tpu.memory_space<vmem>>, %arg10: memref<1x8x128xf32, #tpu.memory_space<vmem>>, %arg11: memref<1x16x128xf32, #tpu.memory_space<vmem>>) attributes {dimension_semantics = [#tpu.dimension_semantics<parallel>], iteration_bounds = array<i64: 2>, scalar_prefetch = 0 : i64, scratch_operands = 0 : i64, tpu.core_type = #tpu.core_type<tc>, window_params = [{transform_indices = @transform_0, window_bounds = array<i64: 1, 8, 128>}, {transform_indices = @transform_1, window_bounds = array<i64: 1, 16, 128>}, {pipeline_mode = #tpu.pipeline_mode<synchronous>, transform_indices = @transform_2, window_bounds = array<i64: 128, 768>}, {pipeline_mode = #tpu.pipeline_mode<synchronous>, transform_indices = @transform_3, window_bounds = array<i64: 1, 768>}, {pipeline_mode = #tpu.pipeline_mode<synchronous>, transform_indices = @transform_4, window_bounds = array<i64: 2, 128, 128>}, {pipeline_mode = #tpu.pipeline_mode<synchronous>, transform_indices = @transform_5, window_bounds = array<i64: 2, 2, 128, 256>}, {pipeline_mode = #tpu.pipeline_mode<synchronous>, transform_indices = @transform_6, window_bounds = array<i64: 2, 256, 128>}, {pipeline_mode = #tpu.pipeline_mode<synchronous>, transform_indices = @transform_7, window_bounds = array<i64: 2, 6, 128>}, {pipeline_mode = #tpu.pipeline_mode<synchronous>, transform_indices = @transform_8, window_bounds = array<i64: 2, 3, 256>}, {transform_indices = @transform_9, window_bounds = array<i64: 1, 8, 128>}, {transform_indices = @transform_10, window_bounds = array<i64: 1, 16, 128>}]} {
    %c0 = arith.constant 0 : index
    %c0_0 = arith.constant 0 : index
    %c0_1 = arith.constant 0 : index
    %0 = vector.load %arg1[%c0, %c0_0, %c0_1] : memref<1x8x128xf32, #tpu.memory_space<vmem>>, vector<1x8x128xf32>
    %1 = vector.shape_cast %0 : vector<1x8x128xf32> to vector<8x128xf32>
    %c0_2 = arith.constant 0 : index
    %c0_3 = arith.constant 0 : index
    %c0_4 = arith.constant 0 : index
    %2 = vector.load %arg2[%c0_2, %c0_3, %c0_4] : memref<1x16x128xf32, #tpu.memory_space<vmem>>, vector<1x16x128xf32>
    %3 = vector.shape_cast %2 : vector<1x16x128xf32> to vector<16x128xf32>
    %4 = tpu.concatenate %1, %3 in 0 : vector<8x128xf32>, vector<16x128xf32> -> vector<24x128xf32>
    %c0_5 = arith.constant 0 : index
    %c0_6 = arith.constant 0 : index
    %5 = vector.load %arg3[%c0_5, %c0_6] : memref<128x768xf32, #tpu.memory_space<vmem>>, vector<128x768xf32>
    %cst = arith.constant dense<0.000000e+00> : vector<24x768xf32>
    %6 = tpu.matmul %4, %5, %cst {dimension_numbers = #tpu.dot_dimension_numbers<[1], [0], [0], [1], [0, 0, 1, 1], [], []>} : vector<24x128xf32>, vector<128x768xf32>, vector<24x768xf32> -> vector<24x768xf32>
    %c0_7 = arith.constant 0 : index
    %c0_8 = arith.constant 0 : index
    %7 = vector.load %arg4[%c0_7, %c0_8] : memref<1x768xf32, #tpu.memory_space<vmem>>, vector<1x768xf32>
    %8 = vector.broadcast %7 : vector<1x768xf32> to vector<24x768xf32>
    %9 = arith.addf %6, %8 : vector<24x768xf32>
    %10 = vector.extract_strided_slice %9 {offsets = [0, 0], sizes = [8, 128], strides = [1, 1]} : vector<24x768xf32> to vector<8x128xf32>
    %11 = vector.extract_strided_slice %9 {offsets = [8, 128], sizes = [16, 128], strides = [1, 1]} : vector<24x768xf32> to vector<16x128xf32>
    %12 = vector.extract_strided_slice %9 {offsets = [8, 256], sizes = [16, 128], strides = [1, 1]} : vector<24x768xf32> to vector<16x128xf32>
    %c0_9 = arith.constant 0 : index
    %c0_10 = arith.constant 0 : index
    %c0_11 = arith.constant 0 : index
    %13 = vector.load %arg1[%c0_9, %c0_10, %c0_11] : memref<1x8x128xf32, #tpu.memory_space<vmem>>, vector<1x8x128xf32>
    %14 = vector.shape_cast %13 : vector<1x8x128xf32> to vector<8x128xf32>
    %15 = vector.extract_strided_slice %10 {offsets = [0, 0], sizes = [8, 32], strides = [1, 1]} : vector<8x128xf32> to vector<8x32xf32>
    %16 = vector.extract_strided_slice %11 {offsets = [0, 0], sizes = [16, 32], strides = [1, 1]} : vector<16x128xf32> to vector<16x32xf32>
    %17 = vector.extract_strided_slice %12 {offsets = [0, 0], sizes = [16, 32], strides = [1, 1]} : vector<16x128xf32> to vector<16x32xf32>
    %cst_12 = arith.constant dense<0.000000e+00> : vector<8x16xf32>
    %18 = tpu.matmul %15, %16, %cst_12 {dimension_numbers = #tpu.dot_dimension_numbers<[1], [1], [0], [0], [0, 0, 1, 0], [], []>} : vector<8x32xf32>, vector<16x32xf32>, vector<8x16xf32> -> vector<8x16xf32>
    %cst_13 = arith.constant dense<0xFF800000> : vector<8xf32>
    %19 = vector.multi_reduction <maximumf>, %18, %cst_13 [1] : vector<8x16xf32> to vector<8xf32>
    %20 = vector.shape_cast %19 : vector<8xf32> to vector<8x1xf32>
    %21 = vector.broadcast %20 : vector<8x1xf32> to vector<8x16xf32>
    %22 = arith.subf %18, %21 : vector<8x16xf32>
    %23 = math.exp %22 : vector<8x16xf32>
    %cst_14 = arith.constant dense<0.000000e+00> : vector<8xf32>
    %24 = vector.multi_reduction <add>, %23, %cst_14 [1] : vector<8x16xf32> to vector<8xf32>
    %25 = vector.shape_cast %24 : vector<8xf32> to vector<8x1xf32>
    %26 = tpu.reciprocal %25 {approx = true} : vector<8x1xf32> -> vector<8x1xf32>
    %27 = vector.broadcast %26 : vector<8x1xf32> to vector<8x16xf32>
    %28 = arith.mulf %23, %27 : vector<8x16xf32>
    %cst_15 = arith.constant dense<0.000000e+00> : vector<8x32xf32>
    %29 = tpu.matmul %28, %17, %cst_15 {dimension_numbers = #tpu.dot_dimension_numbers<[1], [0], [0], [1], [0, 0, 1, 1], [], []>} : vector<8x16xf32>, vector<16x32xf32>, vector<8x32xf32> -> vector<8x32xf32>
    %30 = vector.extract_strided_slice %10 {offsets = [0, 32], sizes = [8, 32], strides = [1, 1]} : vector<8x128xf32> to vector<8x32xf32>
    %31 = vector.extract_strided_slice %11 {offsets = [0, 32], sizes = [16, 32], strides = [1, 1]} : vector<16x128xf32> to vector<16x32xf32>
    %32 = vector.extract_strided_slice %12 {offsets = [0, 32], sizes = [16, 32], strides = [1, 1]} : vector<16x128xf32> to vector<16x32xf32>
    %cst_16 = arith.constant dense<0.000000e+00> : vector<8x16xf32>
    %33 = tpu.matmul %30, %31, %cst_16 {dimension_numbers = #tpu.dot_dimension_numbers<[1], [1], [0], [0], [0, 0, 1, 0], [], []>} : vector<8x32xf32>, vector<16x32xf32>, vector<8x16xf32> -> vector<8x16xf32>
    %cst_17 = arith.constant dense<0xFF800000> : vector<8xf32>
    %34 = vector.multi_reduction <maximumf>, %33, %cst_17 [1] : vector<8x16xf32> to vector<8xf32>
    %35 = vector.shape_cast %34 : vector<8xf32> to vector<8x1xf32>
    %36 = vector.broadcast %35 : vector<8x1xf32> to vector<8x16xf32>
    %37 = arith.subf %33, %36 : vector<8x16xf32>
    %38 = math.exp %37 : vector<8x16xf32>
    %cst_18 = arith.constant dense<0.000000e+00> : vector<8xf32>
    %39 = vector.multi_reduction <add>, %38, %cst_18 [1] : vector<8x16xf32> to vector<8xf32>
    %40 = vector.shape_cast %39 : vector<8xf32> to vector<8x1xf32>
    %41 = tpu.reciprocal %40 {approx = true} : vector<8x1xf32> -> vector<8x1xf32>
    %42 = vector.broadcast %41 : vector<8x1xf32> to vector<8x16xf32>
    %43 = arith.mulf %38, %42 : vector<8x16xf32>
    %cst_19 = arith.constant dense<0.000000e+00> : vector<8x32xf32>
    %44 = tpu.matmul %43, %32, %cst_19 {dimension_numbers = #tpu.dot_dimension_numbers<[1], [0], [0], [1], [0, 0, 1, 1], [], []>} : vector<8x16xf32>, vector<16x32xf32>, vector<8x32xf32> -> vector<8x32xf32>
    %45 = vector.extract_strided_slice %10 {offsets = [0, 64], sizes = [8, 32], strides = [1, 1]} : vector<8x128xf32> to vector<8x32xf32>
    %46 = vector.extract_strided_slice %11 {offsets = [0, 64], sizes = [16, 32], strides = [1, 1]} : vector<16x128xf32> to vector<16x32xf32>
    %47 = vector.extract_strided_slice %12 {offsets = [0, 64], sizes = [16, 32], strides = [1, 1]} : vector<16x128xf32> to vector<16x32xf32>
    %cst_20 = arith.constant dense<0.000000e+00> : vector<8x16xf32>
    %48 = tpu.matmul %45, %46, %cst_20 {dimension_numbers = #tpu.dot_dimension_numbers<[1], [1], [0], [0], [0, 0, 1, 0], [], []>} : vector<8x32xf32>, vector<16x32xf32>, vector<8x16xf32> -> vector<8x16xf32>
    %cst_21 = arith.constant dense<0xFF800000> : vector<8xf32>
    %49 = vector.multi_reduction <maximumf>, %48, %cst_21 [1] : vector<8x16xf32> to vector<8xf32>
    %50 = vector.shape_cast %49 : vector<8xf32> to vector<8x1xf32>
    %51 = vector.broadcast %50 : vector<8x1xf32> to vector<8x16xf32>
    %52 = arith.subf %48, %51 : vector<8x16xf32>
    %53 = math.exp %52 : vector<8x16xf32>
    %cst_22 = arith.constant dense<0.000000e+00> : vector<8xf32>
    %54 = vector.multi_reduction <add>, %53, %cst_22 [1] : vector<8x16xf32> to vector<8xf32>
    %55 = vector.shape_cast %54 : vector<8xf32> to vector<8x1xf32>
    %56 = tpu.reciprocal %55 {approx = true} : vector<8x1xf32> -> vector<8x1xf32>
    %57 = vector.broadcast %56 : vector<8x1xf32> to vector<8x16xf32>
    %58 = arith.mulf %53, %57 : vector<8x16xf32>
    %cst_23 = arith.constant dense<0.000000e+00> : vector<8x32xf32>
    %59 = tpu.matmul %58, %47, %cst_23 {dimension_numbers = #tpu.dot_dimension_numbers<[1], [0], [0], [1], [0, 0, 1, 1], [], []>} : vector<8x16xf32>, vector<16x32xf32>, vector<8x32xf32> -> vector<8x32xf32>
    %60 = vector.extract_strided_slice %10 {offsets = [0, 96], sizes = [8, 32], strides = [1, 1]} : vector<8x128xf32> to vector<8x32xf32>
    %61 = vector.extract_strided_slice %11 {offsets = [0, 96], sizes = [16, 32], strides = [1, 1]} : vector<16x128xf32> to vector<16x32xf32>
    %62 = vector.extract_strided_slice %12 {offsets = [0, 96], sizes = [16, 32], strides = [1, 1]} : vector<16x128xf32> to vector<16x32xf32>
    %cst_24 = arith.constant dense<0.000000e+00> : vector<8x16xf32>
    %63 = tpu.matmul %60, %61, %cst_24 {dimension_numbers = #tpu.dot_dimension_numbers<[1], [1], [0], [0], [0, 0, 1, 0], [], []>} : vector<8x32xf32>, vector<16x32xf32>, vector<8x16xf32> -> vector<8x16xf32>
    %cst_25 = arith.constant dense<0xFF800000> : vector<8xf32>
    %64 = vector.multi_reduction <maximumf>, %63, %cst_25 [1] : vector<8x16xf32> to vector<8xf32>
    %65 = vector.shape_cast %64 : vector<8xf32> to vector<8x1xf32>
    %66 = vector.broadcast %65 : vector<8x1xf32> to vector<8x16xf32>
    %67 = arith.subf %63, %66 : vector<8x16xf32>
    %68 = math.exp %67 : vector<8x16xf32>
    %cst_26 = arith.constant dense<0.000000e+00> : vector<8xf32>
    %69 = vector.multi_reduction <add>, %68, %cst_26 [1] : vector<8x16xf32> to vector<8xf32>
    %70 = vector.shape_cast %69 : vector<8xf32> to vector<8x1xf32>
    %71 = tpu.reciprocal %70 {approx = true} : vector<8x1xf32> -> vector<8x1xf32>
    %72 = vector.broadcast %71 : vector<8x1xf32> to vector<8x16xf32>
    %73 = arith.mulf %68, %72 : vector<8x16xf32>
    %cst_27 = arith.constant dense<0.000000e+00> : vector<8x32xf32>
    %74 = tpu.matmul %73, %62, %cst_27 {dimension_numbers = #tpu.dot_dimension_numbers<[1], [0], [0], [1], [0, 0, 1, 1], [], []>} : vector<8x16xf32>, vector<16x32xf32>, vector<8x32xf32> -> vector<8x32xf32>
    %75 = tpu.concatenate %29, %44, %59, %74 in 1 : vector<8x32xf32>, vector<8x32xf32>, vector<8x32xf32>, vector<8x32xf32> -> vector<8x128xf32>
    %c0_28 = arith.constant 0 : index
    %c0_29 = arith.constant 0 : index
    %c0_30 = arith.constant 0 : index
    %76 = vector.load %arg5[%c0_28, %c0_29, %c0_30] : memref<2x128x128xf32, #tpu.memory_space<vmem>>, vector<1x128x128xf32>
    %77 = vector.shape_cast %76 : vector<1x128x128xf32> to vector<128x128xf32>
    %cst_31 = arith.constant dense<0.000000e+00> : vector<8x128xf32>
    %78 = tpu.matmul %75, %77, %cst_31 {dimension_numbers = #tpu.dot_dimension_numbers<[1], [0], [0], [1], [0, 0, 1, 1], [], []>} : vector<8x128xf32>, vector<128x128xf32>, vector<8x128xf32> -> vector<8x128xf32>
    %c0_32 = arith.constant 0 : index
    %c0_33 = arith.constant 0 : index
    %c0_34 = arith.constant 0 : index
    %79 = vector.load %arg8[%c0_32, %c0_33, %c0_34] : memref<2x6x128xf32, #tpu.memory_space<vmem>>, vector<1x1x128xf32>
    %80 = vector.shape_cast %79 : vector<1x1x128xf32> to vector<128xf32>
    %81 = vector.shape_cast %80 : vector<128xf32> to vector<1x128xf32>
    %82 = vector.broadcast %81 : vector<1x128xf32> to vector<8x128xf32>
    %83 = arith.addf %78, %82 : vector<8x128xf32>
    %84 = arith.addf %14, %83 : vector<8x128xf32>
    %c0_35 = arith.constant 0 : index
    %c1 = arith.constant 1 : index
    %c0_36 = arith.constant 0 : index
    %85 = vector.load %arg8[%c0_35, %c1, %c0_36] : memref<2x6x128xf32, #tpu.memory_space<vmem>>, vector<1x1x128xf32>
    %86 = vector.shape_cast %85 : vector<1x1x128xf32> to vector<128xf32>
    %c0_37 = arith.constant 0 : index
    %c2 = arith.constant 2 : index
    %c0_38 = arith.constant 0 : index
    %87 = vector.load %arg8[%c0_37, %c2, %c0_38] : memref<2x6x128xf32, #tpu.memory_space<vmem>>, vector<1x1x128xf32>
    %88 = vector.shape_cast %87 : vector<1x1x128xf32> to vector<128xf32>
    %cst_39 = arith.constant dense<0.000000e+00> : vector<8xf32>
    %89 = vector.multi_reduction <add>, %84, %cst_39 [1] : vector<8x128xf32> to vector<8xf32>
    %90 = vector.shape_cast %89 : vector<8xf32> to vector<8x1xf32>
    %cst_40 = arith.constant 1.280000e+02 : f32
    %91 = vector.broadcast %cst_40 : f32 to vector<8x1xf32>
    %92 = arith.divf %90, %91 : vector<8x1xf32>
    %93 = vector.broadcast %92 : vector<8x1xf32> to vector<8x128xf32>
    %94 = arith.subf %84, %93 : vector<8x128xf32>
    %95 = arith.mulf %94, %94 : vector<8x128xf32>
    %cst_41 = arith.constant dense<0.000000e+00> : vector<8xf32>
    %96 = vector.multi_reduction <add>, %95, %cst_41 [1] : vector<8x128xf32> to vector<8xf32>
    %97 = vector.shape_cast %96 : vector<8xf32> to vector<8x1xf32>
    %cst_42 = arith.constant 1.280000e+02 : f32
    %98 = vector.broadcast %cst_42 : f32 to vector<8x1xf32>
    %99 = arith.divf %97, %98 : vector<8x1xf32>
    %100 = vector.broadcast %92 : vector<8x1xf32> to vector<8x128xf32>
    %101 = arith.subf %84, %100 : vector<8x128xf32>
    %cst_43 = arith.constant 9.99999974E-6 : f32
    %102 = vector.broadcast %cst_43 : f32 to vector<8x1xf32>
    %103 = arith.addf %99, %102 : vector<8x1xf32>
    %104 = math.rsqrt %103 : vector<8x1xf32>
    %105 = vector.broadcast %104 : vector<8x1xf32> to vector<8x128xf32>
    %106 = arith.mulf %101, %105 : vector<8x128xf32>
    %107 = vector.shape_cast %86 : vector<128xf32> to vector<1x128xf32>
    %108 = vector.broadcast %107 : vector<1x128xf32> to vector<8x128xf32>
    %109 = arith.mulf %106, %108 : vector<8x128xf32>
    %110 = vector.shape_cast %88 : vector<128xf32> to vector<1x128xf32>
    %111 = vector.broadcast %110 : vector<1x128xf32> to vector<8x128xf32>
    %112 = arith.addf %109, %111 : vector<8x128xf32>
    %c0_44 = arith.constant 0 : index
    %c0_45 = arith.constant 0 : index
    %c0_46 = arith.constant 0 : index
    %c0_47 = arith.constant 0 : index
    %113 = vector.load %arg6[%c0_44, %c0_45, %c0_46, %c0_47] : memref<2x2x128x256xf32, #tpu.memory_space<vmem>>, vector<1x1x128x256xf32>
    %114 = vector.shape_cast %113 : vector<1x1x128x256xf32> to vector<128x256xf32>
    %cst_48 = arith.constant dense<0.000000e+00> : vector<8x256xf32>
    %115 = tpu.matmul %112, %114, %cst_48 {dimension_numbers = #tpu.dot_dimension_numbers<[1], [0], [0], [1], [0, 0, 1, 1], [], []>} : vector<8x128xf32>, vector<128x256xf32>, vector<8x256xf32> -> vector<8x256xf32>
    %c0_49 = arith.constant 0 : index
    %c1_50 = arith.constant 1 : index
    %c0_51 = arith.constant 0 : index
    %c0_52 = arith.constant 0 : index
    %116 = vector.load %arg6[%c0_49, %c1_50, %c0_51, %c0_52] : memref<2x2x128x256xf32, #tpu.memory_space<vmem>>, vector<1x1x128x256xf32>
    %117 = vector.shape_cast %116 : vector<1x1x128x256xf32> to vector<128x256xf32>
    %cst_53 = arith.constant dense<0.000000e+00> : vector<8x256xf32>
    %118 = tpu.matmul %83, %117, %cst_53 {dimension_numbers = #tpu.dot_dimension_numbers<[1], [0], [0], [1], [0, 0, 1, 1], [], []>} : vector<8x128xf32>, vector<128x256xf32>, vector<8x256xf32> -> vector<8x256xf32>
    %119 = arith.addf %115, %118 : vector<8x256xf32>
    %c0_54 = arith.constant 0 : index
    %c0_55 = arith.constant 0 : index
    %c0_56 = arith.constant 0 : index
    %120 = vector.load %arg9[%c0_54, %c0_55, %c0_56] : memref<2x3x256xf32, #tpu.memory_space<vmem>>, vector<1x1x256xf32>
    %121 = vector.shape_cast %120 : vector<1x1x256xf32> to vector<256xf32>
    %122 = vector.shape_cast %121 : vector<256xf32> to vector<1x256xf32>
    %123 = vector.broadcast %122 : vector<1x256xf32> to vector<8x256xf32>
    %124 = arith.addf %119, %123 : vector<8x256xf32>
    %c0_57 = arith.constant 0 : index
    %c1_58 = arith.constant 1 : index
    %c0_59 = arith.constant 0 : index
    %125 = vector.load %arg9[%c0_57, %c1_58, %c0_59] : memref<2x3x256xf32, #tpu.memory_space<vmem>>, vector<1x1x256xf32>
    %126 = vector.shape_cast %125 : vector<1x1x256xf32> to vector<256xf32>
    %c0_60 = arith.constant 0 : index
    %c2_61 = arith.constant 2 : index
    %c0_62 = arith.constant 0 : index
    %127 = vector.load %arg9[%c0_60, %c2_61, %c0_62] : memref<2x3x256xf32, #tpu.memory_space<vmem>>, vector<1x1x256xf32>
    %128 = vector.shape_cast %127 : vector<1x1x256xf32> to vector<256xf32>
    %cst_63 = arith.constant dense<0.000000e+00> : vector<8xf32>
    %129 = vector.multi_reduction <add>, %124, %cst_63 [1] : vector<8x256xf32> to vector<8xf32>
    %130 = vector.shape_cast %129 : vector<8xf32> to vector<8x1xf32>
    %cst_64 = arith.constant 2.560000e+02 : f32
    %131 = vector.broadcast %cst_64 : f32 to vector<8x1xf32>
    %132 = arith.divf %130, %131 : vector<8x1xf32>
    %133 = vector.broadcast %132 : vector<8x1xf32> to vector<8x256xf32>
    %134 = arith.subf %124, %133 : vector<8x256xf32>
    %135 = arith.mulf %134, %134 : vector<8x256xf32>
    %cst_65 = arith.constant dense<0.000000e+00> : vector<8xf32>
    %136 = vector.multi_reduction <add>, %135, %cst_65 [1] : vector<8x256xf32> to vector<8xf32>
    %137 = vector.shape_cast %136 : vector<8xf32> to vector<8x1xf32>
    %cst_66 = arith.constant 2.560000e+02 : f32
    %138 = vector.broadcast %cst_66 : f32 to vector<8x1xf32>
    %139 = arith.divf %137, %138 : vector<8x1xf32>
    %140 = vector.broadcast %132 : vector<8x1xf32> to vector<8x256xf32>
    %141 = arith.subf %124, %140 : vector<8x256xf32>
    %cst_67 = arith.constant 9.99999974E-6 : f32
    %142 = vector.broadcast %cst_67 : f32 to vector<8x1xf32>
    %143 = arith.addf %139, %142 : vector<8x1xf32>
    %144 = math.rsqrt %143 : vector<8x1xf32>
    %145 = vector.broadcast %144 : vector<8x1xf32> to vector<8x256xf32>
    %146 = arith.mulf %141, %145 : vector<8x256xf32>
    %147 = vector.shape_cast %126 : vector<256xf32> to vector<1x256xf32>
    %148 = vector.broadcast %147 : vector<1x256xf32> to vector<8x256xf32>
    %149 = arith.mulf %146, %148 : vector<8x256xf32>
    %150 = vector.shape_cast %128 : vector<256xf32> to vector<1x256xf32>
    %151 = vector.broadcast %150 : vector<1x256xf32> to vector<8x256xf32>
    %152 = arith.addf %149, %151 : vector<8x256xf32>
    %cst_68 = arith.constant 0.000000e+00 : f32
    %153 = vector.broadcast %cst_68 : f32 to vector<8x256xf32>
    %154 = arith.maximumf %152, %153 : vector<8x256xf32>
    %c0_69 = arith.constant 0 : index
    %c0_70 = arith.constant 0 : index
    %c0_71 = arith.constant 0 : index
    %155 = vector.load %arg7[%c0_69, %c0_70, %c0_71] : memref<2x256x128xf32, #tpu.memory_space<vmem>>, vector<1x256x128xf32>
    %156 = vector.shape_cast %155 : vector<1x256x128xf32> to vector<256x128xf32>
    %cst_72 = arith.constant dense<0.000000e+00> : vector<8x128xf32>
    %157 = tpu.matmul %154, %156, %cst_72 {dimension_numbers = #tpu.dot_dimension_numbers<[1], [0], [0], [1], [0, 0, 1, 1], [], []>} : vector<8x256xf32>, vector<256x128xf32>, vector<8x128xf32> -> vector<8x128xf32>
    %c0_73 = arith.constant 0 : index
    %c3 = arith.constant 3 : index
    %c0_74 = arith.constant 0 : index
    %158 = vector.load %arg8[%c0_73, %c3, %c0_74] : memref<2x6x128xf32, #tpu.memory_space<vmem>>, vector<1x1x128xf32>
    %159 = vector.shape_cast %158 : vector<1x1x128xf32> to vector<128xf32>
    %160 = vector.shape_cast %159 : vector<128xf32> to vector<1x128xf32>
    %161 = vector.broadcast %160 : vector<1x128xf32> to vector<8x128xf32>
    %162 = arith.addf %157, %161 : vector<8x128xf32>
    %163 = arith.addf %112, %162 : vector<8x128xf32>
    %c0_75 = arith.constant 0 : index
    %c4 = arith.constant 4 : index
    %c0_76 = arith.constant 0 : index
    %164 = vector.load %arg8[%c0_75, %c4, %c0_76] : memref<2x6x128xf32, #tpu.memory_space<vmem>>, vector<1x1x128xf32>
    %165 = vector.shape_cast %164 : vector<1x1x128xf32> to vector<128xf32>
    %c0_77 = arith.constant 0 : index
    %c5 = arith.constant 5 : index
    %c0_78 = arith.constant 0 : index
    %166 = vector.load %arg8[%c0_77, %c5, %c0_78] : memref<2x6x128xf32, #tpu.memory_space<vmem>>, vector<1x1x128xf32>
    %167 = vector.shape_cast %166 : vector<1x1x128xf32> to vector<128xf32>
    %cst_79 = arith.constant dense<0.000000e+00> : vector<8xf32>
    %168 = vector.multi_reduction <add>, %163, %cst_79 [1] : vector<8x128xf32> to vector<8xf32>
    %169 = vector.shape_cast %168 : vector<8xf32> to vector<8x1xf32>
    %cst_80 = arith.constant 1.280000e+02 : f32
    %170 = vector.broadcast %cst_80 : f32 to vector<8x1xf32>
    %171 = arith.divf %169, %170 : vector<8x1xf32>
    %172 = vector.broadcast %171 : vector<8x1xf32> to vector<8x128xf32>
    %173 = arith.subf %163, %172 : vector<8x128xf32>
    %174 = arith.mulf %173, %173 : vector<8x128xf32>
    %cst_81 = arith.constant dense<0.000000e+00> : vector<8xf32>
    %175 = vector.multi_reduction <add>, %174, %cst_81 [1] : vector<8x128xf32> to vector<8xf32>
    %176 = vector.shape_cast %175 : vector<8xf32> to vector<8x1xf32>
    %cst_82 = arith.constant 1.280000e+02 : f32
    %177 = vector.broadcast %cst_82 : f32 to vector<8x1xf32>
    %178 = arith.divf %176, %177 : vector<8x1xf32>
    %179 = vector.broadcast %171 : vector<8x1xf32> to vector<8x128xf32>
    %180 = arith.subf %163, %179 : vector<8x128xf32>
    %cst_83 = arith.constant 9.99999974E-6 : f32
    %181 = vector.broadcast %cst_83 : f32 to vector<8x1xf32>
    %182 = arith.addf %178, %181 : vector<8x1xf32>
    %183 = math.rsqrt %182 : vector<8x1xf32>
    %184 = vector.broadcast %183 : vector<8x1xf32> to vector<8x128xf32>
    %185 = arith.mulf %180, %184 : vector<8x128xf32>
    %186 = vector.shape_cast %165 : vector<128xf32> to vector<1x128xf32>
    %187 = vector.broadcast %186 : vector<1x128xf32> to vector<8x128xf32>
    %188 = arith.mulf %185, %187 : vector<8x128xf32>
    %189 = vector.shape_cast %167 : vector<128xf32> to vector<1x128xf32>
    %190 = vector.broadcast %189 : vector<1x128xf32> to vector<8x128xf32>
    %191 = arith.addf %188, %190 : vector<8x128xf32>
    %c0_84 = arith.constant 0 : index
    %c0_85 = arith.constant 0 : index
    %c0_86 = arith.constant 0 : index
    %192 = vector.load %arg10[%c0_84, %c0_85, %c0_86] : memref<1x8x128xf32, #tpu.memory_space<vmem>>, vector<1x8x128xf32>
    %193 = vector.shape_cast %192 : vector<1x8x128xf32> to vector<8x128xf32>
    %194 = vector.shape_cast %191 : vector<8x128xf32> to vector<1x8x128xf32>
    tpu.vector_store %arg10[%c0_84, %c0_85, %c0_86], %194 {strides = array<i32>} : memref<1x8x128xf32, #tpu.memory_space<vmem>>, vector<1x8x128xf32>,
    %195 = vector.extract_strided_slice %9 {offsets = [8, 384], sizes = [16, 128], strides = [1, 1]} : vector<24x768xf32> to vector<16x128xf32>
    %196 = vector.extract_strided_slice %9 {offsets = [0, 512], sizes = [8, 128], strides = [1, 1]} : vector<24x768xf32> to vector<8x128xf32>
    %197 = vector.extract_strided_slice %9 {offsets = [0, 640], sizes = [8, 128], strides = [1, 1]} : vector<24x768xf32> to vector<8x128xf32>
    %c0_87 = arith.constant 0 : index
    %c0_88 = arith.constant 0 : index
    %c0_89 = arith.constant 0 : index
    %198 = vector.load %arg2[%c0_87, %c0_88, %c0_89] : memref<1x16x128xf32, #tpu.memory_space<vmem>>, vector<1x16x128xf32>
    %199 = vector.shape_cast %198 : vector<1x16x128xf32> to vector<16x128xf32>
    %200 = vector.extract_strided_slice %195 {offsets = [0, 0], sizes = [16, 32], strides = [1, 1]} : vector<16x128xf32> to vector<16x32xf32>
    %201 = vector.extract_strided_slice %196 {offsets = [0, 0], sizes = [8, 32], strides = [1, 1]} : vector<8x128xf32> to vector<8x32xf32>
    %202 = vector.extract_strided_slice %197 {offsets = [0, 0], sizes = [8, 32], strides = [1, 1]} : vector<8x128xf32> to vector<8x32xf32>
    %cst_90 = arith.constant dense<0.000000e+00> : vector<16x8xf32>
    %203 = tpu.matmul %200, %201, %cst_90 {dimension_numbers = #tpu.dot_dimension_numbers<[1], [1], [0], [0], [0, 0, 1, 0], [], []>} : vector<16x32xf32>, vector<8x32xf32>, vector<16x8xf32> -> vector<16x8xf32>
    %cst_91 = arith.constant dense<0xFF800000> : vector<16xf32>
    %204 = vector.multi_reduction <maximumf>, %203, %cst_91 [1] : vector<16x8xf32> to vector<16xf32>
    %205 = vector.shape_cast %204 : vector<16xf32> to vector<16x1xf32>
    %206 = vector.broadcast %205 : vector<16x1xf32> to vector<16x8xf32>
    %207 = arith.subf %203, %206 : vector<16x8xf32>
    %208 = math.exp %207 : vector<16x8xf32>
    %cst_92 = arith.constant dense<0.000000e+00> : vector<16xf32>
    %209 = vector.multi_reduction <add>, %208, %cst_92 [1] : vector<16x8xf32> to vector<16xf32>
    %210 = vector.shape_cast %209 : vector<16xf32> to vector<16x1xf32>
    %211 = tpu.reciprocal %210 {approx = true} : vector<16x1xf32> -> vector<16x1xf32>
    %212 = vector.broadcast %211 : vector<16x1xf32> to vector<16x8xf32>
    %213 = arith.mulf %208, %212 : vector<16x8xf32>
    %cst_93 = arith.constant dense<0.000000e+00> : vector<16x32xf32>
    %214 = tpu.matmul %213, %202, %cst_93 {dimension_numbers = #tpu.dot_dimension_numbers<[1], [0], [0], [1], [0, 0, 1, 1], [], []>} : vector<16x8xf32>, vector<8x32xf32>, vector<16x32xf32> -> vector<16x32xf32>
    %215 = vector.extract_strided_slice %195 {offsets = [0, 32], sizes = [16, 32], strides = [1, 1]} : vector<16x128xf32> to vector<16x32xf32>
    %216 = vector.extract_strided_slice %196 {offsets = [0, 32], sizes = [8, 32], strides = [1, 1]} : vector<8x128xf32> to vector<8x32xf32>
    %217 = vector.extract_strided_slice %197 {offsets = [0, 32], sizes = [8, 32], strides = [1, 1]} : vector<8x128xf32> to vector<8x32xf32>
    %cst_94 = arith.constant dense<0.000000e+00> : vector<16x8xf32>
    %218 = tpu.matmul %215, %216, %cst_94 {dimension_numbers = #tpu.dot_dimension_numbers<[1], [1], [0], [0], [0, 0, 1, 0], [], []>} : vector<16x32xf32>, vector<8x32xf32>, vector<16x8xf32> -> vector<16x8xf32>
    %cst_95 = arith.constant dense<0xFF800000> : vector<16xf32>
    %219 = vector.multi_reduction <maximumf>, %218, %cst_95 [1] : vector<16x8xf32> to vector<16xf32>
    %220 = vector.shape_cast %219 : vector<16xf32> to vector<16x1xf32>
    %221 = vector.broadcast %220 : vector<16x1xf32> to vector<16x8xf32>
    %222 = arith.subf %218, %221 : vector<16x8xf32>
    %223 = math.exp %222 : vector<16x8xf32>
    %cst_96 = arith.constant dense<0.000000e+00> : vector<16xf32>
    %224 = vector.multi_reduction <add>, %223, %cst_96 [1] : vector<16x8xf32> to vector<16xf32>
    %225 = vector.shape_cast %224 : vector<16xf32> to vector<16x1xf32>
    %226 = tpu.reciprocal %225 {approx = true} : vector<16x1xf32> -> vector<16x1xf32>
    %227 = vector.broadcast %226 : vector<16x1xf32> to vector<16x8xf32>
    %228 = arith.mulf %223, %227 : vector<16x8xf32>
    %cst_97 = arith.constant dense<0.000000e+00> : vector<16x32xf32>
    %229 = tpu.matmul %228, %217, %cst_97 {dimension_numbers = #tpu.dot_dimension_numbers<[1], [0], [0], [1], [0, 0, 1, 1], [], []>} : vector<16x8xf32>, vector<8x32xf32>, vector<16x32xf32> -> vector<16x32xf32>
    %230 = vector.extract_strided_slice %195 {offsets = [0, 64], sizes = [16, 32], strides = [1, 1]} : vector<16x128xf32> to vector<16x32xf32>
    %231 = vector.extract_strided_slice %196 {offsets = [0, 64], sizes = [8, 32], strides = [1, 1]} : vector<8x128xf32> to vector<8x32xf32>
    %232 = vector.extract_strided_slice %197 {offsets = [0, 64], sizes = [8, 32], strides = [1, 1]} : vector<8x128xf32> to vector<8x32xf32>
    %cst_98 = arith.constant dense<0.000000e+00> : vector<16x8xf32>
    %233 = tpu.matmul %230, %231, %cst_98 {dimension_numbers = #tpu.dot_dimension_numbers<[1], [1], [0], [0], [0, 0, 1, 0], [], []>} : vector<16x32xf32>, vector<8x32xf32>, vector<16x8xf32> -> vector<16x8xf32>
    %cst_99 = arith.constant dense<0xFF800000> : vector<16xf32>
    %234 = vector.multi_reduction <maximumf>, %233, %cst_99 [1] : vector<16x8xf32> to vector<16xf32>
    %235 = vector.shape_cast %234 : vector<16xf32> to vector<16x1xf32>
    %236 = vector.broadcast %235 : vector<16x1xf32> to vector<16x8xf32>
    %237 = arith.subf %233, %236 : vector<16x8xf32>
    %238 = math.exp %237 : vector<16x8xf32>
    %cst_100 = arith.constant dense<0.000000e+00> : vector<16xf32>
    %239 = vector.multi_reduction <add>, %238, %cst_100 [1] : vector<16x8xf32> to vector<16xf32>
    %240 = vector.shape_cast %239 : vector<16xf32> to vector<16x1xf32>
    %241 = tpu.reciprocal %240 {approx = true} : vector<16x1xf32> -> vector<16x1xf32>
    %242 = vector.broadcast %241 : vector<16x1xf32> to vector<16x8xf32>
    %243 = arith.mulf %238, %242 : vector<16x8xf32>
    %cst_101 = arith.constant dense<0.000000e+00> : vector<16x32xf32>
    %244 = tpu.matmul %243, %232, %cst_101 {dimension_numbers = #tpu.dot_dimension_numbers<[1], [0], [0], [1], [0, 0, 1, 1], [], []>} : vector<16x8xf32>, vector<8x32xf32>, vector<16x32xf32> -> vector<16x32xf32>
    %245 = vector.extract_strided_slice %195 {offsets = [0, 96], sizes = [16, 32], strides = [1, 1]} : vector<16x128xf32> to vector<16x32xf32>
    %246 = vector.extract_strided_slice %196 {offsets = [0, 96], sizes = [8, 32], strides = [1, 1]} : vector<8x128xf32> to vector<8x32xf32>
    %247 = vector.extract_strided_slice %197 {offsets = [0, 96], sizes = [8, 32], strides = [1, 1]} : vector<8x128xf32> to vector<8x32xf32>
    %cst_102 = arith.constant dense<0.000000e+00> : vector<16x8xf32>
    %248 = tpu.matmul %245, %246, %cst_102 {dimension_numbers = #tpu.dot_dimension_numbers<[1], [1], [0], [0], [0, 0, 1, 0], [], []>} : vector<16x32xf32>, vector<8x32xf32>, vector<16x8xf32> -> vector<16x8xf32>
    %cst_103 = arith.constant dense<0xFF800000> : vector<16xf32>
    %249 = vector.multi_reduction <maximumf>, %248, %cst_103 [1] : vector<16x8xf32> to vector<16xf32>
    %250 = vector.shape_cast %249 : vector<16xf32> to vector<16x1xf32>
    %251 = vector.broadcast %250 : vector<16x1xf32> to vector<16x8xf32>
    %252 = arith.subf %248, %251 : vector<16x8xf32>
    %253 = math.exp %252 : vector<16x8xf32>
    %cst_104 = arith.constant dense<0.000000e+00> : vector<16xf32>
    %254 = vector.multi_reduction <add>, %253, %cst_104 [1] : vector<16x8xf32> to vector<16xf32>
    %255 = vector.shape_cast %254 : vector<16xf32> to vector<16x1xf32>
    %256 = tpu.reciprocal %255 {approx = true} : vector<16x1xf32> -> vector<16x1xf32>
    %257 = vector.broadcast %256 : vector<16x1xf32> to vector<16x8xf32>
    %258 = arith.mulf %253, %257 : vector<16x8xf32>
    %cst_105 = arith.constant dense<0.000000e+00> : vector<16x32xf32>
    %259 = tpu.matmul %258, %247, %cst_105 {dimension_numbers = #tpu.dot_dimension_numbers<[1], [0], [0], [1], [0, 0, 1, 1], [], []>} : vector<16x8xf32>, vector<8x32xf32>, vector<16x32xf32> -> vector<16x32xf32>
    %260 = tpu.concatenate %214, %229, %244, %259 in 1 : vector<16x32xf32>, vector<16x32xf32>, vector<16x32xf32>, vector<16x32xf32> -> vector<16x128xf32>
    %c1_106 = arith.constant 1 : index
    %c0_107 = arith.constant 0 : index
    %c0_108 = arith.constant 0 : index
    %261 = vector.load %arg5[%c1_106, %c0_107, %c0_108] : memref<2x128x128xf32, #tpu.memory_space<vmem>>, vector<1x128x128xf32>
    %262 = vector.shape_cast %261 : vector<1x128x128xf32> to vector<128x128xf32>
    %cst_109 = arith.constant dense<0.000000e+00> : vector<16x128xf32>
    %263 = tpu.matmul %260, %262, %cst_109 {dimension_numbers = #tpu.dot_dimension_numbers<[1], [0], [0], [1], [0, 0, 1, 1], [], []>} : vector<16x128xf32>, vector<128x128xf32>, vector<16x128xf32> -> vector<16x128xf32>
    %c1_110 = arith.constant 1 : index
    %c0_111 = arith.constant 0 : index
    %c0_112 = arith.constant 0 : index
    %264 = vector.load %arg8[%c1_110, %c0_111, %c0_112] : memref<2x6x128xf32, #tpu.memory_space<vmem>>, vector<1x1x128xf32>
    %265 = vector.shape_cast %264 : vector<1x1x128xf32> to vector<128xf32>
    %266 = vector.shape_cast %265 : vector<128xf32> to vector<1x128xf32>
    %267 = vector.broadcast %266 : vector<1x128xf32> to vector<16x128xf32>
    %268 = arith.addf %263, %267 : vector<16x128xf32>
    %269 = arith.addf %199, %268 : vector<16x128xf32>
    %c1_113 = arith.constant 1 : index
    %c1_114 = arith.constant 1 : index
    %c0_115 = arith.constant 0 : index
    %270 = vector.load %arg8[%c1_113, %c1_114, %c0_115] : memref<2x6x128xf32, #tpu.memory_space<vmem>>, vector<1x1x128xf32>
    %271 = vector.shape_cast %270 : vector<1x1x128xf32> to vector<128xf32>
    %c1_116 = arith.constant 1 : index
    %c2_117 = arith.constant 2 : index
    %c0_118 = arith.constant 0 : index
    %272 = vector.load %arg8[%c1_116, %c2_117, %c0_118] : memref<2x6x128xf32, #tpu.memory_space<vmem>>, vector<1x1x128xf32>
    %273 = vector.shape_cast %272 : vector<1x1x128xf32> to vector<128xf32>
    %cst_119 = arith.constant dense<0.000000e+00> : vector<16xf32>
    %274 = vector.multi_reduction <add>, %269, %cst_119 [1] : vector<16x128xf32> to vector<16xf32>
    %275 = vector.shape_cast %274 : vector<16xf32> to vector<16x1xf32>
    %cst_120 = arith.constant 1.280000e+02 : f32
    %276 = vector.broadcast %cst_120 : f32 to vector<16x1xf32>
    %277 = arith.divf %275, %276 : vector<16x1xf32>
    %278 = vector.broadcast %277 : vector<16x1xf32> to vector<16x128xf32>
    %279 = arith.subf %269, %278 : vector<16x128xf32>
    %280 = arith.mulf %279, %279 : vector<16x128xf32>
    %cst_121 = arith.constant dense<0.000000e+00> : vector<16xf32>
    %281 = vector.multi_reduction <add>, %280, %cst_121 [1] : vector<16x128xf32> to vector<16xf32>
    %282 = vector.shape_cast %281 : vector<16xf32> to vector<16x1xf32>
    %cst_122 = arith.constant 1.280000e+02 : f32
    %283 = vector.broadcast %cst_122 : f32 to vector<16x1xf32>
    %284 = arith.divf %282, %283 : vector<16x1xf32>
    %285 = vector.broadcast %277 : vector<16x1xf32> to vector<16x128xf32>
    %286 = arith.subf %269, %285 : vector<16x128xf32>
    %cst_123 = arith.constant 9.99999974E-6 : f32
    %287 = vector.broadcast %cst_123 : f32 to vector<16x1xf32>
    %288 = arith.addf %284, %287 : vector<16x1xf32>
    %289 = math.rsqrt %288 : vector<16x1xf32>
    %290 = vector.broadcast %289 : vector<16x1xf32> to vector<16x128xf32>
    %291 = arith.mulf %286, %290 : vector<16x128xf32>
    %292 = vector.shape_cast %271 : vector<128xf32> to vector<1x128xf32>
    %293 = vector.broadcast %292 : vector<1x128xf32> to vector<16x128xf32>
    %294 = arith.mulf %291, %293 : vector<16x128xf32>
    %295 = vector.shape_cast %273 : vector<128xf32> to vector<1x128xf32>
    %296 = vector.broadcast %295 : vector<1x128xf32> to vector<16x128xf32>
    %297 = arith.addf %294, %296 : vector<16x128xf32>
    %c1_124 = arith.constant 1 : index
    %c0_125 = arith.constant 0 : index
    %c0_126 = arith.constant 0 : index
    %c0_127 = arith.constant 0 : index
    %298 = vector.load %arg6[%c1_124, %c0_125, %c0_126, %c0_127] : memref<2x2x128x256xf32, #tpu.memory_space<vmem>>, vector<1x1x128x256xf32>
    %299 = vector.shape_cast %298 : vector<1x1x128x256xf32> to vector<128x256xf32>
    %cst_128 = arith.constant dense<0.000000e+00> : vector<16x256xf32>
    %300 = tpu.matmul %297, %299, %cst_128 {dimension_numbers = #tpu.dot_dimension_numbers<[1], [0], [0], [1], [0, 0, 1, 1], [], []>} : vector<16x128xf32>, vector<128x256xf32>, vector<16x256xf32> -> vector<16x256xf32>
    %c1_129 = arith.constant 1 : index
    %c1_130 = arith.constant 1 : index
    %c0_131 = arith.constant 0 : index
    %c0_132 = arith.constant 0 : index
    %301 = vector.load %arg6[%c1_129, %c1_130, %c0_131, %c0_132] : memref<2x2x128x256xf32, #tpu.memory_space<vmem>>, vector<1x1x128x256xf32>
    %302 = vector.shape_cast %301 : vector<1x1x128x256xf32> to vector<128x256xf32>
    %cst_133 = arith.constant dense<0.000000e+00> : vector<16x256xf32>
    %303 = tpu.matmul %268, %302, %cst_133 {dimension_numbers = #tpu.dot_dimension_numbers<[1], [0], [0], [1], [0, 0, 1, 1], [], []>} : vector<16x128xf32>, vector<128x256xf32>, vector<16x256xf32> -> vector<16x256xf32>
    %304 = arith.addf %300, %303 : vector<16x256xf32>
    %c1_134 = arith.constant 1 : index
    %c0_135 = arith.constant 0 : index
    %c0_136 = arith.constant 0 : index
    %305 = vector.load %arg9[%c1_134, %c0_135, %c0_136] : memref<2x3x256xf32, #tpu.memory_space<vmem>>, vector<1x1x256xf32>
    %306 = vector.shape_cast %305 : vector<1x1x256xf32> to vector<256xf32>
    %307 = vector.shape_cast %306 : vector<256xf32> to vector<1x256xf32>
    %308 = vector.broadcast %307 : vector<1x256xf32> to vector<16x256xf32>
    %309 = arith.addf %304, %308 : vector<16x256xf32>
    %c1_137 = arith.constant 1 : index
    %c1_138 = arith.constant 1 : index
    %c0_139 = arith.constant 0 : index
    %310 = vector.load %arg9[%c1_137, %c1_138, %c0_139] : memref<2x3x256xf32, #tpu.memory_space<vmem>>, vector<1x1x256xf32>
    %311 = vector.shape_cast %310 : vector<1x1x256xf32> to vector<256xf32>
    %c1_140 = arith.constant 1 : index
    %c2_141 = arith.constant 2 : index
    %c0_142 = arith.constant 0 : index
    %312 = vector.load %arg9[%c1_140, %c2_141, %c0_142] : memref<2x3x256xf32, #tpu.memory_space<vmem>>, vector<1x1x256xf32>
    %313 = vector.shape_cast %312 : vector<1x1x256xf32> to vector<256xf32>
    %cst_143 = arith.constant dense<0.000000e+00> : vector<16xf32>
    %314 = vector.multi_reduction <add>, %309, %cst_143 [1] : vector<16x256xf32> to vector<16xf32>
    %315 = vector.shape_cast %314 : vector<16xf32> to vector<16x1xf32>
    %cst_144 = arith.constant 2.560000e+02 : f32
    %316 = vector.broadcast %cst_144 : f32 to vector<16x1xf32>
    %317 = arith.divf %315, %316 : vector<16x1xf32>
    %318 = vector.broadcast %317 : vector<16x1xf32> to vector<16x256xf32>
    %319 = arith.subf %309, %318 : vector<16x256xf32>
    %320 = arith.mulf %319, %319 : vector<16x256xf32>
    %cst_145 = arith.constant dense<0.000000e+00> : vector<16xf32>
    %321 = vector.multi_reduction <add>, %320, %cst_145 [1] : vector<16x256xf32> to vector<16xf32>
    %322 = vector.shape_cast %321 : vector<16xf32> to vector<16x1xf32>
    %cst_146 = arith.constant 2.560000e+02 : f32
    %323 = vector.broadcast %cst_146 : f32 to vector<16x1xf32>
    %324 = arith.divf %322, %323 : vector<16x1xf32>
    %325 = vector.broadcast %317 : vector<16x1xf32> to vector<16x256xf32>
    %326 = arith.subf %309, %325 : vector<16x256xf32>
    %cst_147 = arith.constant 9.99999974E-6 : f32
    %327 = vector.broadcast %cst_147 : f32 to vector<16x1xf32>
    %328 = arith.addf %324, %327 : vector<16x1xf32>
    %329 = math.rsqrt %328 : vector<16x1xf32>
    %330 = vector.broadcast %329 : vector<16x1xf32> to vector<16x256xf32>
    %331 = arith.mulf %326, %330 : vector<16x256xf32>
    %332 = vector.shape_cast %311 : vector<256xf32> to vector<1x256xf32>
    %333 = vector.broadcast %332 : vector<1x256xf32> to vector<16x256xf32>
    %334 = arith.mulf %331, %333 : vector<16x256xf32>
    %335 = vector.shape_cast %313 : vector<256xf32> to vector<1x256xf32>
    %336 = vector.broadcast %335 : vector<1x256xf32> to vector<16x256xf32>
    %337 = arith.addf %334, %336 : vector<16x256xf32>
    %cst_148 = arith.constant 0.000000e+00 : f32
    %338 = vector.broadcast %cst_148 : f32 to vector<16x256xf32>
    %339 = arith.maximumf %337, %338 : vector<16x256xf32>
    %c1_149 = arith.constant 1 : index
    %c0_150 = arith.constant 0 : index
    %c0_151 = arith.constant 0 : index
    %340 = vector.load %arg7[%c1_149, %c0_150, %c0_151] : memref<2x256x128xf32, #tpu.memory_space<vmem>>, vector<1x256x128xf32>
    %341 = vector.shape_cast %340 : vector<1x256x128xf32> to vector<256x128xf32>
    %cst_152 = arith.constant dense<0.000000e+00> : vector<16x128xf32>
    %342 = tpu.matmul %339, %341, %cst_152 {dimension_numbers = #tpu.dot_dimension_numbers<[1], [0], [0], [1], [0, 0, 1, 1], [], []>} : vector<16x256xf32>, vector<256x128xf32>, vector<16x128xf32> -> vector<16x128xf32>
    %c1_153 = arith.constant 1 : index
    %c3_154 = arith.constant 3 : index
    %c0_155 = arith.constant 0 : index
    %343 = vector.load %arg8[%c1_153, %c3_154, %c0_155] : memref<2x6x128xf32, #tpu.memory_space<vmem>>, vector<1x1x128xf32>
    %344 = vector.shape_cast %343 : vector<1x1x128xf32> to vector<128xf32>
    %345 = vector.shape_cast %344 : vector<128xf32> to vector<1x128xf32>
    %346 = vector.broadcast %345 : vector<1x128xf32> to vector<16x128xf32>
    %347 = arith.addf %342, %346 : vector<16x128xf32>
    %348 = arith.addf %297, %347 : vector<16x128xf32>
    %c1_156 = arith.constant 1 : index
    %c4_157 = arith.constant 4 : index
    %c0_158 = arith.constant 0 : index
    %349 = vector.load %arg8[%c1_156, %c4_157, %c0_158] : memref<2x6x128xf32, #tpu.memory_space<vmem>>, vector<1x1x128xf32>
    %350 = vector.shape_cast %349 : vector<1x1x128xf32> to vector<128xf32>
    %c1_159 = arith.constant 1 : index
    %c5_160 = arith.constant 5 : index
    %c0_161 = arith.constant 0 : index
    %351 = vector.load %arg8[%c1_159, %c5_160, %c0_161] : memref<2x6x128xf32, #tpu.memory_space<vmem>>, vector<1x1x128xf32>
    %352 = vector.shape_cast %351 : vector<1x1x128xf32> to vector<128xf32>
    %cst_162 = arith.constant dense<0.000000e+00> : vector<16xf32>
    %353 = vector.multi_reduction <add>, %348, %cst_162 [1] : vector<16x128xf32> to vector<16xf32>
    %354 = vector.shape_cast %353 : vector<16xf32> to vector<16x1xf32>
    %cst_163 = arith.constant 1.280000e+02 : f32
    %355 = vector.broadcast %cst_163 : f32 to vector<16x1xf32>
    %356 = arith.divf %354, %355 : vector<16x1xf32>
    %357 = vector.broadcast %356 : vector<16x1xf32> to vector<16x128xf32>
    %358 = arith.subf %348, %357 : vector<16x128xf32>
    %359 = arith.mulf %358, %358 : vector<16x128xf32>
    %cst_164 = arith.constant dense<0.000000e+00> : vector<16xf32>
    %360 = vector.multi_reduction <add>, %359, %cst_164 [1] : vector<16x128xf32> to vector<16xf32>
    %361 = vector.shape_cast %360 : vector<16xf32> to vector<16x1xf32>
    %cst_165 = arith.constant 1.280000e+02 : f32
    %362 = vector.broadcast %cst_165 : f32 to vector<16x1xf32>
    %363 = arith.divf %361, %362 : vector<16x1xf32>
    %364 = vector.broadcast %356 : vector<16x1xf32> to vector<16x128xf32>
    %365 = arith.subf %348, %364 : vector<16x128xf32>
    %cst_166 = arith.constant 9.99999974E-6 : f32
    %366 = vector.broadcast %cst_166 : f32 to vector<16x1xf32>
    %367 = arith.addf %363, %366 : vector<16x1xf32>
    %368 = math.rsqrt %367 : vector<16x1xf32>
    %369 = vector.broadcast %368 : vector<16x1xf32> to vector<16x128xf32>
    %370 = arith.mulf %365, %369 : vector<16x128xf32>
    %371 = vector.shape_cast %350 : vector<128xf32> to vector<1x128xf32>
    %372 = vector.broadcast %371 : vector<1x128xf32> to vector<16x128xf32>
    %373 = arith.mulf %370, %372 : vector<16x128xf32>
    %374 = vector.shape_cast %352 : vector<128xf32> to vector<1x128xf32>
    %375 = vector.broadcast %374 : vector<1x128xf32> to vector<16x128xf32>
    %376 = arith.addf %373, %375 : vector<16x128xf32>
    %c0_167 = arith.constant 0 : index
    %c0_168 = arith.constant 0 : index
    %c0_169 = arith.constant 0 : index
    %377 = vector.load %arg11[%c0_167, %c0_168, %c0_169] : memref<1x16x128xf32, #tpu.memory_space<vmem>>, vector<1x16x128xf32>
    %378 = vector.shape_cast %377 : vector<1x16x128xf32> to vector<16x128xf32>
    %379 = vector.shape_cast %376 : vector<16x128xf32> to vector<1x16x128xf32>
    tpu.vector_store %arg11[%c0_167, %c0_168, %c0_169], %379 {strides = array<i32>} : memref<1x16x128xf32, #tpu.memory_space<vmem>>, vector<1x16x128xf32>,
    return
  }
  func.func @transform_0(%arg0: i32) -> (i32, i32, i32) {
    %c0_i32 = arith.constant 0 : i32
    %c0_i32_0 = arith.constant 0 : i32
    %c0_i32_1 = arith.constant 0 : i32
    return %arg0, %c0_i32, %c0_i32_0 : i32, i32, i32
  }
  func.func @transform_1(%arg0: i32) -> (i32, i32, i32) {
    %c0_i32 = arith.constant 0 : i32
    %c0_i32_0 = arith.constant 0 : i32
    %c0_i32_1 = arith.constant 0 : i32
    return %arg0, %c0_i32, %c0_i32_0 : i32, i32, i32
  }
  func.func @transform_2(%arg0: i32) -> (i32, i32) {
    %c0_i32 = arith.constant 0 : i32
    %c0_i32_0 = arith.constant 0 : i32
    %c0_i32_1 = arith.constant 0 : i32
    return %c0_i32, %c0_i32_0 : i32, i32
  }
  func.func @transform_3(%arg0: i32) -> (i32, i32) {
    %c0_i32 = arith.constant 0 : i32
    %c0_i32_0 = arith.constant 0 : i32
    %c0_i32_1 = arith.constant 0 : i32
    return %c0_i32, %c0_i32_0 : i32, i32
  }
  func.func @transform_4(%arg0: i32) -> (i32, i32, i32) {
    %c0_i32 = arith.constant 0 : i32
    %c0_i32_0 = arith.constant 0 : i32
    %c0_i32_1 = arith.constant 0 : i32
    %c0_i32_2 = arith.constant 0 : i32
    return %c0_i32, %c0_i32_0, %c0_i32_1 : i32, i32, i32
  }
  func.func @transform_5(%arg0: i32) -> (i32, i32, i32, i32) {
    %c0_i32 = arith.constant 0 : i32
    %c0_i32_0 = arith.constant 0 : i32
    %c0_i32_1 = arith.constant 0 : i32
    %c0_i32_2 = arith.constant 0 : i32
    %c0_i32_3 = arith.constant 0 : i32
    return %c0_i32, %c0_i32_0, %c0_i32_1, %c0_i32_2 : i32, i32, i32, i32
  }
  func.func @transform_6(%arg0: i32) -> (i32, i32, i32) {
    %c0_i32 = arith.constant 0 : i32
    %c0_i32_0 = arith.constant 0 : i32
    %c0_i32_1 = arith.constant 0 : i32
    %c0_i32_2 = arith.constant 0 : i32
    return %c0_i32, %c0_i32_0, %c0_i32_1 : i32, i32, i32
  }
  func.func @transform_7(%arg0: i32) -> (i32, i32, i32) {
    %c0_i32 = arith.constant 0 : i32
    %c0_i32_0 = arith.constant 0 : i32
    %c0_i32_1 = arith.constant 0 : i32
    %c0_i32_2 = arith.constant 0 : i32
    return %c0_i32, %c0_i32_0, %c0_i32_1 : i32, i32, i32
  }
  func.func @transform_8(%arg0: i32) -> (i32, i32, i32) {
    %c0_i32 = arith.constant 0 : i32
    %c0_i32_0 = arith.constant 0 : i32
    %c0_i32_1 = arith.constant 0 : i32
    %c0_i32_2 = arith.constant 0 : i32
    return %c0_i32, %c0_i32_0, %c0_i32_1 : i32, i32, i32
  }
  func.func @transform_9(%arg0: i32) -> (i32, i32, i32) {
    %c0_i32 = arith.constant 0 : i32
    %c0_i32_0 = arith.constant 0 : i32
    %c0_i32_1 = arith.constant 0 : i32
    return %arg0, %c0_i32, %c0_i32_0 : i32, i32, i32
  }
  func.func @transform_10(%arg0: i32) -> (i32, i32, i32) {
    %c0_i32 = arith.constant 0 : i32
    %c0_i32_0 = arith.constant 0 : i32
    %c0_i32_1 = arith.constant 0 : i32
    return %arg0, %c0_i32, %c0_i32_0 : i32, i32, i32
  }
}

</mosaic_0001>

<bundles_post_ra>
// kernel: alignment_integration_forward.1
= control target key start
LH: loop header
LB: loop body
LE: loop exit
PB: predicated region body
PF: predicated region fallthrough
CT: control target
= control target key end

     0   :  { %s5128_s0 = inlined_call_operand.vmem [shape: f32[2,8,128], index: 0, kind: input, shape index: {}]   ;;  %s5129_s1 = inlined_call_operand.vmem [shape: f32[2,16,128], index: 1, kind: input, shape index: {}]   ;;  %s5130_s2 = inlined_call_operand.hbm [shape: f32[128,768], index: 2, kind: input, shape index: {}]   ;;  %s5131_s3 = inlined_call_operand.vmem [shape: f32[1,768], index: 3, kind: input, shape index: {}]   ;;  %s5132_s4 = inlined_call_operand.hbm [shape: f32[2,128,128], index: 4, kind: input, shape index: {}]   ;;  %s5133_s5 = inlined_call_operand.hbm [shape: f32[2,2,128,256], index: 5, kind: input, shape index: {}]   ;;  %s5134_s6 = inlined_call_operand.hbm [shape: f32[2,256,128], index: 6, kind: input, shape index: {}]   ;;  %s5135_s7 = inlined_call_operand.vmem [shape: f32[2,6,128], index: 7, kind: input, shape index: {}]   ;;  %s5136_s8 = inlined_call_operand.vmem [shape: f32[2,3,256], index: 8, kind: input, shape index: {}]   ;;  %s5137_s9 = inlined_call_operand.hbm [shape: f32[2,8,128], index: 9, kind: output, shape index: {0}]   ;;  %s5138_s10 = inlined_call_operand.hbm [shape: f32[2,16,128], index: 10, kind: output, shape index: {1}]  }
   0x1   :  { %5141 = sst [smem:[#allocation20_spill]] %s5128_s0 }
   0x2   :  { %16 = vsyncpa [#allocation3], 0 }
   0x3   :  { %17 = vsyncpa [#allocation6], 0 }
   0x4   :  { %18 = vsyncpa [#allocation9], 0 }
   0x5   :  { %19 = vsyncpa [#allocation4], 0 }
   0x6   :  { %21 = vsyncpa [#allocation4 + $0x1], 0 }
   0x7   :  { %22 = vsyncpa [#allocation12], 0 }
   0x8   :  { %24 = vsyncpa [#allocation12 + $0x1], 0  ;;  %s4479_s13 = smov 0   ;;  %s4481_s14 = smov 0  }
   0x9   :  { %s4483_s15 = smov 0   ;;  %s4485_s16 = smov 0  }
   0xa LB: > { %5142 = sst [smem:[#allocation18_spill]] %s4399_s15  ;;  %s4500_s17 = sadd.s32 4294967295, %s4403_s16   ;;  %s4403_s16 = sphi %s4485_s16, %s5154_s16   ;;  %s4399_s15 = sphi %s4483_s15, %s5151_s15   ;;  %s4395_s14 = sphi %s4481_s14, %s5153_s14   ;;  %s4391_s13 = sphi %s4479_s13, %s5152_s13  }
   0xb   : > { %s3611_s18 = sadd.s32 4294967294, %s4403_s16   ;;  %s4504_s19 = sadd.s32 1, %s4403_s16  }
   0xc   : > { %s236_s20 = sadd.s32 1, %s4399_s15  ;;  %s233_s21 = ssub.s32 %s4403_s16, %s4504_s19 }
   0xd   : > { %p246_p0 = scmp.ne.s32.totalorder %s4399_s15, %s4395_s14  ;;  %p234_p1 = scmp.eq.s32.totalorder %s233_s21, 0 }
   0xe   : > { %p247_p2 = scmp.eq.s32.totalorder %s4500_s17, 1  ;;  %p252_p3 = scmp.ne.s32.totalorder %s4395_s14, %s4391_s13 }
   0xf   : > { %p253_p4 = scmp.eq.s32.totalorder %s3611_s18, 1  ;;  %p3612_p7 = scmp.ge.s32.totalorder %s4403_s16, 1 }
  0x10   : > { %s4515_s22 = scalar_select %p234_p1, %s4399_s15, %s236_s20  }
  0x11   : > { %p4517_p5 = por %p247_p2, %p246_p0  ;;  %p4521_p6 = por %p253_p4, %p252_p3 }
  0x12   : > { %5143 = sst [smem:[#allocation19_spill]] %s4515_s22  ;;  %p286_p8 = scmp.lt.s32.totalorder %s4403_s16, 3 }
  0x13   : > { %p4058_p9 = scmp.eq.s32.totalorder %s4500_s17, 0  ;;  %s4405_s26 = smov [#allocation5]  }
  0x14   : > { %p4528_p10 = pnand %p3612_p7, %p286_p8  ;;  %s314_s27 = sshll.u32 %s4405_s26, 4  ;;  %s315_s27 = int_to_ptr.vmem [resolvable:$true] %s314_s27 }
  0x15   : > { %s4406_s29 = smov [#allocation2]   ;;  %s4208_s11 = scalar_lea.vmem %s315_s27, 4096 }
  0x16   : > { %p4038_p11 = pneg %p4528_p10  ;;  %s298_s30 = sshll.u32 %s4406_s29, 4  ;;  %s299_s30 = int_to_ptr.vmem [resolvable:$true] %s298_s30 }
  0x17   : > { %p4209_p0 = scmp.ne.s32.totalorder %s315_s27, %s4208_s11  ;;  %p4216_p3 = scmp.lt.s32.totalorder %s315_s27, %s315_s27 }
  0x18   : > { %p4536_p12 = pnand %p4058_p9, %p4038_p11  ;;  %p4217_p4 = scmp.lt.s32.totalorder %s4208_s11, %s4208_s11 }
  0x1a   : > { %p4199_p13 = pneg %p4536_p12  ;;  %p4218_p7 = por %p4217_p4, %p4216_p3 }
  0x1c   : > { %p4211_p1 = pnand %p4209_p0, %p4199_p13 }
  0x1e   : > { %p4212_p2 = pneg %p4211_p1 }
  0x20   : > { %p4219_p8 = pnand %p4218_p7, %p4212_p2 }
  0x22   : > { %4222 = shalt.err (!%p4219_p8)
}
  0x23   : > { %s5140_s12 = smov 128   ;;  %s4408_s18 = smov 8  }
  0x24   : > { %4044 = dma.hbm_to_vmem [thread:$0]  (!%p4536_p12), %s5132_s4, 4096, %s315_s27, [#allocation6], %s5140_s12, %s5140_s12, %s4408_s18  }
  0x25   : > { %s4234_s26 = scalar_lea.vmem %s299_s30, 12288  ;;  %p4242_p2 = scmp.lt.s32.totalorder %s299_s30, %s299_s30 }
  0x26   : > { %p4235_p11 = scmp.ne.s32.totalorder %s299_s30, %s4234_s26  ;;  %p4243_p3 = scmp.lt.s32.totalorder %s4234_s26, %s4234_s26 }
  0x28   : > { %p4237_p0 = pnand %p4235_p11, %p4199_p13  ;;  %p4244_p4 = por %p4243_p3, %p4242_p2 }
  0x2a   : > { %p4238_p1 = pneg %p4237_p0 }
  0x2c   : > { %p4245_p7 = pnand %p4244_p4, %p4238_p1 }
  0x2e   : > { %4248 = shalt.err (!%p4245_p7)
}
  0x2f   : > { %s4409_s29 = smov 768   ;;  %s4410_s11 = smov 48  }
  0x30   : > { %4041 = dma.hbm_to_vmem [thread:$0]  (!%p4536_p12), %s5130_s2, 12288, %s299_s30, [#allocation3], %s4409_s29, %s4409_s29, %s4410_s11  }
  0x31   : > { %s4411_s27 = smov [#allocation7]  }
  0x32   : > { %s327_s20 = sshll.u32 %s4411_s27, 4  ;;  %s328_s20 = int_to_ptr.vmem [resolvable:$true] %s327_s20 }
  0x33   : > { %s4260_s21 = scalar_lea.vmem %s328_s20, 16384  ;;  %p4268_p1 = scmp.lt.s32.totalorder %s328_s20, %s328_s20 }
  0x34   : > { %p4261_p8 = scmp.ne.s32.totalorder %s328_s20, %s4260_s21  ;;  %p4269_p2 = scmp.lt.s32.totalorder %s4260_s21, %s4260_s21 }
  0x36   : > { %p4263_p11 = pnand %p4261_p8, %p4199_p13  ;;  %p4270_p3 = por %p4269_p2, %p4268_p1 }
  0x38   : > { %p4264_p0 = pneg %p4263_p11 }
  0x3a   : > { %p4271_p4 = pnand %p4270_p3, %p4264_p0 }
  0x3c   : > { %4274 = shalt.err (!%p4271_p4)
}
  0x3d   : > { %s4412_s26 = smov 256   ;;  %s4413_s12 = smov 16  }
  0x3e   : > { %4047 = dma.hbm_to_vmem [thread:$0]  (!%p4536_p12), %s5133_s5, 16384, %s328_s20, [#allocation6], %s4412_s26, %s4412_s26, %s4413_s12  }
  0x3f   : > { %s4414_s30 = smov [#allocation8]  }
  0x40   : > { %s340_s29 = sshll.u32 %s4414_s30, 4  ;;  %s341_s29 = int_to_ptr.vmem [resolvable:$true] %s340_s29 }
  0x41   : > { %s4286_s11 = scalar_lea.vmem %s341_s29, 8192  ;;  %p4294_p0 = scmp.lt.s32.totalorder %s341_s29, %s341_s29 }
  0x42   : > { %p4287_p7 = scmp.ne.s32.totalorder %s341_s29, %s4286_s11  ;;  %p4295_p1 = scmp.lt.s32.totalorder %s4286_s11, %s4286_s11 }
  0x44   : > { %p4289_p8 = pnand %p4287_p7, %p4199_p13  ;;  %p4296_p2 = por %p4295_p1, %p4294_p0 }
  0x46   : > { %p4290_p11 = pneg %p4289_p8 }
  0x48   : > { %p4297_p3 = pnand %p4296_p2, %p4290_p11 }
  0x4a   : > { %4300 = shalt.err (!%p4297_p3)
}
  0x4b   : > { %s5148_s27 = smov 128   ;;  %377 = sbr.rel (%p4528_p10) target bundleno = 5065 (0x13c9), region = 56 }
  0x4c   : > { %4050 = dma.hbm_to_vmem [thread:$0]  (!%p4536_p12), %s5134_s6, 8192, %s341_s29, [#allocation9], %s5148_s27, %s5148_s27, %s4408_s18  }
  0x50   : > { %4370 = dma.done.wait (%p4058_p9), [#allocation3], 12288  }
  0x51   : > { %4372 = vsyncadd (%p4058_p9), [#allocation3], 4294955008 }
  0x52   : > { %4374 = dma.done.wait (%p4058_p9), [#allocation6], 20480  }
  0x53   : > { %4376 = vsyncadd (%p4058_p9), [#allocation6], 4294946816 }
  0x54   : > { %4378 = dma.done.wait (%p4058_p9), [#allocation9], 8192  }
  0x55   : > { %4380 = vsyncadd (%p4058_p9), [#allocation9], 4294959104  ;;  %v4415_v0 = vmov 0.0   ;;  %v539_v1 = vld [vmem:[#allocation2 + $0x2d8] sm:$0xff]  ;;  %v538_v2 = vld [vmem:[#allocation2 + $0x2d0] sm:$0xff]  ;;  %p436_p9 = scmp.lt.s32.totalorder %s4500_s17, 1 }
  0x56   : > { %640 = vmatprep.mubr.f32.mxu0 %v4415_v0  ;;  %720 = vmatprep.mubr.f32.mxu1 %v4415_v0  ;;  %v533_v3 = vld [vmem:[#allocation2 + $0x2a8] sm:$0xff]  ;;  %v532_v4 = vld [vmem:[#allocation2 + $0x2a0] sm:$0xff]  ;;  %v527_v5 = vld [vmem:[#allocation2 + $0x278] sm:$0xff]  ;;  %s5149_s0 = sld [smem:[#allocation20_spill]]  ;;  %vm4416_vm0 = vmmov 0   ;;  %vm816_vm1 = vcmask 261120  }
  0x57   : > { %576 = vmatprep.subr.mxu0 %v539_v1  ;;  %v526_v6 = vld [vmem:[#allocation2 + $0x270] sm:$0xff]  ;;  %v521_v7 = vld [vmem:[#allocation2 + $0x248] sm:$0xff]  ;;  %v520_v8 = vld [vmem:[#allocation2 + $0x240] sm:$0xff]  ;;  %s4600_s25 = scalar_select %p436_p9, %s4500_s17, 1  ;;  %vm896_vm2 = vcmask 130048   ;;  %vm1512_vm3 = vcmask 523264  }
  0x58   : > { %577 = vmatpush1.msra.mxu0 %v538_v2  ;;  %v515_v9 = vld [vmem:[#allocation2 + $0x218] sm:$0xff]  ;;  %v514_v10 = vld [vmem:[#allocation2 + $0x210] sm:$0xff]  ;;  %v509_v11 = vld [vmem:[#allocation2 + $0x1e8] sm:$0xff]  ;;  %s4417_s12 = smov 96   ;;  %s4418_s20 = smov 64   ;;  %vm1514_vm4 = vcmask 785408  }
  0x59   : > { %578 = vmatprep.subr.mxu0 %v533_v3  ;;  %v508_v12 = vld [vmem:[#allocation2 + $0x1e0] sm:$0xff]  ;;  %v503_v13 = vld [vmem:[#allocation2 + $0x1b8] sm:$0xff]  ;;  %v502_v14 = vld [vmem:[#allocation2 + $0x1b0] sm:$0xff]  ;;  %s3625_s28 = sshll.u32 %s4600_s25, 3  ;;  %s3694_s15 = sshll.u32 %s4600_s25, 4  ;;  %vm2120_vm5 = vcmask 64512  }
  0x5a   : > { %579 = vmatpush1.msra.mxu0 %v532_v4  ;;  %v497_v15 = vld [vmem:[#allocation2 + $0x188] sm:$0xff]  ;;  %v540_v17 = vld [vmem:[#allocation2 + $0x2e0] sm:$0xff]  ;;  %v535_v18 = vld [vmem:[#allocation2 + $0x2b8] sm:$0xff]  ;;  %s4612_s29 = scalar_lea.vmem %s5129_s1, %s3694_s15  ;;  %s4419_s25 = smov 32  }
  0x5b   : > { %580 = vmatprep.subr.mxu0 %v527_v5  ;;  %v541_v16 = vld [vmem:[#allocation2 + $0x2e8] sm:$0xff]  ;;  %v534_v19 = vld [vmem:[#allocation2 + $0x2b0] sm:$0xff]  ;;  %v496_v20 = vld [vmem:[#allocation2 + $0x180] sm:$0xff]  ;;  %v546_v5 = vlaneseq  ;;  %s4420_s15 = smov [#allocation10]  }
  0x5c   : > { %581 = vmatpush1.msra.mxu0 %v526_v6  ;;  %656 = vmatprep.subr.mxu1 %v541_v16  ;;  %v529_v21 = vld [vmem:[#allocation2 + $0x288] sm:$0xff]  ;;  %v491_v22 = vld [vmem:[#allocation2 + $0x158] sm:$0xff]  ;;  %v528_v23 = vld [vmem:[#allocation2 + $0x280] sm:$0xff]  ;;  %s439_s26 = scalar_lea.vmem %s5149_s0, %s3625_s28  ;;  %s3689_s28 = sshll.u32 %s4500_s17, 7 }
  0x5d   : > { %582 = vmatprep.subr.mxu0 %v521_v7  ;;  %657 = vmatpush1.msra.mxu1 %v540_v17  ;;  %v490_v24 = vld [vmem:[#allocation2 + $0x150] sm:$0xff]  ;;  %v523_v25 = vld [vmem:[#allocation2 + $0x258] sm:$0xff]  ;;  %v485_v26 = vld [vmem:[#allocation2 + $0x128] sm:$0xff]  ;;  %s4305_s30 = sshll.u32 %s4420_s15, 4  ;;  %s4306_s30 = int_to_ptr.vmem [resolvable:$false] %s4305_s30 }
  0x5e   : > { %583 = vmatpush1.msra.mxu0 %v520_v8  ;;  %658 = vmatprep.subr.mxu1 %v535_v18  ;;  %v522_v27 = vld [vmem:[#allocation2 + $0x250] sm:$0xff]  ;;  %v484_v28 = vld [vmem:[#allocation2 + $0x120] sm:$0xff]  ;;  %v517_v29 = vld [vmem:[#allocation2 + $0x228] sm:$0xff]  ;;  %v4634_v8 = vshrl.u32 %v546_v5, 7  ;;  %s4307_s11 = scalar_lea.vmem %s4306_s30, 256 }
  0x5f   : > { %584 = vmatprep.subr.mxu0 %v515_v9  ;;  %659 = vmatpush1.msra.mxu1 %v534_v19  ;;  %v479_v30 = vld [vmem:[#allocation2 + $0xf8] sm:$0xff]  ;;  %v516_v31 = vld [vmem:[#allocation2 + $0x220] sm:$0xff]  ;;  %v478_v32 = vld [vmem:[#allocation2 + $0xf0] sm:$0xff] }
  0x60   : > { %585 = vmatpush1.msra.mxu0 %v514_v10  ;;  %660 = vmatprep.subr.mxu1 %v529_v21  ;;  %v511_v33 = vld [vmem:[#allocation2 + $0x1f8] sm:$0xff]  ;;  %v473_v34 = vld [vmem:[#allocation2 + $0xc8] sm:$0xff]  ;;  %v510_v35 = vld [vmem:[#allocation2 + $0x1f0] sm:$0xff]  ;;  %v4637_v10 = vsub.s32 1, %v4634_v8 }
  0x61   : > { %586 = vmatprep.subr.mxu0 %v509_v11  ;;  %661 = vmatpush1.msra.mxu1 %v528_v23  ;;  %v472_v36 = vld [vmem:[#allocation2 + $0xc0] sm:$0xff]  ;;  %v505_v37 = vld [vmem:[#allocation2 + $0x1c8] sm:$0xff]  ;;  %v467_v38 = vld [vmem:[#allocation2 + $0x98] sm:$0xff] }
  0x62   : > { %587 = vmatpush1.msra.mxu0 %v508_v12  ;;  %662 = vmatprep.subr.mxu1 %v523_v25  ;;  %v504_v39 = vld [vmem:[#allocation2 + $0x1c0] sm:$0xff]  ;;  %v466_v40 = vld [vmem:[#allocation2 + $0x90] sm:$0xff]  ;;  %v499_v41 = vld [vmem:[#allocation2 + $0x198] sm:$0xff] }
  0x63   : > { %588 = vmatprep.subr.mxu0 %v503_v13  ;;  %663 = vmatpush1.msra.mxu1 %v522_v27  ;;  %v461_v42 = vld [vmem:[#allocation2 + $0x68] sm:$0xff]  ;;  %v498_v43 = vld [vmem:[#allocation2 + $0x190] sm:$0xff]  ;;  %v460_v44 = vld [vmem:[#allocation2 + $0x60] sm:$0xff] }
  0x64   : > { %589 = vmatpush1.msra.mxu0 %v502_v14  ;;  %664 = vmatprep.subr.mxu1 %v517_v29  ;;  %v493_v45 = vld [vmem:[#allocation2 + $0x168] sm:$0xff]  ;;  %v455_v46 = vld [vmem:[#allocation2 + $0x38] sm:$0xff]  ;;  %v492_v47 = vld [vmem:[#allocation2 + $0x160] sm:$0xff] }
  0x65   : > { %590 = vmatprep.subr.mxu0 %v497_v15  ;;  %665 = vmatpush1.msra.mxu1 %v516_v31  ;;  %v454_v48 = vld [vmem:[#allocation2 + $0x30] sm:$0xff]  ;;  %v487_v49 = vld [vmem:[#allocation2 + $0x138] sm:$0xff]  ;;  %v449_v50 = vld [vmem:[#allocation2 + $0x8] sm:$0xff]  ;;  %v4647_v15 = vsub.s32 0, %v4634_v8 }
  0x66   : > { %591 = vmatpush1.msra.mxu0 %v496_v20  ;;  %666 = vmatprep.subr.mxu1 %v511_v33  ;;  %v486_v51 = vld [vmem:[#allocation2 + $0x130] sm:$0xff]  ;;  %v448_v52 = vld [vmem:[#allocation2] sm:$0xff]  ;;  %v481_v53 = vld [vmem:[#allocation2 + $0x108] sm:$0xff] }
  0x67   : > { %592 = vmatprep.subr.mxu0 %v491_v22  ;;  %667 = vmatpush1.msra.mxu1 %v510_v35  ;;  %v4607_v54 = vld [vmem:[%s439_s26] sm:$0xff]  ;;  %v475_v56 = vld [vmem:[#allocation2 + $0xd8] sm:$0xff]  ;;  %v474_v57 = vld [vmem:[#allocation2 + $0xd0] sm:$0xff]  ;;  %v556_v22 = vsub.s32 2, %v4634_v8 }
  0x68   : > { %593 = vmatpush1.msra.mxu0 %v490_v24  ;;  %668 = vmatprep.subr.mxu1 %v505_v37  ;;  %v480_v55 = vld [vmem:[#allocation2 + $0x100] sm:$0xff]  ;;  %v469_v58 = vld [vmem:[#allocation2 + $0xa8] sm:$0xff]  ;;  %v463_v62 = vld [vmem:[#allocation2 + $0x78] sm:$0xff] }
  0x69   : > { %594 = vmatprep.subr.mxu0 %v485_v26  ;;  %669 = vmatpush1.msra.mxu1 %v504_v39  ;;  %v4617_v59 = vld [vmem:[%s4612_s29] sm:$0xff]  ;;  %v4622_v60 = vld [vmem:[%s4612_s29 + $0x8] sm:$0xff]  ;;  %v462_v63 = vld [vmem:[#allocation2 + $0x70] sm:$0xff] }
  0x6a   : > { %595 = vmatpush1.msra.mxu0 %v484_v28  ;;  %670 = vmatprep.subr.mxu1 %v499_v41  ;;  %v468_v61 = vld [vmem:[#allocation2 + $0xa0] sm:$0xff]  ;;  %v457_v1 = vld [vmem:[#allocation2 + $0x48] sm:$0xff]  ;;  %v451_v3 = vld [vmem:[#allocation2 + $0x18] sm:$0xff] }
  0x6b   : > { %596 = vmatprep.subr.mxu0 %v479_v30  ;;  %671 = vmatpush1.msra.mxu1 %v498_v43  ;;  %v456_v2 = vld [vmem:[#allocation2 + $0x40] sm:$0xff]  ;;  %v450_v4 = vld [vmem:[#allocation2 + $0x10] sm:$0xff] }
  0x6c   : > { %597 = vmatpush1.msra.mxu0 %v478_v32  ;;  %672 = vmatprep.subr.mxu1 %v493_v45  ;;  %v4642_v12 = vld [vmem:[%s5131_s3] sm:$0x3f]  ;;  %v543_v45 = vld [vmem:[#allocation2 + $0x2f8] sm:$0xff] }
  0x6d   : > { %598 = vmatprep.subr.mxu0 %v473_v34  ;;  %673 = vmatpush1.msra.mxu1 %v492_v47  ;;  %v553_v14 = vrot.slane %v4642_v12, %v4637_v10  ;;  %v549_v18 = vrot.slane %v4642_v12, %v4647_v15  ;;  %v557_v25 = vrot.slane %v4642_v12, %v556_v22  ;;  %v537_v47 = vld [vmem:[#allocation2 + $0x2c8] sm:$0xff]  ;;  %v470_v22 = vld [vmem:[#allocation2 + $0xb0] sm:$0xff] }
  0x6e   : > { %599 = vmatpush1.msra.mxu0 %v472_v36  ;;  %674 = vmatprep.subr.mxu1 %v487_v49  ;;  %v531_v49 = vld [vmem:[#allocation2 + $0x298] sm:$0xff] }
  0x6f   : > { %600 = vmatprep.subr.mxu0 %v467_v38  ;;  %675 = vmatpush1.msra.mxu1 %v486_v51  ;;  %v525_v51 = vld [vmem:[#allocation2 + $0x268] sm:$0xff] }
  0x70   : > { %601 = vmatpush1.msra.mxu0 %v466_v40  ;;  %676 = vmatprep.subr.mxu1 %v481_v53  ;;  %v519_v53 = vld [vmem:[#allocation2 + $0x238] sm:$0xff] }
  0x71   : > { %602 = vmatprep.subr.mxu0 %v461_v42  ;;  %677 = vmatpush1.msra.mxu1 %v480_v55  ;;  %v518_v55 = vld [vmem:[#allocation2 + $0x230] sm:$0xff] }
  0x72   : > { %603 = vmatpush1.msra.mxu0 %v460_v44  ;;  %678 = vmatprep.subr.mxu1 %v475_v56  ;;  %v513_v56 = vld [vmem:[#allocation2 + $0x208] sm:$0xff] }
  0x73   : > { %604 = vmatprep.subr.mxu0 %v455_v46  ;;  %679 = vmatpush1.msra.mxu1 %v474_v57  ;;  %v542_v46 = vld [vmem:[#allocation2 + $0x2f0] sm:$0xff]  ;;  %v512_v57 = vld [vmem:[#allocation2 + $0x200] sm:$0xff] }
  0x74   : > { %605 = vmatpush1.msra.mxu0 %v454_v48  ;;  %680 = vmatprep.subr.mxu1 %v469_v58  ;;  %v536_v48 = vld [vmem:[#allocation2 + $0x2c0] sm:$0xff]  ;;  %v507_v58 = vld [vmem:[#allocation2 + $0x1d8] sm:$0xff] }
  0x75   : > { %606 = vmatprep.subr.mxu0 %v449_v50  ;;  %681 = vmatpush1.msra.mxu1 %v468_v61  ;;  %v530_v50 = vld [vmem:[#allocation2 + $0x290] sm:$0xff] }
  0x76   : > { %607 = vmatpush1.msra.mxu0 %v448_v52  ;;  %682 = vmatprep.subr.mxu1 %v463_v62  ;;  %v524_v52 = vld [vmem:[#allocation2 + $0x260] sm:$0xff]  ;;  %v506_v61 = vld [vmem:[#allocation2 + $0x1d0] sm:$0xff]  ;;  %v501_v62 = vld [vmem:[#allocation2 + $0x1a8] sm:$0xff] }
  0x77   : > { %641 = vmatmul.mubr.f32.vlgmr.msra.gmra.mxu0 %v4607_v54  ;;  %683 = vmatpush1.msra.mxu1 %v462_v63  ;;  %v500_v63 = vld [vmem:[#allocation2 + $0x1a0] sm:$0xff] }
  0x78   : > { %645 = vmatprep.mubr.f32.mxu0 %v4415_v0  ;;  %684 = vmatprep.subr.mxu1 %v457_v1  ;;  %v495_v1 = vld [vmem:[#allocation2 + $0x178] sm:$0xff] }
  0x79   : > { %685 = vmatpush1.msra.mxu1 %v456_v2  ;;  %737 = vmatprep.subr.mxu0 %v543_v45 }
  0x7a   : > { %686 = vmatprep.subr.mxu1 %v451_v3  ;;  %738 = vmatpush1.msra.mxu0 %v542_v46 }
  0x7b   : > { %646 = vmatmul.mubr.f32.gmra.mxu0 %v4617_v59  ;;  %687 = vmatpush1.msra.mxu1 %v450_v4 }
  0x7c   : > { %650 = vmatprep.mubr.f32.mxu0 %v4415_v0  ;;  %721 = vmatmul.mubr.f32.vlgmr.msra.gmra.mxu1 %v4607_v54 }
  0x7d   : > { %3852 = vmatprep.subr.mxu1 %v4415_v0  ;;  %724 = vmatprep.mubr.f32.mxu1 %v4415_v0 }
  0x7e   : > { %739 = vmatprep.subr.mxu0 %v537_v47 }
  0x7f   : > { %651 = vmatmul.mubr.f32.gmra.mxu0 %v4622_v60 }
  0x80   : > { %801 = vmatprep.mubr.f32.mxu0 %v4415_v0  ;;  %725 = vmatmul.mubr.f32.gmra.mxu1 %v4617_v59 }
  0x81   : > { %730 = vmatprep.mubr.f32.mxu1 %v4415_v0  ;;  %740 = vmatpush1.msra.mxu0 %v536_v48 }
  0x82   : > { %741 = vmatprep.subr.mxu0 %v531_v49 }
  0x83   : > { %742 = vmatpush1.msra.mxu0 %v530_v50 }
  0x84   : > { %731 = vmatmul.mubr.f32.gmra.mxu1 %v4622_v60  ;;  %743 = vmatprep.subr.mxu0 %v525_v51 }
  0x85   : > { %3856 = vmatprep.mubr.msk.f32.mxu1 %vm4416_vm0, %v4415_v0  ;;  %744 = vmatpush1.msra.mxu0 %v524_v52 }
  0x86   : > { %745 = vmatprep.subr.mxu0 %v519_v53 }
  0x87   : > { %746 = vmatpush1.msra.mxu0 %v518_v55 }
  0x88   : > { %747 = vmatprep.subr.mxu0 %v513_v56 }
  0x89   : > { %748 = vmatpush1.msra.mxu0 %v512_v57 }
  0x8a   : > { %749 = vmatprep.subr.mxu0 %v507_v58 }
  0x8b   : > { %750 = vmatpush1.msra.mxu0 %v506_v61 }
  0x8c   : > { %751 = vmatprep.subr.mxu0 %v501_v62 }
  0x8d   : > { %752 = vmatpush1.msra.mxu0 %v500_v63 }
  0x8e   : > { %753 = vmatprep.subr.mxu0 %v495_v1 }
 0x137   : > { %v642_v6 = vpop.f32.mrf.mxu0 }
 0x138   : > { %v4664_v20 = vadd.f32 %v642_v6, %v549_v18  ;;  %v476_v18 = vld [vmem:[#allocation2 + $0xe0] sm:$0xff] }
 0x139   : > { %v644_v7 = vpop.f32.mrf.mxu0 }
 0x13a   : > { %v494_v7 = vld [vmem:[#allocation2 + $0x170] sm:$0xff] }
 0x13b   : > { %v647_v9 = vpop.f32.mrf.mxu0  ;;  %754 = vmatpush1.msra.mxu0 %v494_v7 }
 0x13c   : > { %v722_v21 = vpop.f32.mrf.mxu1  ;;  %v489_v9 = vld [vmem:[#allocation2 + $0x148] sm:$0xff] }
 0x13d   : > { %v648_v11 = vpop.f32.mrf.mxu0  ;;  %755 = vmatprep.subr.mxu0 %v489_v9  ;;  %v471_v21 = vld [vmem:[#allocation2 + $0xb8] sm:$0xff] }
 0x13e   : > { %v4658_v19 = vadd.f32 %v648_v11, %v553_v14  ;;  %v723_v23 = vpop.f32.mrf.mxu1  ;;  %v488_v11 = vld [vmem:[#allocation2 + $0x140] sm:$0xff] }
 0x13f   : > { %v652_v13 = vpop.f32.mrf.mxu0  ;;  %756 = vmatpush1.msra.mxu0 %v488_v11  ;;  %v465_v23 = vld [vmem:[#allocation2 + $0x88] sm:$0xff] }
 0x140   : > { %v726_v24 = vpop.f32.mrf.mxu1  ;;  %v483_v13 = vld [vmem:[#allocation2 + $0x118] sm:$0xff] }
 0x141   : > { %v653_v16 = vpop.f32.mrf.mxu0  ;;  %v4675_v28 = vadd.f32 %v726_v24, %v557_v25  ;;  %757 = vmatprep.subr.mxu0 %v483_v13  ;;  %v464_v24 = vld [vmem:[#allocation2 + $0x80] sm:$0xff] }
 0x142   : > { %v4649_v17 = vadd.f32 %v653_v16, %v553_v14  ;;  %v4673_v26 = vpop.f32.mrf.mxu1  ;;  %v482_v14 = vld [vmem:[#allocation2 + $0x110] sm:$0xff]  ;;  %v477_v16 = vld [vmem:[#allocation2 + $0xe8] sm:$0xff] }
 0x143   : > { %758 = vmatpush1.msra.mxu0 %v482_v14 }
 0x144   : > { %985 = vrot.lane.b32.xlu1 %v4649_v17, %s4417_s12  ;;  %3853 = vmatpush3.xpose.msk.msra.mxu1 %vm816_vm1, %v4649_v17  ;;  %v732_v27 = vpop.f32.mrf.mxu1 }
 0x145   : > { %3854 = vmatprep.subr.mxu1 %v4415_v0  ;;  %v4677_v29 = vadd.f32 %v732_v27, %v557_v25  ;;  %759 = vmatprep.subr.mxu0 %v477_v16  ;;  %v459_v25 = vld [vmem:[#allocation2 + $0x58] sm:$0xff]  ;;  %v458_v27 = vld [vmem:[#allocation2 + $0x50] sm:$0xff] }
 0x146   : > { %v4683_v30 = vpop.f32.mrf.mxu1  ;;  %760 = vmatpush1.msra.mxu0 %v476_v18 }
 0x147   : > { %761 = vmatprep.subr.mxu0 %v471_v21 }
 0x148   : > { %983 = vrot.lane.b32.xlu1 %v4658_v19, %s4417_s12  ;;  %3855 = vmatpush3.xpose.msk.msra.mxu1 %vm816_vm1, %v4658_v19 }
 0x149   : > { %3859 = vmatprep.subr.mxu1 %v4415_v0  ;;  %762 = vmatpush1.msra.mxu0 %v470_v22 }
 0x14a   : > { %763 = vmatprep.subr.mxu0 %v465_v23 }
 0x14b   : > { %3857 = vmatmul.mubr.msk.f32.vlgmr.msra.gmra.mxu1 %vm816_vm1, %v4664_v20  ;;  %764 = vmatpush1.msra.mxu0 %v464_v24  ;;  %v1531_v24 = vld [vmem:[#allocation5 + $0x78] sm:$0xff] }
 0x14c   : > { %3863 = vmatprep.mubr.msk.f32.mxu1 %vm4416_vm0, %v4415_v0  ;;  %3860 = vmatpush3.msra.mxu1 %v4677_v29 }
 0x14d   : > { %3861 = vmatprep.subr.mxu1 %v4415_v0  ;;  %765 = vmatprep.subr.mxu0 %v459_v25  ;;  %v1530_v25 = vld [vmem:[#allocation5 + $0x70] sm:$0xff] }
 0x14e   : > { %3862 = vmatpush3.msra.mxu1 %v4675_v28  ;;  %766 = vmatpush1.msra.mxu0 %v458_v27  ;;  %v1529_v27 = vld [vmem:[#allocation5 + $0x68] sm:$0xff] }
 0x14f   : > { %3866 = vmatprep.subr.mxu1 %v4415_v0 }
 0x1b6   : > { %v986_v41 = vpop.permute.xlu1 %985 }
 0x1ba   : > { %v984_v43 = vpop.permute.xlu1 %983 }
 0x20b   : > { %v892_v31 = vpop.f32.mrf.mxu1 }
 0x20c   : > { %v897_v32 = vsel %vm896_vm2, %v892_v31, -inf }
 0x20d   : > { %898 = vmax.xlane.f32.xlu0 %v897_v32  ;;  %v3858_v33 = vpop.f32.mrf.mxu1  ;;  %v452_v32 = vld [vmem:[#allocation2 + $0x20] sm:$0xff] }
 0x296   : > { %v899_v34 = vpop.xlane.xlu0 %898 }
 0x297   : > { %v900_v35 = vsub.f32 %v892_v31, %v899_v34  ;;  %v453_v31 = vld [vmem:[#allocation2 + $0x28] sm:$0xff] }
 0x298   : > { %767 = vmatprep.subr.mxu0 %v453_v31  ;;  %v1528_v31 = vld [vmem:[#allocation5 + $0x60] sm:$0xff] }
 0x299   : > { %v901_v36 = vmul.f32 1.442695, %v900_v35  ;;  %768 = vmatpush1.msra.mxu0 %v452_v32  ;;  %v1527_v32 = vld [vmem:[#allocation5 + $0x58] sm:$0xff] }
 0x29a   : > { %3894 = vmatprep.subr.mxu0 %v4415_v0  ;;  %802 = vmatmul.mubr.f32.vlgmr.msra.gmra.mxu0 %v4607_v54 }
 0x29b   : > { %4131 = vpow2.f32 %v901_v36  ;;  %807 = vmatprep.mubr.f32.mxu0 %v4415_v0 }
 0x29e   : > { %808 = vmatmul.mubr.f32.gmra.mxu0 %v4617_v59 }
 0x29f   : > { %811 = vmatprep.mubr.f32.mxu0 %v4415_v0 }
 0x2a2   : > { %812 = vmatmul.mubr.f32.gmra.mxu0 %v4622_v60 }
 0x2a3   : > { %3898 = vmatprep.mubr.msk.f32.mxu0 %vm4416_vm0, %v4415_v0 }
 0x2a8   : > { %v4132_v37 = vpop.eup %4131 }
 0x2a9   : > { %v903_v38 = vsel %vm896_vm2, %v4132_v37, 0.0 }
 0x2aa   : > { %904 = vadd.xlane.f32.xlu0 %v903_v38 }
 0x2c0   : > { %981 = vrot.lane.b32.xlu0 %v4664_v20, %s4417_s12 }
 0x333   : > { %v905_v39 = vpop.xlane.xlu0 %904 }
 0x334   : > { %4133 = vrcp.f32 %v905_v39 }
 0x337   : > { %v982_v44 = vpop.permute.xlu0 %981 }
 0x341   : > { %v4134_v40 = vpop.eup %4133 }
 0x342   : > { %v907_v42 = vmul.f32 %v4134_v40, %v4132_v37 }
 0x344   : > { %3864 = vmatmul.mubr.msk.f32.vlgmr.msra.gmra.mxu1 %vm896_vm2, %v907_v42 }
 0x345   : > { %3867 = vmatpush3.xpose.msk.msra.mxu1 %vm816_vm1, %v986_v41  ;;  %3870 = vmatprep.mubr.msk.f32.mxu1 %vm4416_vm0, %v4415_v0 }
 0x346   : > { %3868 = vmatprep.subr.mxu1 %v4415_v0 }
 0x349   : > { %3869 = vmatpush3.xpose.msk.msra.mxu1 %vm816_vm1, %v984_v43 }
 0x34a   : > { %3873 = vmatprep.subr.mxu1 %v4415_v0 }
 0x34c   : > { %3871 = vmatmul.mubr.msk.f32.vlgmr.msra.gmra.mxu1 %vm816_vm1, %v982_v44 }
 0x34d   : > { %3877 = vmatprep.mubr.msk.f32.mxu1 %vm4416_vm0, %v4415_v0 }
 0x35a   : > { %v4735_v40 = vpop.f32.mrf.mxu0 }
 0x35c   : > { %v4737_v41 = vpop.f32.mrf.mxu0 }
 0x35e   : > { %v809_v42 = vpop.f32.mrf.mxu0 }
 0x360   : > { %v810_v43 = vpop.f32.mrf.mxu0 }
 0x362   : > { %v813_v44 = vpop.f32.mrf.mxu0 }
 0x364   : > { %v814_v45 = vpop.f32.mrf.mxu0 }
 0x404   : > { %v4699_v2 = vpop.f32.mrf.mxu1 }
 0x406   : > { %v3865_v3 = vpop.f32.mrf.mxu1 }
 0x40c   : > { %v1059_v4 = vpop.f32.mrf.mxu1 }
 0x40d   : > { %v1063_v5 = vsel %vm896_vm2, %v1059_v4, -inf }
 0x40e   : > { %1064 = vmax.xlane.f32.xlu1 %v1063_v5  ;;  %v3872_v6 = vpop.f32.mrf.mxu1 }
 0x41f   : > { %1078 = vrot.lane.b32.xlu1 %v4677_v29, %s4417_s12 }
 0x423   : > { %1159 = vrot.lane.b32.xlu1 %v4649_v17, %s4418_s20 }
 0x427   : > { %1157 = vrot.lane.b32.xlu1 %v4658_v19, %s4418_s20 }
 0x42b   : > { %1331 = vrot.lane.b32.xlu1 %v4649_v17, %s4419_s25 }
 0x42f   : > { %1155 = vrot.lane.b32.xlu1 %v4664_v20, %s4418_s20 }
 0x433   : > { %1329 = vrot.lane.b32.xlu1 %v4658_v19, %s4419_s25 }
 0x437   : > { %1327 = vrot.lane.b32.xlu1 %v4664_v20, %s4419_s25 }
 0x497   : > { %v1065_v33 = vpop.xlane.xlu1 %1064 }
 0x498   : > { %v1066_v17 = vsub.f32 %v1059_v4, %v1065_v33  ;;  %v1526_v33 = vld [vmem:[#allocation5 + $0x50] sm:$0xff] }
 0x49a   : > { %v1067_v34 = vmul.f32 1.442695, %v1066_v17  ;;  %v1525_v17 = vld [vmem:[#allocation5 + $0x48] sm:$0xff] }
 0x49b   : > { %v1079_v59 = vpop.permute.xlu1 %1078 }
 0x49c   : > { %4135 = vpow2.f32 %v1067_v34  ;;  %3874 = vmatpush3.msra.mxu1 %v1079_v59  ;;  %v1524_v34 = vld [vmem:[#allocation5 + $0x40] sm:$0xff]  ;;  %v1523_v59 = vld [vmem:[#allocation5 + $0x38] sm:$0xff] }
 0x49d   : > { %3875 = vmatprep.subr.mxu1 %v4415_v0 }
 0x49f   : > { %v1160_v35 = vpop.permute.xlu1 %1159 }
 0x4a3   : > { %v1158_v36 = vpop.permute.xlu1 %1157 }
 0x4a7   : > { %v1332_v60 = vpop.permute.xlu1 %1331 }
 0x4a8   : > { %3895 = vmatpush3.xpose.msk.msra.mxu0 %vm816_vm1, %v1332_v60  ;;  %v1520_v60 = vld [vmem:[#allocation5 + $0x20] sm:$0xff] }
 0x4a9   : > { %v4136_v37 = vpop.eup %4135  ;;  %3896 = vmatprep.subr.mxu0 %v4415_v0 }
 0x4aa   : > { %v1069_v19 = vsel %vm896_vm2, %v4136_v37, 0.0 }
 0x4ab   : > { %1070 = vadd.xlane.f32.xlu0 %v1069_v19  ;;  %v1156_v20 = vpop.permute.xlu1 %1155  ;;  %v1518_v19 = vld [vmem:[#allocation5 + $0x10] sm:$0xff] }
 0x4af   : > { %v1330_v38 = vpop.permute.xlu1 %1329 }
 0x4b0   : > { %3897 = vmatpush3.xpose.msk.msra.mxu0 %vm816_vm1, %v1330_v38  ;;  %v1516_v38 = vld [vmem:[#allocation5] sm:$0xff] }
 0x4b1   : > { %3908 = vmatprep.subr.mxu0 %v4415_v0 }
 0x4b3   : > { %v1328_v39 = vpop.permute.xlu1 %1327 }
 0x4b4   : > { %3899 = vmatmul.mubr.msk.f32.vlgmr.msra.gmra.mxu0 %vm816_vm1, %v1328_v39  ;;  %v1663_v39 = vld [vmem:[#allocation7 + $0xf8] sm:$0xff] }
 0x4b5   : > { %3940 = vmatprep.mubr.msk.f32.mxu0 %vm4416_vm0, %v4415_v0  ;;  %3909 = vmatpush3.msra.mxu0 %v1531_v24 }
 0x4b6   : > { %3910 = vmatprep.subr.mxu0 %v4415_v0 }
 0x4b7   : > { %3911 = vmatpush3.msra.mxu0 %v1530_v25 }
 0x4b8   : > { %3912 = vmatprep.subr.mxu0 %v4415_v0 }
 0x4b9   : > { %3913 = vmatpush3.msra.mxu0 %v1529_v27 }
 0x4ba   : > { %3914 = vmatprep.subr.mxu0 %v4415_v0 }
 0x4bb   : > { %3915 = vmatpush3.msra.mxu0 %v1528_v31  ;;  %v1662_v31 = vld [vmem:[#allocation7 + $0xf0] sm:$0xff] }
 0x4bc   : > { %3916 = vmatprep.subr.mxu0 %v4415_v0 }
 0x4bd   : > { %3917 = vmatpush3.msra.mxu0 %v1527_v32 }
 0x4be   : > { %3918 = vmatprep.subr.mxu0 %v4415_v0 }
 0x4bf   : > { %3919 = vmatpush3.msra.mxu0 %v1526_v33  ;;  %v1661_v33 = vld [vmem:[#allocation7 + $0xe8] sm:$0xff] }
 0x4c0   : > { %3920 = vmatprep.subr.mxu0 %v4415_v0 }
 0x4c1   : > { %1076 = vrot.lane.b32.xlu0 %v4675_v28, %s4417_s12  ;;  %3921 = vmatpush3.msra.mxu0 %v1525_v17  ;;  %v1660_v17 = vld [vmem:[#allocation7 + $0xe0] sm:$0xff] }
 0x4c2   : > { %3922 = vmatprep.subr.mxu0 %v4415_v0 }
 0x4c3   : > { %3923 = vmatpush3.msra.mxu0 %v1524_v34  ;;  %v1659_v34 = vld [vmem:[#allocation7 + $0xd8] sm:$0xff] }
 0x4c4   : > { %3924 = vmatprep.subr.mxu0 %v4415_v0 }
 0x4c5   : > { %3925 = vmatpush3.msra.mxu0 %v1523_v59  ;;  %v1658_v59 = vld [vmem:[#allocation7 + $0xd0] sm:$0xff] }
 0x4c6   : > { %3926 = vmatprep.subr.mxu0 %v4415_v0 }
 0x534   : > { %v1071_v46 = vpop.xlane.xlu0 %1070 }
 0x535   : > { %4137 = vrcp.f32 %v1071_v46  ;;  %v1696_v46 = vld [vmem:[#allocation7 + $0x1f8] sm:$0xff] }
 0x538   : > { %v1077_v47 = vpop.permute.xlu0 %1076 }
 0x539   : > { %3876 = vmatpush3.msra.mxu1 %v1077_v47  ;;  %v1695_v47 = vld [vmem:[#allocation7 + $0x1f0] sm:$0xff] }
 0x53a   : > { %3880 = vmatprep.subr.mxu1 %v4415_v0 }
 0x542   : > { %v4138_v48 = vpop.eup %4137 }
 0x543   : > { %v1073_v49 = vmul.f32 %v4138_v48, %v4136_v37  ;;  %v1519_v37 = vld [vmem:[#allocation5 + $0x18] sm:$0xff]  ;;  %v1694_v48 = vld [vmem:[#allocation7 + $0x1e8] sm:$0xff] }
 0x545   : > { %3878 = vmatmul.mubr.msk.f32.vlgmr.msra.gmra.mxu1 %vm896_vm2, %v1073_v49  ;;  %v1693_v49 = vld [vmem:[#allocation7 + $0x1e0] sm:$0xff] }
 0x546   : > { %3881 = vmatpush3.xpose.msk.msra.mxu1 %vm816_vm1, %v1160_v35  ;;  %3884 = vmatprep.mubr.msk.f32.mxu1 %vm4416_vm0, %v4415_v0  ;;  %v1522_v35 = vld [vmem:[#allocation5 + $0x30] sm:$0xff] }
 0x547   : > { %3882 = vmatprep.subr.mxu1 %v4415_v0  ;;  %3927 = vmatpush3.msra.mxu0 %v1522_v35  ;;  %v1657_v35 = vld [vmem:[#allocation7 + $0xc8] sm:$0xff] }
 0x548   : > { %3928 = vmatprep.subr.mxu0 %v4415_v0 }
 0x54a   : > { %3883 = vmatpush3.xpose.msk.msra.mxu1 %vm816_vm1, %v1158_v36  ;;  %v1521_v36 = vld [vmem:[#allocation5 + $0x28] sm:$0xff] }
 0x54b   : > { %3887 = vmatprep.subr.mxu1 %v4415_v0  ;;  %3929 = vmatpush3.msra.mxu0 %v1521_v36  ;;  %v1656_v36 = vld [vmem:[#allocation7 + $0xc0] sm:$0xff] }
 0x54c   : > { %3930 = vmatprep.subr.mxu0 %v4415_v0 }
 0x54d   : > { %3885 = vmatmul.mubr.msk.f32.vlgmr.msra.gmra.mxu1 %vm816_vm1, %v1156_v20  ;;  %3931 = vmatpush3.msra.mxu0 %v1520_v60  ;;  %v1517_v20 = vld [vmem:[#allocation5 + $0x8] sm:$0xff]  ;;  %v1654_v60 = vld [vmem:[#allocation7 + $0xb0] sm:$0xff] }
 0x54e   : > { %3891 = vmatprep.mubr.msk.f32.mxu1 %vm4416_vm0, %v4415_v0  ;;  %3932 = vmatprep.subr.mxu0 %v4415_v0 }
 0x54f   : > { %3933 = vmatpush3.msra.mxu0 %v1519_v37  ;;  %v1653_v37 = vld [vmem:[#allocation7 + $0xa8] sm:$0xff] }
 0x550   : > { %3934 = vmatprep.subr.mxu0 %v4415_v0 }
 0x551   : > { %3935 = vmatpush3.msra.mxu0 %v1518_v19  ;;  %v1652_v19 = vld [vmem:[#allocation7 + $0xa0] sm:$0xff] }
 0x552   : > { %3936 = vmatprep.subr.mxu0 %v4415_v0 }
 0x553   : > { %3937 = vmatpush3.msra.mxu0 %v1517_v20  ;;  %v1651_v20 = vld [vmem:[#allocation7 + $0x98] sm:$0xff] }
 0x554   : > { %3938 = vmatprep.subr.mxu0 %v4415_v0 }
 0x555   : > { %3939 = vmatpush3.msra.mxu0 %v1516_v38  ;;  %v1650_v38 = vld [vmem:[#allocation7 + $0x90] sm:$0xff] }
 0x556   : > { %1768 = vmatprep.subr.mxu0 %v1663_v39  ;;  %v1649_v39 = vld [vmem:[#allocation7 + $0x88] sm:$0xff] }
 0x574   : > { %v1405_v50 = vpop.f32.mrf.mxu0 }
 0x575   : > { %v1409_v51 = vsel %vm896_vm2, %v1405_v50, -inf }
 0x576   : > { %1410 = vmax.xlane.f32.xlu1 %v1409_v51  ;;  %v3900_v52 = vpop.f32.mrf.mxu0  ;;  %v1691_v51 = vld [vmem:[#allocation7 + $0x1d0] sm:$0xff] }
 0x577   : > { %v1690_v52 = vld [vmem:[#allocation7 + $0x1c8] sm:$0xff] }
 0x587   : > { %1250 = vrot.lane.b32.xlu1 %v4677_v29, %s4418_s20 }
 0x58b   : > { %1422 = vrot.lane.b32.xlu1 %v4677_v29, %s4419_s25 }
 0x58f   : > { %1420 = vrot.lane.b32.xlu1 %v4675_v28, %s4419_s25 }
 0x5ff   : > { %v1411_v53 = vpop.xlane.xlu1 %1410 }
 0x600   : > { %v1412_v55 = vsub.f32 %v1405_v50, %v1411_v53  ;;  %v1692_v50 = vld [vmem:[#allocation7 + $0x1d8] sm:$0xff]  ;;  %v1689_v53 = vld [vmem:[#allocation7 + $0x1c0] sm:$0xff] }
 0x602   : > { %v1413_v56 = vmul.f32 1.442695, %v1412_v55  ;;  %v1688_v55 = vld [vmem:[#allocation7 + $0x1b8] sm:$0xff] }
 0x603   : > { %v1251_v57 = vpop.permute.xlu1 %1250 }
 0x604   : > { %4139 = vpow2.f32 %v1413_v56  ;;  %3888 = vmatpush3.msra.mxu1 %v1251_v57  ;;  %v1687_v56 = vld [vmem:[#allocation7 + $0x1b0] sm:$0xff]  ;;  %v1686_v57 = vld [vmem:[#allocation7 + $0x1a8] sm:$0xff] }
 0x605   : > { %v1151_v58 = vpop.f32.mrf.mxu1  ;;  %3889 = vmatprep.subr.mxu1 %v4415_v0 }
 0x607   : > { %v3879_v61 = vpop.f32.mrf.mxu1  ;;  %v1423_v16 = vpop.permute.xlu1 %1422 }
 0x608   : > { %v1684_v61 = vld [vmem:[#allocation7 + $0x198] sm:$0xff] }
 0x60d   : > { %v1233_v62 = vpop.f32.mrf.mxu1 }
 0x60e   : > { %v1237_v63 = vsel %vm896_vm2, %v1233_v62, -inf }
 0x60f   : > { %1238 = vmax.xlane.f32.xlu0 %v1237_v63  ;;  %v3886_v1 = vpop.f32.mrf.mxu1  ;;  %v1682_v63 = vld [vmem:[#allocation7 + $0x188] sm:$0xff] }
 0x610   : > { %v1681_v1 = vld [vmem:[#allocation7 + $0x180] sm:$0xff] }
 0x611   : > { %v4140_v3 = vpop.eup %4139 }
 0x612   : > { %v1415_v29 = vsel %vm896_vm2, %v4140_v3, 0.0 }
 0x613   : > { %1416 = vadd.xlane.f32.xlu0 %v1415_v29  ;;  %v1679_v29 = vld [vmem:[#allocation7 + $0x170] sm:$0xff] }
 0x698   : > { %v1239_v4 = vpop.xlane.xlu0 %1238 }
 0x699   : > { %v1240_v5 = vsub.f32 %v1233_v62, %v1239_v4  ;;  %v1683_v62 = vld [vmem:[#allocation7 + $0x190] sm:$0xff]  ;;  %v1678_v4 = vld [vmem:[#allocation7 + $0x168] sm:$0xff] }
 0x69b   : > { %v1241_v6 = vmul.f32 1.442695, %v1240_v5  ;;  %v1677_v5 = vld [vmem:[#allocation7 + $0x160] sm:$0xff] }
 0x69c   : > { %v1417_v11 = vpop.xlane.xlu0 %1416 }
 0x69d   : > { %4141 = vpow2.f32 %v1241_v6  ;;  %v1676_v6 = vld [vmem:[#allocation7 + $0x158] sm:$0xff] }
 0x6aa   : > { %v4142_v7 = vpop.eup %4141 }
 0x6ab   : > { %v1243_v9 = vsel %vm896_vm2, %v4142_v7, 0.0 }
 0x6ac   : > { %1244 = vadd.xlane.f32.xlu0 %v1243_v9  ;;  %v1674_v9 = vld [vmem:[#allocation7 + $0x148] sm:$0xff] }
 0x6c2   : > { %1248 = vrot.lane.b32.xlu0 %v4675_v28, %s4418_s20  ;;  %v1421_v28 = vpop.permute.xlu1 %1420 }
 0x6c6   : > { %1500 = vrot.lane.b32.xlu0 %v1151_v58, %s4419_s25  ;;  %v1685_v58 = vld [vmem:[#allocation7 + $0x1a0] sm:$0xff] }
 0x735   : > { %v1245_v13 = vpop.xlane.xlu0 %1244 }
 0x736   : > { %4143 = vrcp.f32 %v1245_v13  ;;  %v1672_v13 = vld [vmem:[#allocation7 + $0x138] sm:$0xff] }
 0x737   : > { %4145 = vrcp.f32 %v1417_v11  ;;  %v1673_v11 = vld [vmem:[#allocation7 + $0x140] sm:$0xff] }
 0x739   : > { %v1249_v14 = vpop.permute.xlu0 %1248 }
 0x73a   : > { %3890 = vmatpush3.msra.mxu1 %v1249_v14  ;;  %v1671_v14 = vld [vmem:[#allocation7 + $0x130] sm:$0xff] }
 0x73b   : > { %3901 = vmatprep.subr.mxu1 %v4415_v0 }
 0x743   : > { %v4144_v18 = vpop.eup %4143 }
 0x744   : > { %v1247_v21 = vmul.f32 %v4144_v18, %v4142_v7  ;;  %v4146_v22 = vpop.eup %4145  ;;  %v1675_v7 = vld [vmem:[#allocation7 + $0x150] sm:$0xff]  ;;  %v1669_v18 = vld [vmem:[#allocation7 + $0x120] sm:$0xff] }
 0x745   : > { %v1419_v23 = vmul.f32 %v4146_v22, %v4140_v3  ;;  %v1680_v3 = vld [vmem:[#allocation7 + $0x178] sm:$0xff]  ;;  %v1667_v22 = vld [vmem:[#allocation7 + $0x110] sm:$0xff] }
 0x746   : > { %3892 = vmatmul.mubr.msk.f32.vlgmr.msra.gmra.mxu1 %vm896_vm2, %v1247_v21  ;;  %v1668_v21 = vld [vmem:[#allocation7 + $0x118] sm:$0xff] }
 0x747   : > { %3902 = vmatpush3.msra.mxu1 %v1423_v16  ;;  %3905 = vmatprep.mubr.msk.f32.mxu1 %vm4416_vm0, %v4415_v0  ;;  %v1670_v16 = vld [vmem:[#allocation7 + $0x128] sm:$0xff] }
 0x748   : > { %3903 = vmatprep.subr.mxu1 %v4415_v0 }
 0x749   : > { %3904 = vmatpush3.msra.mxu1 %v1421_v28  ;;  %v1501_v28 = vpop.permute.xlu0 %1500 }
 0x74a   : > { %3906 = vmatmul.mubr.msk.f32.vlgmr.msra.gmra.mxu1 %vm896_vm2, %v1419_v23  ;;  %1697 = vmatprep.subr.mxu1 %v1696_v46  ;;  %v1511_v24 = vsel %vm816_vm1, %v4699_v2, %v1501_v28  ;;  %v1655_v2 = vld [vmem:[#allocation7 + $0xb8] sm:$0xff]  ;;  %v1644_v46 = vld [vmem:[#allocation7 + $0x60] sm:$0xff] }
 0x74b   : > { %1761 = vmatprep.mubr.f32.mxu1 %v4415_v0  ;;  %1698 = vmatpush1.msra.mxu1 %v1695_v47  ;;  %v1643_v47 = vld [vmem:[#allocation7 + $0x58] sm:$0xff] }
 0x74c   : > { %1699 = vmatprep.subr.mxu1 %v1694_v48  ;;  %v1642_v48 = vld [vmem:[#allocation7 + $0x50] sm:$0xff]  ;;  %v1929_v28 = vld [vmem:[#allocation8 + $0xd8] sm:$0xff] }
 0x74d   : > { %1700 = vmatpush1.msra.mxu1 %v1693_v49  ;;  %v1641_v49 = vld [vmem:[#allocation7 + $0x48] sm:$0xff] }
 0x74e   : > { %1701 = vmatprep.subr.mxu1 %v1692_v50  ;;  %v1640_v50 = vld [vmem:[#allocation7 + $0x40] sm:$0xff] }
 0x74f   : > { %1702 = vmatpush1.msra.mxu1 %v1691_v51  ;;  %v1639_v51 = vld [vmem:[#allocation7 + $0x38] sm:$0xff] }
 0x750   : > { %1703 = vmatprep.subr.mxu1 %v1690_v52  ;;  %v564_v52 = vsub.s32 4, %v4634_v8 }
 0x751   : > { %1704 = vmatpush1.msra.mxu1 %v1689_v53  ;;  %v1638_v53 = vld [vmem:[#allocation7 + $0x30] sm:$0xff] }
 0x752   : > { %1705 = vmatprep.subr.mxu1 %v1688_v55  ;;  %v1637_v55 = vld [vmem:[#allocation7 + $0x28] sm:$0xff] }
 0x753   : > { %1706 = vmatpush1.msra.mxu1 %v1687_v56  ;;  %v1636_v56 = vld [vmem:[#allocation7 + $0x20] sm:$0xff] }
 0x754   : > { %1707 = vmatprep.subr.mxu1 %v1686_v57  ;;  %v1635_v57 = vld [vmem:[#allocation7 + $0x18] sm:$0xff] }
 0x755   : > { %1708 = vmatpush1.msra.mxu1 %v1685_v58  ;;  %v565_v58 = vrot.slane %v4642_v12, %v564_v52 }
 0x756   : > { %1709 = vmatprep.subr.mxu1 %v1684_v61  ;;  %v1634_v61 = vld [vmem:[#allocation7 + $0x10] sm:$0xff] }
 0x757   : > { %1710 = vmatpush1.msra.mxu1 %v1683_v62  ;;  %v1633_v62 = vld [vmem:[#allocation7 + $0x8] sm:$0xff] }
 0x758   : > { %1711 = vmatprep.subr.mxu1 %v1682_v63  ;;  %v1632_v63 = vld [vmem:[#allocation7] sm:$0xff] }
 0x759   : > { %1712 = vmatpush1.msra.mxu1 %v1681_v1  ;;  %v4796_v1 = vadd.f32 %v4735_v40, %v565_v58 }
 0x75a   : > { %1713 = vmatprep.subr.mxu1 %v1680_v3  ;;  %v1666_v3 = vld [vmem:[#allocation7 + $0x108] sm:$0xff] }
 0x75b   : > { %1714 = vmatpush1.msra.mxu1 %v1679_v29  ;;  %v1665_v29 = vld [vmem:[#allocation7 + $0x100] sm:$0xff] }
 0x75c   : > { %1715 = vmatprep.subr.mxu1 %v1678_v4  ;;  %v1933_v4 = vld [vmem:[#allocation8 + $0xf8] sm:$0xff] }
 0x75d   : > { %1716 = vmatpush1.msra.mxu1 %v1677_v5  ;;  %v3644_v5 = vld [vmem:[%s5135_s7] ss:$0 sm:$0xff] }
 0x75e   : > { %1717 = vmatprep.subr.mxu1 %v1676_v6 }
 0x75f   : > { %1718 = vmatpush1.msra.mxu1 %v1675_v7 }
 0x760   : > { %1719 = vmatprep.subr.mxu1 %v1674_v9  ;;  %v1917_v9 = vld [vmem:[#allocation8 + $0x78] sm:$0xff] }
 0x761   : > { %1720 = vmatpush1.msra.mxu1 %v1673_v11  ;;  %v1932_v11 = vld [vmem:[#allocation8 + $0xf0] sm:$0xff] }
 0x762   : > { %1721 = vmatprep.subr.mxu1 %v1672_v13  ;;  %v1916_v13 = vld [vmem:[#allocation8 + $0x70] sm:$0xff] }
 0x763   : > { %1722 = vmatpush1.msra.mxu1 %v1671_v14 }
 0x764   : > { %1723 = vmatprep.subr.mxu1 %v1670_v16  ;;  %v1931_v16 = vld [vmem:[#allocation8 + $0xe8] sm:$0xff] }
 0x765   : > { %1724 = vmatpush1.msra.mxu1 %v1669_v18  ;;  %v1915_v18 = vld [vmem:[#allocation8 + $0x68] sm:$0xff] }
 0x766   : > { %1725 = vmatprep.subr.mxu1 %v1668_v21  ;;  %v1930_v21 = vld [vmem:[#allocation8 + $0xe0] sm:$0xff] }
 0x767   : > { %1726 = vmatpush1.msra.mxu1 %v1667_v22  ;;  %v1914_v22 = vld [vmem:[#allocation8 + $0x60] sm:$0xff] }
 0x768   : > { %1727 = vmatprep.subr.mxu1 %v1666_v3 }
 0x769   : > { %1728 = vmatpush1.msra.mxu1 %v1665_v29 }
 0x76a   : > { %3737 = vmatprep.subr.mxu1 %v1933_v4 }
 0x806   : > { %v1323_v42 = vpop.f32.mrf.mxu1 }
 0x807   : > { %1504 = vrot.lane.b32.xlu1 %v1323_v42, %s4418_s20  ;;  %v1648_v42 = vld [vmem:[#allocation7 + $0x80] sm:$0xff] }
 0x808   : > { %v3893_v43 = vpop.f32.mrf.mxu1 }
 0x809   : > { %v1647_v43 = vld [vmem:[#allocation7 + $0x78] sm:$0xff] }
 0x80a   : > { %v1495_v44 = vpop.f32.mrf.mxu1 }
 0x80b   : > { %1508 = vrot.lane.b32.xlu0 %v1495_v44, %s4417_s12  ;;  %v1646_v44 = vld [vmem:[#allocation7 + $0x70] sm:$0xff] }
 0x80c   : > { %v3907_v45 = vpop.f32.mrf.mxu1 }
 0x80d   : > { %v1645_v45 = vld [vmem:[#allocation7 + $0x68] sm:$0xff] }
 0x879   : > { %v1505_v23 = vpop.permute.xlu1 %1504 }
 0x87a   : > { %v1513_v25 = vsel %vm1512_vm3, %v1511_v24, %v1505_v23  ;;  %v1913_v23 = vld [vmem:[#allocation8 + $0x58] sm:$0xff]  ;;  %v1928_v24 = vld [vmem:[#allocation8 + $0xd0] sm:$0xff] }
 0x87d   : > { %v1509_v27 = vpop.permute.xlu0 %1508 }
 0x87e   : > { %v1515_v32 = vsel %vm1514_vm4, %v1513_v25, %v1509_v27  ;;  %v1912_v25 = vld [vmem:[#allocation8 + $0x50] sm:$0xff]  ;;  %v1927_v27 = vld [vmem:[#allocation8 + $0xc8] sm:$0xff] }
 0x87f   : > { %3941 = vmatmul.mubr.f32.vlgmr.msra.gmra.mxu0 %v1515_v32  ;;  %v1926_v32 = vld [vmem:[#allocation8 + $0xc0] sm:$0xff] }
 0x880   : > { %1769 = vmatpush1.msra.mxu0 %v1662_v31  ;;  %1832 = vmatprep.mubr.f32.mxu0 %v4415_v0  ;;  %v1911_v31 = vld [vmem:[#allocation8 + $0x48] sm:$0xff] }
 0x881   : > { %1770 = vmatprep.subr.mxu0 %v1661_v33  ;;  %v1910_v33 = vld [vmem:[#allocation8 + $0x40] sm:$0xff] }
 0x882   : > { %1771 = vmatpush1.msra.mxu0 %v1660_v17 }
 0x883   : > { %1772 = vmatprep.subr.mxu0 %v1659_v34  ;;  %v1925_v34 = vld [vmem:[#allocation8 + $0xb8] sm:$0xff] }
 0x884   : > { %1773 = vmatpush1.msra.mxu0 %v1658_v59  ;;  %v1909_v59 = vld [vmem:[#allocation8 + $0x38] sm:$0xff] }
 0x885   : > { %1774 = vmatprep.subr.mxu0 %v1657_v35  ;;  %v1924_v35 = vld [vmem:[#allocation8 + $0xb0] sm:$0xff] }
 0x886   : > { %1775 = vmatpush1.msra.mxu0 %v1656_v36  ;;  %v1908_v36 = vld [vmem:[#allocation8 + $0x30] sm:$0xff] }
 0x887   : > { %1776 = vmatprep.subr.mxu0 %v1655_v2 }
 0x888   : > { %1777 = vmatpush1.msra.mxu0 %v1654_v60  ;;  %v1923_v60 = vld [vmem:[#allocation8 + $0xa8] sm:$0xff] }
 0x889   : > { %1778 = vmatprep.subr.mxu0 %v1653_v37  ;;  %v1907_v37 = vld [vmem:[#allocation8 + $0x28] sm:$0xff] }
 0x88a   : > { %1779 = vmatpush1.msra.mxu0 %v1652_v19  ;;  %v1922_v19 = vld [vmem:[#allocation8 + $0xa0] sm:$0xff] }
 0x88b   : > { %1780 = vmatprep.subr.mxu0 %v1651_v20  ;;  %v1906_v20 = vld [vmem:[#allocation8 + $0x20] sm:$0xff] }
 0x88c   : > { %1781 = vmatpush1.msra.mxu0 %v1650_v38 }
 0x88d   : > { %1782 = vmatprep.subr.mxu0 %v1649_v39  ;;  %v1921_v39 = vld [vmem:[#allocation8 + $0x98] sm:$0xff] }
 0x88e   : > { %1783 = vmatpush1.msra.mxu0 %v1648_v42  ;;  %v568_v42 = vsub.s32 5, %v4634_v8 }
 0x88f   : > { %1784 = vmatprep.subr.mxu0 %v1647_v43  ;;  %v1920_v43 = vld [vmem:[#allocation8 + $0x90] sm:$0xff] }
 0x890   : > { %1785 = vmatpush1.msra.mxu0 %v1646_v44  ;;  %v1904_v44 = vld [vmem:[#allocation8 + $0x10] sm:$0xff] }
 0x891   : > { %1786 = vmatprep.subr.mxu0 %v1645_v45  ;;  %v1919_v45 = vld [vmem:[#allocation8 + $0x88] sm:$0xff] }
 0x892   : > { %1787 = vmatpush1.msra.mxu0 %v1644_v46  ;;  %v569_v46 = vrot.slane %v4642_v12, %v568_v42 }
 0x893   : > { %1788 = vmatprep.subr.mxu0 %v1643_v47  ;;  %v1903_v47 = vld [vmem:[#allocation8 + $0x8] sm:$0xff] }
 0x894   : > { %1789 = vmatpush1.msra.mxu0 %v1642_v48  ;;  %v4821_v48 = vadd.f32 %v4737_v41, %v569_v46 }
 0x895   : > { %1790 = vmatprep.subr.mxu0 %v1641_v49 }
 0x896   : > { %1791 = vmatpush1.msra.mxu0 %v1640_v50 }
 0x897   : > { %1792 = vmatprep.subr.mxu0 %v1639_v51 }
 0x898   : > { %1793 = vmatpush1.msra.mxu0 %v1638_v53 }
 0x899   : > { %1794 = vmatprep.subr.mxu0 %v1637_v55 }
 0x89a   : > { %1795 = vmatpush1.msra.mxu0 %v1636_v56 }
 0x89b   : > { %1796 = vmatprep.subr.mxu0 %v1635_v57  ;;  %v3645_v57 = vld [vmem:[%s5135_s7 + $0x1] ss:$0 sm:$0xff] }
 0x89c   : > { %1797 = vmatpush1.msra.mxu0 %v1634_v61 }
 0x89d   : > { %1798 = vmatprep.subr.mxu0 %v1633_v62  ;;  %v3646_v62 = vld [vmem:[%s5135_s7 + $0x2] ss:$0 sm:$0xff] }
 0x89e   : > { %1799 = vmatpush1.msra.mxu0 %v1632_v63 }
 0x89f   : > { %3943 = vmatprep.subr.msk.mxu0 %vm816_vm1, %v4796_v1 }
 0x93f   : > { %v1603_v6 = vpop.f32.mrf.mxu0 }
 0x940   : > { %v1604_v7 = vadd.f32 %v3644_v5, %v1603_v6 }
 0x941   : > { %v3942_v40 = vpop.f32.mrf.mxu0 }
 0x942   : > { %1762 = vmatmul.mubr.f32.vlgmr.msra.gmra.mxu1 %v1604_v7  ;;  %v4804_v14 = vadd.f32 %v1604_v7, %v4607_v54  ;;  %v560_v54 = vsub.s32 3, %v4634_v8  ;;  %v1902_v8 = vld [vmem:[#allocation8] sm:$0xff] }
 0x943   : > { %3738 = vmatpush3.msra.mxu1 %v1917_v9 }
 0x944   : > { %3739 = vmatprep.subr.mxu1 %v1932_v11  ;;  %1610 = vadd.xlane.f32.xlu1 %v4804_v14  ;;  %v561_v17 = vrot.slane %v4642_v12, %v560_v54  ;;  %v1839_v11 = vld [vmem:[%s5136_s8] ss:$4 sm:$0x3] }
 0x945   : > { %3740 = vmatpush3.msra.mxu1 %v1916_v13 }
 0x946   : > { %3741 = vmatprep.subr.mxu1 %v1931_v16  ;;  %v4810_v2 = vadd.f32 %v4673_v26, %v561_v17  ;;  %v735_v38 = vadd.f32 %v4683_v30, %v561_v17  ;;  %v1905_v26 = vld [vmem:[#allocation8 + $0x18] sm:$0xff]  ;;  %v1918_v30 = vld [vmem:[#allocation8 + $0x80] sm:$0xff]  ;;  %v1844_v16 = vrot.slane %v1839_v11, %v4647_v15 }
 0x947   : > { %3742 = vmatpush3.msra.mxu1 %v1915_v18  ;;  %v1848_v18 = vrot.slane %v1839_v11, %v4637_v10 }
 0x948   : > { %3743 = vmatprep.subr.mxu1 %v1930_v21 }
 0x949   : > { %3744 = vmatpush3.msra.mxu1 %v1914_v22 }
 0x94a   : > { %3745 = vmatprep.subr.mxu1 %v1929_v28 }
 0x94b   : > { %3746 = vmatpush3.msra.mxu1 %v1913_v23 }
 0x94c   : > { %3747 = vmatprep.subr.mxu1 %v1928_v24 }
 0x94d   : > { %3748 = vmatpush3.msra.mxu1 %v1912_v25 }
 0x94e   : > { %3749 = vmatprep.subr.mxu1 %v1927_v27 }
 0x94f   : > { %3750 = vmatpush3.msra.mxu1 %v1911_v31 }
 0x950   : > { %3751 = vmatprep.subr.mxu1 %v1926_v32 }
 0x951   : > { %3752 = vmatpush3.msra.mxu1 %v1910_v33 }
 0x952   : > { %3753 = vmatprep.subr.mxu1 %v1925_v34 }
 0x953   : > { %3754 = vmatpush3.msra.mxu1 %v1909_v59 }
 0x954   : > { %3755 = vmatprep.subr.mxu1 %v1924_v35 }
 0x955   : > { %3756 = vmatpush3.msra.mxu1 %v1908_v36  ;;  %2224 = vrot.lane.b32.xlu1 %v4810_v2, %s4417_s12 }
 0x956   : > { %3757 = vmatprep.subr.mxu1 %v1923_v60 }
 0x957   : > { %3758 = vmatpush3.msra.mxu1 %v1907_v37 }
 0x958   : > { %3759 = vmatprep.subr.mxu1 %v1922_v19 }
 0x959   : > { %3760 = vmatpush3.msra.mxu1 %v1906_v20  ;;  %2226 = vrot.lane.b32.xlu1 %v735_v38, %s4417_s12 }
 0x95a   : > { %3761 = vmatprep.subr.mxu1 %v1921_v39 }
 0x95b   : > { %3762 = vmatpush3.msra.mxu1 %v1905_v26 }
 0x95c   : > { %3763 = vmatprep.subr.mxu1 %v1920_v43 }
 0x95d   : > { %3764 = vmatpush3.msra.mxu1 %v1904_v44  ;;  %2418 = vrot.lane.b32.xlu1 %v4810_v2, %s4418_s20 }
 0x95e   : > { %3765 = vmatprep.subr.mxu1 %v1919_v45 }
 0x95f   : > { %3766 = vmatpush3.msra.mxu1 %v1903_v47 }
 0x960   : > { %3767 = vmatprep.subr.mxu1 %v1918_v30 }
 0x961   : > { %3768 = vmatpush3.msra.mxu1 %v1902_v8  ;;  %2615 = vrot.lane.b32.xlu1 %v4796_v1, %s4419_s25 }
 0x962   : > { %3948 = vmatprep.subr.mxu1 %v4821_v48 }
 0x965   : > { %2613 = vrot.lane.b32.xlu1 %v735_v38, %s4419_s25 }
 0x9cd   : > { %v1611_v12 = vpop.xlane.xlu1 %1610 }
 0x9ce   : > { %v1613_v49 = vmul.f32 0.0078125, %v1611_v12 }
 0x9d0   : > { %v1614_v50 = vsub.f32 %v4804_v14, %v1613_v49 }
 0x9d1   : > { %v2225_v55 = vpop.permute.xlu1 %2224 }
 0x9d2   : > { %v1615_v51 = vmul.f32 %v1614_v50, %v1614_v50 }
 0x9d4   : > { %1616 = vadd.xlane.f32.xlu0 %v1615_v51 }
 0x9d5   : > { %v2227_v3 = vpop.permute.xlu1 %2226 }
 0x9d9   : > { %v2419_v5 = vpop.permute.xlu1 %2418 }
 0x9dd   : > { %v2616_v7 = vpop.permute.xlu1 %2615 }
 0x9e1   : > { %v2614_v9 = vpop.permute.xlu1 %2613 }
 0x9ea   : > { %2228 = vrot.lane.b32.xlu0 %v4796_v1, %s4417_s12 }
 0x9ee   : > { %2422 = vrot.lane.b32.xlu0 %v4796_v1, %s4418_s20 }
 0x9f2   : > { %2420 = vrot.lane.b32.xlu0 %v735_v38, %s4418_s20 }
 0x9f6   : > { %2611 = vrot.lane.b32.xlu0 %v4810_v2, %s4419_s25 }
 0xa02   : > { %v1763_v40 = vpop.f32.mrf.mxu1 }
 0xa04   : > { %v1765_v21 = vpop.f32.mrf.mxu1 }
 0xa5d   : > { %v1617_v41 = vpop.xlane.xlu0 %1616 }
 0xa5e   : > { %v1618_v52 = vmul.f32 0.0078125, %v1617_v41 }
 0xa60   : > { %v1619_v53 = vadd.f32 1e-05, %v1618_v52 }
 0xa61   : > { %v2229_v58 = vpop.permute.xlu0 %2228 }
 0xa62   : > { %4147 = vrsqrt.f32 %v1619_v53 }
 0xa65   : > { %v2423_v4 = vpop.permute.xlu0 %2422 }
 0xa69   : > { %v2421_v6 = vpop.permute.xlu0 %2420 }
 0xa6f   : > { %v4148_v56 = vpop.eup %4147 }
 0xa70   : > { %v1621_v61 = vmul.f32 %v4148_v56, %v1614_v50 }
 0xa72   : > { %v1626_v63 = vmul.f32 %v3645_v57, %v1621_v61 }
 0xa74   : > { %v4841_v29 = vadd.f32 %v3646_v62, %v1626_v63 }
 0xa76   : > { %1833 = vmatmul.mubr.f32.vlgmr.msra.gmra.mxu0 %v4841_v29 }
 0xa77   : > { %3944 = vmatpush3.xpose.msk.msra.mxu0 %vm816_vm1, %v4796_v1  ;;  %3945 = vmatprep.mubr.msk.f32.mxu0 %vm816_vm1, %v4810_v2  ;;  %v2612_v1 = vpop.permute.xlu0 %2611 }
 0xa78   : > { %3953 = vmatprep.subr.msk.mxu0 %vm816_vm1, %v2229_v58 }
 0xa7a   : > { %3946 = vmatmul.mubr.msk.f32.vlgmr.msra.gmra.mxu0 %vm816_vm1, %v735_v38 }
 0xa7b   : > { %3954 = vmatpush3.xpose.msk.msra.mxu0 %vm816_vm1, %v2229_v58  ;;  %3955 = vmatprep.mubr.msk.f32.mxu0 %vm816_vm1, %v2225_v55 }
 0xa7c   : > { %3963 = vmatprep.subr.msk.mxu0 %vm816_vm1, %v2423_v4 }
 0xa7e   : > { %3956 = vmatmul.mubr.msk.f32.vlgmr.msra.gmra.mxu0 %vm816_vm1, %v2227_v3 }
 0xa7f   : > { %3964 = vmatpush3.xpose.msk.msra.mxu0 %vm816_vm1, %v2423_v4  ;;  %3965 = vmatprep.mubr.msk.f32.mxu0 %vm816_vm1, %v2419_v5 }
 0xa80   : > { %3973 = vmatprep.subr.msk.mxu0 %vm816_vm1, %v2616_v7 }
 0xa82   : > { %3966 = vmatmul.mubr.msk.f32.vlgmr.msra.gmra.mxu0 %vm816_vm1, %v2421_v6 }
 0xa83   : > { %3974 = vmatpush3.xpose.msk.msra.mxu0 %vm816_vm1, %v2616_v7  ;;  %3975 = vmatprep.mubr.msk.f32.mxu0 %vm816_vm1, %v2612_v1 }
 0xa86   : > { %3976 = vmatmul.mubr.msk.f32.vlgmr.msra.gmra.mxu0 %vm816_vm1, %v2614_v9 }
 0xb36   : > { %v1834_v13 = vpop.f32.mrf.mxu0 }
 0xb37   : > { %v1835_v14 = vadd.f32 %v1834_v13, %v1763_v40 }
 0xb38   : > { %v1836_v22 = vpop.f32.mrf.mxu0 }
 0xb39   : > { %v1837_v28 = vadd.f32 %v1836_v22, %v1765_v21  ;;  %v1851_v24 = vadd.f32 %v1844_v16, %v1835_v14 }
 0xb3a   : > { %v3947_v23 = vpop.f32.mrf.mxu0 }
 0xb3b   : > { %v1852_v25 = vadd.f32 %v1848_v18, %v1837_v28  ;;  %v2124_v59 = vsel %vm2120_vm5, %v3947_v23, -inf }
 0xb3c   : > { %v2111_v54 = vpop.f32.mrf.mxu0 }
 0xb3d   : > { %v2121_v27 = vsel %vm2120_vm5, %v2111_v54, -inf  ;;  %v1857_v31 = vadd.f32 %v1852_v25, %v1851_v24 }
 0xb3e   : > { %v3957_v32 = vpop.f32.mrf.mxu0  ;;  %2122 = vmax.xlane.f32.xlu1 %v2121_v27 }
 0xb3f   : > { %1858 = vadd.xlane.f32.xlu0 %v1857_v31  ;;  %v2314_v17 = vsel %vm2120_vm5, %v3957_v32, -inf }
 0xb40   : > { %v2302_v33 = vpop.f32.mrf.mxu0 }
 0xb41   : > { %v2311_v60 = vsel %vm2120_vm5, %v2302_v33, -inf }
 0xb42   : > { %v3967_v34 = vpop.f32.mrf.mxu0  ;;  %2315 = vmax.xlane.f32.xlu1 %v2314_v17 }
 0xb43   : > { %2125 = vmax.xlane.f32.xlu0 %v2124_v59  ;;  %v2508_v36 = vsel %vm2120_vm5, %v3967_v34, -inf }
 0xb44   : > { %v2496_v35 = vpop.f32.mrf.mxu0 }
 0xb45   : > { %v2505_v19 = vsel %vm2120_vm5, %v2496_v35, -inf }
 0xb46   : > { %v3977_v2 = vpop.f32.mrf.mxu0  ;;  %2509 = vmax.xlane.f32.xlu1 %v2508_v36  ;;  %v3647_v36 = vld [vmem:[%s5136_s8 + $0x1] ss:$4 sm:$0x3] }
 0xb47   : > { %2312 = vmax.xlane.f32.xlu0 %v2311_v60  ;;  %v2701_v37 = vsel %vm2120_vm5, %v3977_v2, -inf  ;;  %v3648_v60 = vld [vmem:[%s5136_s8 + $0x2] ss:$4 sm:$0x3] }
 0xb48   : > { %v2689_v20 = vpop.f32.mrf.mxu0 }
 0xb49   : > { %v2698_v38 = vsel %vm2120_vm5, %v2689_v20, -inf }
 0xb4a   : > { %2702 = vmax.xlane.f32.xlu1 %v2701_v37  ;;  %v1878_v37 = vrot.slane %v3647_v36, %v4647_v15 }
 0xb4b   : > { %2506 = vmax.xlane.f32.xlu0 %v2505_v19  ;;  %v1882_v19 = vrot.slane %v3647_v36, %v4637_v10  ;;  %v2836_v36 = vld [vmem:[#allocation5 + $0x88] sm:$0xff] }
 0xb4f   : > { %2699 = vmax.xlane.f32.xlu0 %v2698_v38 }
 0xb5b   : > { %2334 = vrot.lane.b32.xlu1 %v4821_v48, %s4417_s12 }
 0xbc7   : > { %v2123_v39 = vpop.xlane.xlu1 %2122 }
 0xbc8   : > { %v2127_v42 = vsub.f32 %v2111_v54, %v2123_v39  ;;  %v1859_v26 = vpop.xlane.xlu0 %1858 }
 0xbc9   : > { %v1861_v43 = vmul.f32 0.00390625, %v1859_v26  ;;  %v1891_v26 = vrot.slane %v3648_v60, %v4647_v15 }
 0xbca   : > { %v2129_v44 = vmul.f32 1.442695, %v2127_v42 }
 0xbcb   : > { %v4876_v45 = vsub.f32 %v1851_v24, %v1861_v43  ;;  %v4878_v46 = vsub.f32 %v1852_v25, %v1861_v43  ;;  %v2316_v47 = vpop.xlane.xlu1 %2315  ;;  %v1895_v43 = vrot.slane %v3648_v60, %v4637_v10 }
 0xbcc   : > { %4149 = vpow2.f32 %v2129_v44  ;;  %v2318_v30 = vsub.f32 %v3957_v32, %v2316_v47  ;;  %v2126_v8 = vpop.xlane.xlu0 %2125 }
 0xbcd   : > { %v2128_v12 = vsub.f32 %v3947_v23, %v2126_v8  ;;  %v1864_v49 = vmul.f32 %v4876_v45, %v4876_v45  ;;  %v1865_v50 = vmul.f32 %v4878_v46, %v4878_v46 }
 0xbce   : > { %v2321_v51 = vmul.f32 1.442695, %v2318_v30 }
 0xbcf   : > { %v2131_v41 = vmul.f32 1.442695, %v2128_v12  ;;  %v2510_v52 = vpop.xlane.xlu1 %2509  ;;  %v1866_v53 = vadd.f32 %v1865_v50, %v1864_v49 }
 0xbd0   : > { %v2512_v55 = vsub.f32 %v3967_v34, %v2510_v52  ;;  %v2313_v56 = vpop.xlane.xlu0 %2312 }
 0xbd1   : > { %4151 = vpow2.f32 %v2131_v41  ;;  %v2317_v57 = vsub.f32 %v2302_v33, %v2313_v56  ;;  %1867 = vadd.xlane.f32.xlu0 %v1866_v53 }
 0xbd2   : > { %4153 = vpow2.f32 %v2321_v51  ;;  %v2515_v58 = vmul.f32 1.442695, %v2512_v55 }
 0xbd3   : > { %v2319_v61 = vmul.f32 1.442695, %v2317_v57  ;;  %v2703_v62 = vpop.xlane.xlu1 %2702 }
 0xbd4   : > { %v2705_v63 = vsub.f32 %v3977_v2, %v2703_v62  ;;  %v2507_v3 = vpop.xlane.xlu0 %2506 }
 0xbd5   : > { %4155 = vpow2.f32 %v2319_v61  ;;  %v2511_v4 = vsub.f32 %v2496_v35, %v2507_v3 }
 0xbd6   : > { %4157 = vpow2.f32 %v2515_v58  ;;  %v2708_v5 = vmul.f32 1.442695, %v2705_v63 }
 0xbd7   : > { %v2513_v6 = vmul.f32 1.442695, %v2511_v4  ;;  %v2335_v59 = vpop.permute.xlu1 %2334 }
 0xbd8   : > { %v2700_v7 = vpop.xlane.xlu0 %2699 }
 0xbd9   : > { %v4884_v1 = vpop.eup %4149  ;;  %4159 = vpow2.f32 %v2513_v6  ;;  %v2704_v9 = vsub.f32 %v2689_v20, %v2700_v7 }
 0xbda   : > { %v2133_v40 = vsel %vm2120_vm5, %v4884_v1, 0.0  ;;  %4161 = vpow2.f32 %v2708_v5 }
 0xbdb   : > { %v2706_v11 = vmul.f32 1.442695, %v2704_v9  ;;  %2134 = vadd.xlane.f32.xlu1 %v2133_v40 }
 0xbdd   : > { %4163 = vpow2.f32 %v2706_v11  ;;  %v2850_v11 = vld [vmem:[#allocation5 + $0xf8] sm:$0xff] }
 0xbde   : > { %v4888_v13 = vpop.eup %4151  ;;  %3983 = vmatprep.subr.mxu0 %v2850_v11 }
 0xbdf   : > { %v2136_v14 = vsel %vm2120_vm5, %v4888_v13, 0.0  ;;  %v4892_v16 = vpop.eup %4153  ;;  %3984 = vmatpush3.msra.mxu0 %v2850_v11 }
 0xbe0   : > { %2137 = vadd.xlane.f32.xlu0 %v2136_v14  ;;  %v2326_v21 = vsel %vm2120_vm5, %v4892_v16, 0.0  ;;  %v2848_v14 = vld [vmem:[#allocation5 + $0xe8] sm:$0xff] }
 0xbe2   : > { %v4894_v18 = vpop.eup %4155 }
 0xbe3   : > { %v2323_v22 = vsel %vm2120_vm5, %v4894_v18, 0.0  ;;  %v4900_v28 = vpop.eup %4157 }
 0xbe4   : > { %2327 = vadd.xlane.f32.xlu0 %v2326_v21  ;;  %2324 = vadd.xlane.f32.xlu1 %v2323_v22  ;;  %v2520_v24 = vsel %vm2120_vm5, %v4900_v28, 0.0  ;;  %v2845_v21 = vld [vmem:[#allocation5 + $0xd0] sm:$0xff]  ;;  %v2844_v22 = vld [vmem:[#allocation5 + $0xc8] sm:$0xff] }
 0xbe6   : > { %v4902_v23 = vpop.eup %4159 }
 0xbe7   : > { %v2517_v25 = vsel %vm2120_vm5, %v4902_v23, 0.0  ;;  %v4908_v54 = vpop.eup %4161 }
 0xbe8   : > { %2521 = vadd.xlane.f32.xlu0 %v2520_v24  ;;  %2518 = vadd.xlane.f32.xlu1 %v2517_v25  ;;  %v2713_v31 = vsel %vm2120_vm5, %v4908_v54, 0.0  ;;  %v2841_v24 = vld [vmem:[#allocation5 + $0xb0] sm:$0xff] }
 0xbea   : > { %v4910_v27 = vpop.eup %4163 }
 0xbeb   : > { %v2710_v32 = vsel %vm2120_vm5, %v4910_v27, 0.0 }
 0xbec   : > { %2714 = vadd.xlane.f32.xlu0 %v2713_v31  ;;  %2711 = vadd.xlane.f32.xlu1 %v2710_v32  ;;  %v2839_v32 = vld [vmem:[#allocation5 + $0xa0] sm:$0xff] }
 0xbfd   : > { %2720 = vrot.lane.b32.xlu1 %v4821_v48, %s4419_s25 }
 0xc02   : > { %2527 = vrot.lane.b32.xlu0 %v4821_v48, %s4418_s20 }
 0xc5a   : > { %v1868_v33 = vpop.xlane.xlu0 %1867 }
 0xc5b   : > { %v1869_v17 = vmul.f32 0.00390625, %v1868_v33 }
 0xc5d   : > { %v1870_v34 = vadd.f32 1e-05, %v1869_v17  ;;  %v2838_v17 = vld [vmem:[#allocation5 + $0x98] sm:$0xff] }
 0xc5f   : > { %4165 = vrsqrt.f32 %v1870_v34  ;;  %v2837_v34 = vld [vmem:[#allocation5 + $0x90] sm:$0xff] }
 0xc64   : > { %v2135_v35 = vpop.xlane.xlu1 %2134 }
 0xc65   : > { %4167 = vrcp.f32 %v2135_v35 }
 0xc69   : > { %v2138_v2 = vpop.xlane.xlu0 %2137 }
 0xc6a   : > { %4169 = vrcp.f32 %v2138_v2  ;;  %v2835_v2 = vld [vmem:[#allocation5 + $0x80] sm:$0xff] }
 0xc6c   : > { %v4166_v20 = vpop.eup %4165 }
 0xc6d   : > { %v2325_v38 = vpop.xlane.xlu1 %2324  ;;  %v2328_v39 = vpop.xlane.xlu0 %2327  ;;  %v1873_v42 = vmul.f32 %v4166_v20, %v4878_v46  ;;  %v1872_v44 = vmul.f32 %v4166_v20, %v4876_v45  ;;  %v3035_v20 = vld [vmem:[#allocation7 + $0x3f8] sm:$0xff] }
 0xc6e   : > { %4171 = vrcp.f32 %v2325_v38  ;;  %v3034_v38 = vld [vmem:[#allocation7 + $0x3f0] sm:$0xff] }
 0xc6f   : > { %4173 = vrcp.f32 %v2328_v39  ;;  %v1886_v47 = vmul.f32 %v1882_v19, %v1873_v42  ;;  %v1885_v30 = vmul.f32 %v1878_v37, %v1872_v44  ;;  %v3033_v39 = vld [vmem:[#allocation7 + $0x3e8] sm:$0xff]  ;;  %v3032_v42 = vld [vmem:[#allocation7 + $0x3e0] sm:$0xff] }
 0xc71   : > { %v2519_v8 = vpop.xlane.xlu1 %2518  ;;  %v2522_v12 = vpop.xlane.xlu0 %2521  ;;  %v1899_v49 = vadd.f32 %v1895_v43, %v1886_v47  ;;  %v1898_v50 = vadd.f32 %v1891_v26, %v1885_v30  ;;  %v3031_v43 = vld [vmem:[#allocation7 + $0x3d8] sm:$0xff]  ;;  %v3030_v47 = vld [vmem:[#allocation7 + $0x3d0] sm:$0xff] }
 0xc72   : > { %v4168_v51 = vpop.eup %4167  ;;  %4175 = vrcp.f32 %v2519_v8  ;;  %v3029_v8 = vld [vmem:[#allocation7 + $0x3c8] sm:$0xff] }
 0xc73   : > { %4177 = vrcp.f32 %v2522_v12  ;;  %v1901_v41 = vmax.f32 %v1899_v49, 0.0  ;;  %v1900_v52 = vmax.f32 %v1898_v50, 0.0  ;;  %v2141_v55 = vmul.f32 %v4168_v51, %v4884_v1  ;;  %v3028_v12 = vld [vmem:[#allocation7 + $0x3c0] sm:$0xff]  ;;  %v3027_v50 = vld [vmem:[#allocation7 + $0x3b8] sm:$0xff] }
 0xc75   : > { %v2712_v46 = vpop.xlane.xlu1 %2711  ;;  %2003 = vmatprep.mubr.f32.mxu1 %v1901_v41  ;;  %v2715_v53 = vpop.xlane.xlu0 %2714  ;;  %v3026_v41 = vld [vmem:[#allocation7 + $0x3b0] sm:$0xff] }
 0xc76   : > { %4179 = vrcp.f32 %v2712_v46  ;;  %2004 = vmatmul.mubr.f32.vlgmr.msra.gmra.mxu1 %v1900_v52  ;;  %v3025_v52 = vld [vmem:[#allocation7 + $0x3a8] sm:$0xff]  ;;  %v3024_v46 = vld [vmem:[#allocation7 + $0x3a0] sm:$0xff] }
 0xc77   : > { %v4170_v45 = vpop.eup %4169  ;;  %4181 = vrcp.f32 %v2715_v53  ;;  %3949 = vmatpush3.msra.mxu1 %v4821_v48  ;;  %3950 = vmatprep.mubr.msk.f32.mxu1 %vm2120_vm5, %v2141_v55  ;;  %v3023_v53 = vld [vmem:[#allocation7 + $0x398] sm:$0xff]  ;;  %v3022_v55 = vld [vmem:[#allocation7 + $0x390] sm:$0xff] }
 0xc78   : > { %3958 = vmatprep.subr.mxu1 %v2335_v59  ;;  %v2142_v56 = vmul.f32 %v4170_v45, %v4888_v13  ;;  %v2849_v13 = vld [vmem:[#allocation5 + $0xf0] sm:$0xff]  ;;  %v3021_v45 = vld [vmem:[#allocation7 + $0x388] sm:$0xff] }
 0xc79   : > { %v2528_v57 = vpop.permute.xlu0 %2527  ;;  %v2721_v4 = vpop.permute.xlu1 %2720  ;;  %3985 = vmatprep.subr.mxu0 %v2849_v13 }
 0xc7a   : > { %3951 = vmatmul.mubr.msk.f32.vlgmr.msra.gmra.mxu1 %vm2120_vm5, %v2142_v56  ;;  %3986 = vmatpush3.msra.mxu0 %v2849_v13  ;;  %v3020_v56 = vld [vmem:[#allocation7 + $0x380] sm:$0xff] }
 0xc7b   : > { %v4172_v58 = vpop.eup %4171  ;;  %3959 = vmatpush3.msra.mxu1 %v2335_v59  ;;  %3987 = vmatprep.subr.mxu0 %v2848_v14 }
 0xc7c   : > { %v4174_v61 = vpop.eup %4173  ;;  %3968 = vmatprep.subr.mxu1 %v2528_v57  ;;  %v2331_v62 = vmul.f32 %v4172_v58, %v4894_v18  ;;  %3988 = vmatpush3.msra.mxu0 %v2848_v14  ;;  %v2846_v18 = vld [vmem:[#allocation5 + $0xd8] sm:$0xff]  ;;  %v3018_v58 = vld [vmem:[#allocation7 + $0x370] sm:$0xff] }
 0xc7d   : > { %v2332_v63 = vmul.f32 %v4174_v61, %v4892_v16  ;;  %v2847_v16 = vld [vmem:[#allocation5 + $0xe0] sm:$0xff]  ;;  %v3017_v61 = vld [vmem:[#allocation7 + $0x368] sm:$0xff] }
 0xc7e   : > { %3960 = vmatprep.mubr.msk.f32.mxu1 %vm2120_vm5, %v2331_v62  ;;  %3989 = vmatprep.subr.mxu0 %v2847_v16  ;;  %v3016_v62 = vld [vmem:[#allocation7 + $0x360] sm:$0xff] }
 0xc7f   : > { %v4176_v3 = vpop.eup %4175  ;;  %3961 = vmatmul.mubr.msk.f32.vlgmr.msra.gmra.mxu1 %vm2120_vm5, %v2332_v63  ;;  %3990 = vmatpush3.msra.mxu0 %v2847_v16  ;;  %v3015_v63 = vld [vmem:[#allocation7 + $0x358] sm:$0xff] }
 0xc80   : > { %v4178_v48 = vpop.eup %4177  ;;  %3969 = vmatpush3.msra.mxu1 %v2528_v57  ;;  %v2525_v5 = vmul.f32 %v4176_v3, %v4902_v23  ;;  %3991 = vmatprep.subr.mxu0 %v2846_v18  ;;  %v2842_v23 = vld [vmem:[#allocation5 + $0xb8] sm:$0xff]  ;;  %v3014_v3 = vld [vmem:[#allocation7 + $0x350] sm:$0xff] }
 0xc81   : > { %3978 = vmatprep.subr.mxu1 %v2721_v4  ;;  %v2526_v6 = vmul.f32 %v4178_v48, %v4900_v28  ;;  %3992 = vmatpush3.msra.mxu0 %v2846_v18  ;;  %v2843_v28 = vld [vmem:[#allocation5 + $0xc0] sm:$0xff]  ;;  %v3019_v57 = vld [vmem:[#allocation7 + $0x378] sm:$0xff]  ;;  %v3013_v48 = vld [vmem:[#allocation7 + $0x348] sm:$0xff] }
 0xc82   : > { %3970 = vmatprep.mubr.msk.f32.mxu1 %vm2120_vm5, %v2525_v5  ;;  %3993 = vmatprep.subr.mxu0 %v2845_v21  ;;  %v3011_v5 = vld [vmem:[#allocation7 + $0x338] sm:$0xff] }
 0xc83   : > { %v4180_v7 = vpop.eup %4179  ;;  %3971 = vmatmul.mubr.msk.f32.vlgmr.msra.gmra.mxu1 %vm2120_vm5, %v2526_v6  ;;  %3994 = vmatpush3.msra.mxu0 %v2845_v21  ;;  %v3010_v6 = vld [vmem:[#allocation7 + $0x330] sm:$0xff] }
 0xc84   : > { %v4182_v1 = vpop.eup %4181  ;;  %3979 = vmatpush3.msra.mxu1 %v2721_v4  ;;  %v2718_v9 = vmul.f32 %v4180_v7, %v4910_v27  ;;  %3995 = vmatprep.subr.mxu0 %v2844_v22  ;;  %v3012_v4 = vld [vmem:[#allocation7 + $0x340] sm:$0xff]  ;;  %v3009_v7 = vld [vmem:[#allocation7 + $0x328] sm:$0xff] }
 0xc85   : > { %v2719_v40 = vmul.f32 %v4182_v1, %v4908_v54  ;;  %3996 = vmatpush3.msra.mxu0 %v2844_v22  ;;  %v2840_v54 = vld [vmem:[#allocation5 + $0xa8] sm:$0xff]  ;;  %3036 = vmatprep.subr.mxu1 %v3035_v20 }
 0xc86   : > { %3980 = vmatprep.mubr.msk.f32.mxu1 %vm2120_vm5, %v2718_v9  ;;  %3997 = vmatprep.subr.mxu0 %v2843_v28 }
 0xc87   : > { %3981 = vmatmul.mubr.msk.f32.vlgmr.msra.gmra.mxu1 %vm2120_vm5, %v2719_v40  ;;  %3998 = vmatpush3.msra.mxu0 %v2843_v28 }
 0xc88   : > { %3100 = vmatprep.mubr.f32.mxu1 %v4415_v0  ;;  %3999 = vmatprep.subr.mxu0 %v2842_v23 }
 0xc89   : > { %4000 = vmatpush3.msra.mxu0 %v2842_v23  ;;  %3037 = vmatpush1.msra.mxu1 %v3034_v38 }
 0xc8a   : > { %4001 = vmatprep.subr.mxu0 %v2841_v24  ;;  %3038 = vmatprep.subr.mxu1 %v3033_v39  ;;  %v3002_v39 = vld [vmem:[#allocation7 + $0x2f8] sm:$0xff] }
 0xc8b   : > { %4002 = vmatpush3.msra.mxu0 %v2841_v24  ;;  %3039 = vmatpush1.msra.mxu1 %v3032_v42  ;;  %v3001_v42 = vld [vmem:[#allocation7 + $0x2f0] sm:$0xff] }
 0xc8c   : > { %4003 = vmatprep.subr.mxu0 %v2840_v54  ;;  %3040 = vmatprep.subr.mxu1 %v3031_v43  ;;  %v2999_v43 = vld [vmem:[#allocation7 + $0x2e0] sm:$0xff] }
 0xc8d   : > { %4004 = vmatpush3.msra.mxu0 %v2840_v54  ;;  %3041 = vmatpush1.msra.mxu1 %v3030_v47  ;;  %v2997_v47 = vld [vmem:[#allocation7 + $0x2d0] sm:$0xff] }
 0xc8e   : > { %4005 = vmatprep.subr.mxu0 %v2839_v32  ;;  %3042 = vmatprep.subr.mxu1 %v3029_v8  ;;  %v2995_v8 = vld [vmem:[#allocation7 + $0x2c0] sm:$0xff] }
 0xc8f   : > { %4006 = vmatpush3.msra.mxu0 %v2839_v32  ;;  %3043 = vmatpush1.msra.mxu1 %v3028_v12  ;;  %v3007_v32 = vld [vmem:[#allocation7 + $0x318] sm:$0xff] }
 0xc90   : > { %4007 = vmatprep.subr.mxu0 %v2838_v17  ;;  %3044 = vmatprep.subr.mxu1 %v3027_v50 }
 0xc91   : > { %4008 = vmatpush3.msra.mxu0 %v2838_v17  ;;  %3045 = vmatpush1.msra.mxu1 %v3026_v41  ;;  %v3005_v17 = vld [vmem:[#allocation7 + $0x308] sm:$0xff] }
 0xc92   : > { %4009 = vmatprep.subr.mxu0 %v2837_v34  ;;  %3046 = vmatprep.subr.mxu1 %v3025_v52 }
 0xc93   : > { %4010 = vmatpush3.msra.mxu0 %v2837_v34  ;;  %3047 = vmatpush1.msra.mxu1 %v3024_v46  ;;  %v3004_v34 = vld [vmem:[#allocation7 + $0x300] sm:$0xff] }
 0xc94   : > { %4011 = vmatprep.subr.mxu0 %v2836_v36  ;;  %3048 = vmatprep.subr.mxu1 %v3023_v53 }
 0xc95   : > { %4012 = vmatpush3.msra.mxu0 %v2836_v36  ;;  %3049 = vmatpush1.msra.mxu1 %v3022_v55  ;;  %v2035_v36 = vld [vmem:[%s4612_s29 + $0x8] sm:$0xff]  ;;  %v2994_v55 = vld [vmem:[#allocation7 + $0x2b8] sm:$0xff] }
 0xc96   : > { %4013 = vmatprep.subr.mxu0 %v2835_v2  ;;  %3050 = vmatprep.subr.mxu1 %v3021_v45  ;;  %v2993_v45 = vld [vmem:[#allocation7 + $0x2b0] sm:$0xff] }
 0xc97   : > { %4014 = vmatpush3.msra.mxu0 %v2835_v2  ;;  %3051 = vmatpush1.msra.mxu1 %v3020_v56  ;;  %v2992_v56 = vld [vmem:[#allocation7 + $0x2a8] sm:$0xff] }
 0xc98   : > { %3052 = vmatprep.subr.mxu1 %v3019_v57  ;;  %3113 = vmatprep.subr.mxu0 %v3002_v39  ;;  %v2991_v57 = vld [vmem:[#allocation7 + $0x2a0] sm:$0xff] }
 0xc99   : > { %3053 = vmatpush1.msra.mxu1 %v3018_v58  ;;  %v2990_v58 = vld [vmem:[#allocation7 + $0x298] sm:$0xff] }
 0xc9a   : > { %3054 = vmatprep.subr.mxu1 %v3017_v61  ;;  %v2989_v61 = vld [vmem:[#allocation7 + $0x290] sm:$0xff] }
 0xc9b   : > { %3055 = vmatpush1.msra.mxu1 %v3016_v62  ;;  %v2988_v62 = vld [vmem:[#allocation7 + $0x288] sm:$0xff] }
 0xc9c   : > { %3056 = vmatprep.subr.mxu1 %v3015_v63  ;;  %v2987_v63 = vld [vmem:[#allocation7 + $0x280] sm:$0xff] }
 0xc9d   : > { %3057 = vmatpush1.msra.mxu1 %v3014_v3  ;;  %v2986_v3 = vld [vmem:[#allocation7 + $0x278] sm:$0xff] }
 0xc9e   : > { %3058 = vmatprep.subr.mxu1 %v3013_v48  ;;  %v2985_v48 = vld [vmem:[#allocation7 + $0x270] sm:$0xff] }
 0xc9f   : > { %3059 = vmatpush1.msra.mxu1 %v3012_v4  ;;  %v2984_v4 = vld [vmem:[#allocation7 + $0x268] sm:$0xff] }
 0xca0   : > { %3060 = vmatprep.subr.mxu1 %v3011_v5  ;;  %v2983_v5 = vld [vmem:[#allocation7 + $0x260] sm:$0xff] }
 0xca1   : > { %3061 = vmatpush1.msra.mxu1 %v3010_v6  ;;  %v2982_v6 = vld [vmem:[#allocation7 + $0x258] sm:$0xff] }
 0xca2   : > { %3062 = vmatprep.subr.mxu1 %v3009_v7  ;;  %v2981_v7 = vld [vmem:[#allocation7 + $0x250] sm:$0xff] }
 0xd36   : > { %v3769_v25 = vpop.f32.mrf.mxu1 }
 0xd38   : > { %v3770_v27 = vpop.f32.mrf.mxu1 }
 0xd39   : > { %v4950_v31 = vadd.f32 %v3770_v27, %v3769_v25  ;;  %v3008_v27 = vld [vmem:[#allocation7 + $0x320] sm:$0xff] }
 0xd3a   : > { %v4952_v33 = vpop.f32.mrf.mxu1  ;;  %3063 = vmatpush1.msra.mxu1 %v3008_v27 }
 0xd3b   : > { %3064 = vmatprep.subr.mxu1 %v3007_v32 }
 0xd3c   : > { %v4954_v59 = vpop.f32.mrf.mxu1 }
 0xd3f   : > { %v3962_v35 = vpop.f32.mrf.mxu1 }
 0xd41   : > { %v2409_v60 = vpop.f32.mrf.mxu1 }
 0xd42   : > { %v4116_v37 = vpack.i.bf16 %v3962_v35, %v2409_v60 }
 0xd43   : > { %v3972_v19 = vpop.f32.mrf.mxu1 }
 0xd44   : > { %4117 = vrot.lane.b32.xlu1 %v4116_v37, %s4419_s25  ;;  %v2034_v37 = vld [vmem:[%s4612_s29] sm:$0xff]  ;;  %s5047_s25 = sand.u32 1, %s4395_s14  }
 0xd45   : > { %v2602_v26 = vpop.f32.mrf.mxu1  ;;  %s3623_s22 = sshll.u32 %s5047_s25, 3  ;;  %s3431_s29 = scalar_lea.sflag [#allocation4], %s5047_s25 }
 0xd46   : > { %v4121_v44 = vpack.i.bf16 %v3972_v19, %v2602_v26  ;;  %v3000_v26 = vld [vmem:[#allocation7 + $0x2e8] sm:$0xff]  ;;  %s428_s27 = scalar_lea.vmem [#allocation10], %s3623_s22 }
 0xd47   : > { %v3982_v30 = vpop.f32.mrf.mxu1  ;;  %s3449_s18 = sshll.u32 %s428_s27, 4  ;;  %s3450_s18 = int_to_ptr.vmem [resolvable:$true] %s3449_s18 }
 0xd48   : > { %4122 = vrot.lane.b32.xlu0 %v4121_v44, %s4418_s20  ;;  %v2998_v44 = vld [vmem:[#allocation7 + $0x2d8] sm:$0xff]  ;;  %s3447_s20 = scalar_lea.hbm %s5137_s9, %s3689_s28  ;;  %s4301_s26 = scalar_lea.vmem %s3450_s18, 128 }
 0xd49   : > { %v2795_v49 = vpop.f32.mrf.mxu1  ;;  %p4302_p10 = scmp.ne.s32.totalorder %s3450_s18, %s4301_s26  ;;  %p4308_p4 = scmp.lt.s32.totalorder %s3450_s18, %s4306_s30 }
 0xd4a   : > { %v4126_v51 = vpack.i.bf16 %v3982_v30, %v2795_v49  ;;  %v2996_v30 = vld [vmem:[#allocation7 + $0x2c8] sm:$0xff]  ;;  %p4309_p7 = scmp.lt.s32.totalorder %s4307_s11, %s4301_s26 }
 0xd4b   : > { %p4303_p12 = pnand %p4302_p10, %p4517_p5 }
 0xd4c   : > { %4127 = vrot.lane.b32.xlu1 %v4126_v51, %s4417_s12  ;;  %p4310_p8 = por %p4309_p7, %p4308_p4 }
 0xd4d   : > { %p4304_p13 = pneg %p4303_p12 }
 0xd4f   : > { %p4311_p11 = pnand %p4310_p8, %p4304_p13 }
 0xdb6   : > { %v4118_v1 = vpop.permute.xlu1 %4117 }
 0xdb7   : > { %v4120_v40 = vunpack.i.h.bf16 %v4118_v1  ;;  %v4119_v11 = vunpack.i.l.bf16 %v4118_v1  ;;  %v2980_v1 = vld [vmem:[#allocation7 + $0x248] sm:$0xff] }
 0xdb9   : > { %v2829_v18 = vsel %vm816_vm1, %v4952_v33, %v4120_v40  ;;  %v2828_v28 = vsel %vm816_vm1, %v4954_v59, %v4119_v11  ;;  %v3006_v33 = vld [vmem:[#allocation7 + $0x310] sm:$0xff]  ;;  %v3673_v59 = vld [vmem:[%s5135_s7 + $0x8] ss:$0 sm:$0xff]  ;;  %v2978_v40 = vld [vmem:[#allocation7 + $0x238] sm:$0xff] }
 0xdba   : > { %v4123_v9 = vpop.permute.xlu0 %4122  ;;  %3065 = vmatpush1.msra.mxu1 %v3006_v33  ;;  %v2977_v11 = vld [vmem:[#allocation7 + $0x230] sm:$0xff]  ;;  %v3676_v33 = vld [vmem:[%s5135_s7 + $0x9] ss:$0 sm:$0xff] }
 0xdbb   : > { %v4125_v13 = vunpack.i.h.bf16 %v4123_v9  ;;  %v4124_v14 = vunpack.i.l.bf16 %v4123_v9  ;;  %3066 = vmatprep.subr.mxu1 %v3005_v17  ;;  %v2979_v9 = vld [vmem:[#allocation7 + $0x240] sm:$0xff] }
 0xdbc   : > { %3067 = vmatpush1.msra.mxu1 %v3004_v34  ;;  %v3677_v34 = vld [vmem:[%s5135_s7 + $0xa] ss:$0 sm:$0xff] }
 0xdbd   : > { %v2830_v23 = vsel %vm1512_vm3, %v2828_v28, %v4124_v14  ;;  %v2831_v24 = vsel %vm1512_vm3, %v2829_v18, %v4125_v13  ;;  %v2976_v13 = vld [vmem:[#allocation7 + $0x228] sm:$0xff]  ;;  %v2975_v14 = vld [vmem:[#allocation7 + $0x220] sm:$0xff]  ;;  %v2973_v18 = vld [vmem:[#allocation7 + $0x210] sm:$0xff] }
 0xdbe   : > { %v4128_v16 = vpop.permute.xlu1 %4127 }
 0xdbf   : > { %v4130_v21 = vunpack.i.h.bf16 %v4128_v16  ;;  %v4129_v22 = vunpack.i.l.bf16 %v4128_v16  ;;  %v2974_v16 = vld [vmem:[#allocation7 + $0x218] sm:$0xff] }
 0xdc1   : > { %v2832_v25 = vsel %vm1514_vm4, %v2830_v23, %v4129_v22  ;;  %v2833_v54 = vsel %vm1514_vm4, %v2831_v24, %v4130_v21  ;;  %v2972_v21 = vld [vmem:[#allocation7 + $0x208] sm:$0xff]  ;;  %v2971_v22 = vld [vmem:[#allocation7 + $0x200] sm:$0xff] }
 0xdc2   : > { %4015 = vmatprep.mubr.f32.mxu0 %v2832_v25 }
 0xdc3   : > { %4016 = vmatmul.mubr.f32.vlgmr.msra.gmra.mxu0 %v2833_v54 }
 0xdc4   : > { %3177 = vmatprep.mubr.f32.mxu0 %v4415_v0  ;;  %3114 = vmatpush1.msra.mxu0 %v3001_v42 }
 0xdc5   : > { %3115 = vmatprep.subr.mxu0 %v3000_v26 }
 0xdc6   : > { %3116 = vmatpush1.msra.mxu0 %v2999_v43 }
 0xdc7   : > { %3117 = vmatprep.subr.mxu0 %v2998_v44 }
 0xdc8   : > { %3118 = vmatpush1.msra.mxu0 %v2997_v47 }
 0xdc9   : > { %3119 = vmatprep.subr.mxu0 %v2996_v30 }
 0xdca   : > { %3120 = vmatpush1.msra.mxu0 %v2995_v8 }
 0xdcb   : > { %3121 = vmatprep.subr.mxu0 %v2994_v55 }
 0xdcc   : > { %3122 = vmatpush1.msra.mxu0 %v2993_v45  ;;  %v3309_v45 = vld [vmem:[#allocation8 + $0x1f8] sm:$0xff] }
 0xdcd   : > { %3123 = vmatprep.subr.mxu0 %v2992_v56  ;;  %v3293_v56 = vld [vmem:[#allocation8 + $0x178] sm:$0xff]  ;;  %3814 = vmatprep.subr.mxu1 %v3309_v45 }
 0xdce   : > { %3124 = vmatpush1.msra.mxu0 %v2991_v57  ;;  %v3308_v57 = vld [vmem:[#allocation8 + $0x1f0] sm:$0xff] }
 0xdcf   : > { %3125 = vmatprep.subr.mxu0 %v2990_v58  ;;  %v3292_v58 = vld [vmem:[#allocation8 + $0x170] sm:$0xff] }
 0xdd0   : > { %3126 = vmatpush1.msra.mxu0 %v2989_v61  ;;  %v3307_v61 = vld [vmem:[#allocation8 + $0x1e8] sm:$0xff] }
 0xdd1   : > { %3127 = vmatprep.subr.mxu0 %v2988_v62 }
 0xdd2   : > { %3128 = vmatpush1.msra.mxu0 %v2987_v63 }
 0xdd3   : > { %3129 = vmatprep.subr.mxu0 %v2986_v3 }
 0xdd4   : > { %3130 = vmatpush1.msra.mxu0 %v2985_v48 }
 0xdd5   : > { %3131 = vmatprep.subr.mxu0 %v2984_v4  ;;  %v3649_v4 = vld [vmem:[%s5135_s7 + $0x3] ss:$0 sm:$0xff] }
 0xdd6   : > { %3132 = vmatpush1.msra.mxu0 %v2983_v5 }
 0xdd7   : > { %3133 = vmatprep.subr.mxu0 %v2982_v6 }
 0xdd8   : > { %3134 = vmatpush1.msra.mxu0 %v2981_v7 }
 0xdd9   : > { %3135 = vmatprep.subr.mxu0 %v2980_v1 }
 0xdda   : > { %3136 = vmatpush1.msra.mxu0 %v2979_v9  ;;  %v2006_v9 = vadd.f32 %v4950_v31, %v3649_v4  ;;  %v3291_v31 = vld [vmem:[#allocation8 + $0x168] sm:$0xff] }
 0xddb   : > { %3137 = vmatprep.subr.mxu0 %v2978_v40 }
 0xddc   : > { %3138 = vmatpush1.msra.mxu0 %v2977_v11 }
 0xddd   : > { %3139 = vmatprep.subr.mxu0 %v2976_v13 }
 0xdde   : > { %3140 = vmatpush1.msra.mxu0 %v2975_v14 }
 0xddf   : > { %3141 = vmatprep.subr.mxu0 %v2974_v16 }
 0xde0   : > { %3142 = vmatpush1.msra.mxu0 %v2973_v18  ;;  %v5023_v18 = vadd.f32 %v2006_v9, %v4841_v29  ;;  %v3303_v29 = vld [vmem:[#allocation8 + $0x1c8] sm:$0xff] }
 0xde1   : > { %3143 = vmatprep.subr.mxu0 %v2972_v21 }
 0xde2   : > { %3144 = vmatpush1.msra.mxu0 %v2971_v22  ;;  %v3306_v22 = vld [vmem:[#allocation8 + $0x1e0] sm:$0xff] }
 0xe83   : > { %v4017_v35 = vpop.f32.mrf.mxu0 }
 0xe84   : > { %v2929_v2 = vadd.f32 %v4017_v35, %v3673_v59 }
 0xe85   : > { %v2923_v60 = vpop.f32.mrf.mxu0 }
 0xe86   : > { %v2924_v19 = vadd.f32 %v3673_v59, %v2923_v60  ;;  %v2933_v20 = vadd.f32 %v2929_v2, %v2035_v36 }
 0xe88   : > { %2938 = vadd.xlane.f32.xlu1 %v2933_v20  ;;  %3101 = vmatmul.mubr.f32.vlgmr.msra.gmra.mxu1 %v2924_v19  ;;  %v2932_v38 = vadd.f32 %v2924_v19, %v2034_v37 }
 0xe89   : > { %3106 = vmatprep.mubr.f32.mxu1 %v4415_v0  ;;  %3815 = vmatpush3.msra.mxu1 %v3293_v56 }
 0xe8a   : > { %2936 = vadd.xlane.f32.xlu0 %v2932_v38  ;;  %3816 = vmatprep.subr.mxu1 %v3308_v57 }
 0xe8b   : > { %3817 = vmatpush3.msra.mxu1 %v3292_v58 }
 0xe8c   : > { %3107 = vmatmul.mubr.f32.gmra.mxu1 %v2929_v2  ;;  %3818 = vmatprep.subr.mxu1 %v3307_v61 }
 0xe8d   : > { %3819 = vmatpush3.msra.mxu1 %v3291_v31 }
 0xe8e   : > { %3820 = vmatprep.subr.mxu1 %v3306_v22 }
 0xf11   : > { %v2939_v12 = vpop.xlane.xlu1 %2938 }
 0xf12   : > { %v2941_v50 = vmul.f32 0.0078125, %v2939_v12 }
 0xf13   : > { %v2937_v49 = vpop.xlane.xlu0 %2936 }
 0xf14   : > { %v2940_v51 = vmul.f32 0.0078125, %v2937_v49  ;;  %v4976_v52 = vsub.f32 %v2933_v20, %v2941_v50 }
 0xf16   : > { %v4974_v41 = vsub.f32 %v2932_v38, %v2940_v51  ;;  %v2945_v53 = vmul.f32 %v4976_v52, %v4976_v52  ;;  %v3678_v38 = vld [vmem:[%s5136_s8 + $0x8] ss:$4 sm:$0x3] }
 0xf17   : > { %v3196_v26 = vrot.slane %v3678_v38, %v4647_v15  ;;  %v3200_v43 = vrot.slane %v3678_v38, %v4637_v10  ;;  %v3297_v38 = vld [vmem:[#allocation8 + $0x198] sm:$0xff] }
 0xf18   : > { %v2944_v46 = vmul.f32 %v4974_v41, %v4974_v41 }
 0xf1a   : > { %2946 = vadd.xlane.f32.xlu0 %v2944_v46 }
 0xf1e   : > { %2948 = vadd.xlane.f32.xlu0 %v2945_v53 }
 0xf48   : > { %v3102_v19 = vpop.f32.mrf.mxu1 }
 0xf4a   : > { %v3104_v20 = vpop.f32.mrf.mxu1 }
 0xf4c   : > { %v3108_v44 = vpop.f32.mrf.mxu1 }
 0xf4e   : > { %v3110_v50 = vpop.f32.mrf.mxu1 }
 0xfa3   : > { %v2947_v28 = vpop.xlane.xlu0 %2946 }
 0xfa4   : > { %v2950_v23 = vmul.f32 0.0078125, %v2947_v28  ;;  %v3290_v28 = vld [vmem:[#allocation8 + $0x160] sm:$0xff] }
 0xfa5   : > { %3821 = vmatpush3.msra.mxu1 %v3290_v28 }
 0xfa6   : > { %v2952_v24 = vadd.f32 1e-05, %v2950_v23  ;;  %v3305_v23 = vld [vmem:[#allocation8 + $0x1d8] sm:$0xff] }
 0xfa7   : > { %v2949_v25 = vpop.xlane.xlu0 %2948  ;;  %3822 = vmatprep.subr.mxu1 %v3305_v23 }
 0xfa8   : > { %4183 = vrsqrt.f32 %v2952_v24  ;;  %v2951_v54 = vmul.f32 0.0078125, %v2949_v25  ;;  %v3289_v24 = vld [vmem:[#allocation8 + $0x158] sm:$0xff]  ;;  %v3304_v25 = vld [vmem:[#allocation8 + $0x1d0] sm:$0xff] }
 0xfa9   : > { %3823 = vmatpush3.msra.mxu1 %v3289_v24 }
 0xfaa   : > { %v2953_v27 = vadd.f32 1e-05, %v2951_v54  ;;  %3824 = vmatprep.subr.mxu1 %v3304_v25  ;;  %v3288_v54 = vld [vmem:[#allocation8 + $0x150] sm:$0xff] }
 0xfab   : > { %3825 = vmatpush3.msra.mxu1 %v3288_v54 }
 0xfac   : > { %4185 = vrsqrt.f32 %v2953_v27  ;;  %3826 = vmatprep.subr.mxu1 %v3303_v29  ;;  %v3287_v27 = vld [vmem:[#allocation8 + $0x148] sm:$0xff] }
 0xfad   : > { %3827 = vmatpush3.msra.mxu1 %v3287_v27 }
 0xfb5   : > { %v4184_v32 = vpop.eup %4183 }
 0xfb6   : > { %v2956_v17 = vmul.f32 %v4184_v32, %v4974_v41  ;;  %v3302_v32 = vld [vmem:[#allocation8 + $0x1c0] sm:$0xff] }
 0xfb7   : > { %3828 = vmatprep.subr.mxu1 %v3302_v32 }
 0xfb8   : > { %v2962_v59 = vmul.f32 %v3676_v33, %v2956_v17  ;;  %v3301_v17 = vld [vmem:[#allocation8 + $0x1b8] sm:$0xff] }
 0xfb9   : > { %v4186_v35 = vpop.eup %4185 }
 0xfba   : > { %v4989_v36 = vadd.f32 %v3677_v34, %v2962_v59  ;;  %v2957_v2 = vmul.f32 %v4186_v35, %v4976_v52  ;;  %v3300_v59 = vld [vmem:[#allocation8 + $0x1b0] sm:$0xff] }
 0xfbb   : > { %v3284_v35 = vld [vmem:[#allocation8 + $0x130] sm:$0xff] }
 0xfbc   : > { %3178 = vmatmul.mubr.f32.vlgmr.msra.gmra.mxu0 %v4989_v36  ;;  %v2963_v60 = vmul.f32 %v3676_v33, %v2957_v2  ;;  %v3286_v33 = vld [vmem:[#allocation8 + $0x140] sm:$0xff]  ;;  %v3299_v2 = vld [vmem:[#allocation8 + $0x1a8] sm:$0xff] }
 0xfbd   : > { %3183 = vmatprep.mubr.f32.mxu0 %v4415_v0  ;;  %3829 = vmatpush3.msra.mxu1 %v3286_v33 }
 0xfbe   : > { %v4994_v37 = vadd.f32 %v3677_v34, %v2963_v60  ;;  %v3285_v34 = vld [vmem:[#allocation8 + $0x138] sm:$0xff]  ;;  %3830 = vmatprep.subr.mxu1 %v3301_v17  ;;  %v3283_v60 = vld [vmem:[#allocation8 + $0x128] sm:$0xff] }
 0xfbf   : > { %3831 = vmatpush3.msra.mxu1 %v3285_v34 }
 0xfc0   : > { %3184 = vmatmul.mubr.f32.gmra.mxu0 %v4994_v37  ;;  %3832 = vmatprep.subr.mxu1 %v3300_v59 }
 0xfc1   : > { %3833 = vmatpush3.msra.mxu1 %v3284_v35 }
 0xfc2   : > { %3834 = vmatprep.subr.mxu1 %v3299_v2 }
 0xfc3   : > { %3835 = vmatpush3.msra.mxu1 %v3283_v60 }
0x107c   : > { %v3179_v39 = vpop.f32.mrf.mxu0 }
0x107d   : > { %v3180_v42 = vadd.f32 %v3179_v39, %v3102_v19  ;;  %v3298_v19 = vld [vmem:[#allocation8 + $0x1a0] sm:$0xff]  ;;  %v3281_v39 = vld [vmem:[#allocation8 + $0x118] sm:$0xff] }
0x107e   : > { %v3181_v47 = vpop.f32.mrf.mxu0  ;;  %3836 = vmatprep.subr.mxu1 %v3298_v19 }
0x107f   : > { %v3182_v30 = vadd.f32 %v3181_v47, %v3104_v20  ;;  %v3203_v8 = vadd.f32 %v3196_v26, %v3180_v42  ;;  %v3282_v20 = vld [vmem:[#allocation8 + $0x120] sm:$0xff]  ;;  %v3296_v42 = vld [vmem:[#allocation8 + $0x190] sm:$0xff] }
0x1080   : > { %v3185_v0 = vpop.f32.mrf.mxu0  ;;  %3837 = vmatpush3.msra.mxu1 %v3282_v20  ;;  %v3294_v47 = vld [vmem:[#allocation8 + $0x180] sm:$0xff] }
0x1081   : > { %v3204_v12 = vadd.f32 %v3200_v43, %v3182_v30  ;;  %v3186_v49 = vadd.f32 %v3185_v0, %v3108_v44  ;;  %3838 = vmatprep.subr.mxu1 %v3297_v38  ;;  %v3279_v44 = vld [vmem:[#allocation8 + $0x108] sm:$0xff]  ;;  %v3278_v30 = vld [vmem:[#allocation8 + $0x100] sm:$0xff] }
0x1082   : > { %v3187_v51 = vpop.f32.mrf.mxu0  ;;  %3839 = vmatpush3.msra.mxu1 %v3281_v39  ;;  %v3650_v39 = vld [vmem:[%s5135_s7 + $0x4] ss:$0 sm:$0xff] }
0x1083   : > { %v3188_v41 = vadd.f32 %v3187_v51, %v3110_v50  ;;  %v3211_v52 = vadd.f32 %v3204_v12, %v3203_v8  ;;  %v3205_v46 = vadd.f32 %v3196_v26, %v3186_v49  ;;  %v3280_v26 = vld [vmem:[#allocation8 + $0x110] sm:$0xff]  ;;  %3840 = vmatprep.subr.mxu1 %v3296_v42 }
0x1084   : > { %3841 = vmatpush3.msra.mxu1 %v3280_v26  ;;  %v3651_v26 = vld [vmem:[%s5135_s7 + $0x5] ss:$0 sm:$0xff] }
0x1085   : > { %v3206_v53 = vadd.f32 %v3200_v43, %v3188_v41  ;;  %3212 = vadd.xlane.f32.xlu1 %v3211_v52  ;;  %v3295_v43 = vld [vmem:[#allocation8 + $0x188] sm:$0xff] }
0x1086   : > { %3842 = vmatprep.subr.mxu1 %v3295_v43  ;;  %v3679_v41 = vld [vmem:[%s5136_s8 + $0x9] ss:$4 sm:$0x3]  ;;  %v3680_v52 = vld [vmem:[%s5136_s8 + $0xa] ss:$4 sm:$0x3] }
0x1087   : > { %v3214_v55 = vadd.f32 %v3206_v53, %v3205_v46  ;;  %3843 = vmatpush3.msra.mxu1 %v3279_v44  ;;  %v3262_v57 = vrot.slane %v3680_v52, %v4647_v15  ;;  %v3266_v58 = vrot.slane %v3680_v52, %v4637_v10 }
0x1088   : > { %3844 = vmatprep.subr.mxu1 %v3294_v47 }
0x1089   : > { %3215 = vadd.xlane.f32.xlu0 %v3214_v55  ;;  %3845 = vmatpush3.msra.mxu1 %v3278_v30 }
0x110e   : > { %v3213_v62 = vpop.xlane.xlu1 %3212 }
0x110f   : > { %v3217_v63 = vmul.f32 0.00390625, %v3213_v62 }
0x1111   : > { %v5002_v3 = vsub.f32 %v3203_v8, %v3217_v63  ;;  %v5004_v48 = vsub.f32 %v3204_v12, %v3217_v63 }
0x1112   : > { %v3216_v5 = vpop.xlane.xlu0 %3215 }
0x1113   : > { %v3218_v6 = vmul.f32 0.00390625, %v3216_v5  ;;  %v3223_v7 = vmul.f32 %v5002_v3, %v5002_v3  ;;  %v3224_v1 = vmul.f32 %v5004_v48, %v5004_v48 }
0x1115   : > { %v5014_v40 = vsub.f32 %v3205_v46, %v3218_v6  ;;  %v5016_v11 = vsub.f32 %v3206_v53, %v3218_v6  ;;  %v3227_v13 = vadd.f32 %v3224_v1, %v3223_v7  ;;  %v3247_v46 = vrot.slane %v3679_v41, %v4647_v15 }
0x1116   : > { %v3251_v53 = vrot.slane %v3679_v41, %v4637_v10 }
0x1117   : > { %3228 = vadd.xlane.f32.xlu1 %v3227_v13  ;;  %v3225_v14 = vmul.f32 %v5014_v40, %v5014_v40  ;;  %v3226_v16 = vmul.f32 %v5016_v11, %v5016_v11 }
0x1119   : > { %v3230_v21 = vadd.f32 %v3226_v16, %v3225_v14 }
0x111b   : > { %2012 = vadd.xlane.f32.xlu1 %v5023_v18  ;;  %3231 = vadd.xlane.f32.xlu0 %v3230_v21 }
0x11a0   : > { %v3229_v0 = vpop.xlane.xlu1 %3228 }
0x11a1   : > { %v3233_v8 = vmul.f32 0.00390625, %v3229_v0 }
0x11a3   : > { %v3235_v12 = vadd.f32 1e-05, %v3233_v8 }
0x11a4   : > { %v3232_v49 = vpop.xlane.xlu0 %3231  ;;  %v2013_v10 = vpop.xlane.xlu1 %2012 }
0x11a5   : > { %4187 = vrsqrt.f32 %v3235_v12  ;;  %v3234_v50 = vmul.f32 0.00390625, %v3232_v49 }
0x11a7   : > { %v3236_v51 = vadd.f32 1e-05, %v3234_v50 }
0x11a9   : > { %4189 = vrsqrt.f32 %v3236_v51 }
0x11b2   : > { %v4188_v55 = vpop.eup %4187 }
0x11b3   : > { %v3239_v45 = vmul.f32 %v4188_v55, %v5002_v3  ;;  %v3240_v56 = vmul.f32 %v4188_v55, %v5004_v48 }
0x11b5   : > { %v3254_v61 = vmul.f32 %v3247_v46, %v3239_v45  ;;  %v3255_v62 = vmul.f32 %v3251_v53, %v3240_v56 }
0x11b6   : > { %v4190_v63 = vpop.eup %4189 }
0x11b7   : > { %v3269_v4 = vadd.f32 %v3262_v57, %v3254_v61  ;;  %v3270_v5 = vadd.f32 %v3266_v58, %v3255_v62  ;;  %v3242_v6 = vmul.f32 %v4190_v63, %v5016_v11  ;;  %v3241_v7 = vmul.f32 %v4190_v63, %v5014_v40  ;;  %v3682_v11 = vld [vmem:[%s5135_s7 + $0xb] ss:$0 sm:$0xff] }
0x11b8   : > { %v2014_v40 = vmul.f32 0.0078125, %v2013_v10 }
0x11b9   : > { %v3273_v1 = vmax.f32 %v3269_v4, 0.0  ;;  %v3274_v9 = vmax.f32 %v3270_v5, 0.0  ;;  %v3257_v13 = vmul.f32 %v3251_v53, %v3242_v6  ;;  %v3256_v14 = vmul.f32 %v3247_v46, %v3241_v7 }
0x11ba   : > { %v2015_v25 = vsub.f32 %v5023_v18, %v2014_v40 }
0x11bb   : > { %3379 = vmatprep.mubr.f32.mxu1 %v3274_v9  ;;  %v3272_v3 = vadd.f32 %v3266_v58, %v3257_v13  ;;  %v3271_v48 = vadd.f32 %v3262_v57, %v3256_v14 }
0x11bc   : > { %3380 = vmatmul.mubr.f32.vlgmr.msra.gmra.mxu1 %v3273_v1  ;;  %v2016_v32 = vmul.f32 %v2015_v25, %v2015_v25 }
0x11bd   : > { %v3276_v15 = vmax.f32 %v3272_v3, 0.0  ;;  %v3275_v16 = vmax.f32 %v3271_v48, 0.0 }
0x11bf   : > { %3384 = vmatprep.mubr.f32.mxu1 %v3276_v15 }
0x11c0   : > { %3385 = vmatmul.mubr.f32.gmra.mxu1 %v3275_v16 }
0x127c   : > { %v3846_v21 = vpop.f32.mrf.mxu1 }
0x127e   : > { %v3847_v31 = vpop.f32.mrf.mxu1 }
0x127f   : > { %v3848_v22 = vadd.f32 %v3847_v31, %v3846_v21 }
0x1280   : > { %v3849_v28 = vpop.f32.mrf.mxu1 }
0x1281   : > { %v3382_v23 = vadd.f32 %v3848_v22, %v3682_v11 }
0x1282   : > { %v3850_v24 = vpop.f32.mrf.mxu1 }
0x1283   : > { %v3851_v54 = vadd.f32 %v3850_v24, %v3849_v28  ;;  %v3390_v29 = vadd.f32 %v3382_v23, %v4989_v36 }
0x1285   : > { %v3387_v27 = vadd.f32 %v3851_v54, %v3682_v11  ;;  %3394 = vadd.xlane.f32.xlu0 %v3390_v29 }
0x1287   : > { %v3391_v33 = vadd.f32 %v3387_v27, %v4994_v37 }
0x1289   : > { %2017 = vadd.xlane.f32.xlu0 %v2016_v32  ;;  %3396 = vadd.xlane.f32.xlu1 %v3391_v33 }
0x130e   : > { %v3395_v17 = vpop.xlane.xlu0 %3394 }
0x130f   : > { %v3398_v34 = vmul.f32 0.0078125, %v3395_v17 }
0x1311   : > { %v3400_v59 = vsub.f32 %v3390_v29, %v3398_v34 }
0x1312   : > { %v3397_v35 = vpop.xlane.xlu1 %3396  ;;  %v2018_v2 = vpop.xlane.xlu0 %2017 }
0x1313   : > { %v3399_v60 = vmul.f32 0.0078125, %v3397_v35  ;;  %v2019_v19 = vmul.f32 0.0078125, %v2018_v2  ;;  %v3402_v20 = vmul.f32 %v3400_v59, %v3400_v59 }
0x1315   : > { %v3401_v18 = vsub.f32 %v3391_v33, %v3399_v60  ;;  %v2020_v38 = vadd.f32 1e-05, %v2019_v19  ;;  %3404 = vadd.xlane.f32.xlu1 %v3402_v20 }
0x1317   : > { %4191 = vrsqrt.f32 %v2020_v38  ;;  %v3403_v36 = vmul.f32 %v3401_v18, %v3401_v18 }
0x1319   : > { %3406 = vadd.xlane.f32.xlu0 %v3403_v36 }
0x1324   : > { %v4192_v37 = vpop.eup %4191 }
0x1325   : > { %v2022_v42 = vmul.f32 %v4192_v37, %v2015_v25 }
0x1327   : > { %v2027_v43 = vmul.f32 %v3650_v39, %v2022_v42 }
0x1329   : > { %v2032_v44 = vadd.f32 %v3651_v26, %v2027_v43 }
0x132b   : > { %2033 = vst [vmem:[%s428_s27] sm:$0xff] %v2032_v44 }
0x132c   : > { %4314 = shalt.err (!%p4311_p11)
}
0x132d   : > { %s4315_s22 = scalar_lea.hbm %s3447_s20, 128  ;;  %s4319_s21 = scalar_lea.hbm %s5137_s9, 256 }
0x132e   : > { %p4316_p0 = scmp.ne.s32.totalorder %s3447_s20, %s4315_s22  ;;  %p4320_p3 = scmp.lt.s32.totalorder %s3447_s20, %s5137_s9 }
0x132f   : > { %p4321_p9 = scmp.lt.s32.totalorder %s4319_s21, %s4315_s22 }
0x1330   : > { %p4317_p1 = pnand %p4316_p0, %p4517_p5 }
0x1331   : > { %p4322_p10 = por %p4321_p9, %p4320_p3 }
0x1332   : > { %p4318_p2 = pneg %p4317_p1 }
0x1334   : > { %p4323_p12 = pnand %p4322_p10, %p4318_p2 }
0x1336   : > { %4326 = shalt.err (!%p4323_p12)
}
0x1337   : > { %4034 = dma.vmem_to_hbm [thread:$0]  (%p4517_p5), %s3450_s18, 128, %s3447_s20, %s3431_s29   ;;  %v3685_v51 = vld [vmem:[%s5135_s7 + $0xc] ss:$0 sm:$0xff]  ;;  %v3686_v52 = vld [vmem:[%s5135_s7 + $0xd] ss:$0 sm:$0xff] }
0x1338   : > { %s3624_s15 = sshll.u32 %s5047_s25, 4  ;;  %s3695_s18 = sshll.u32 %s4500_s17, 8 }
0x1339   : > { %s435_s20 = scalar_lea.vmem [#allocation11], %s3624_s15  ;;  %s5084_s28 = scalar_lea.hbm %s5138_s10, %s3695_s18 }
0x133a   : > { %s3462_s29 = sshll.u32 %s435_s20, 4  ;;  %s3436_s21 = scalar_lea.sflag [#allocation12], %s5047_s25  ;;  %s5086_s29 = int_to_ptr.vmem [resolvable:$true] %s3462_s29 }
0x133b   : > { %s4327_s12 = scalar_lea.vmem %s5086_s29, 256  ;;  %s4421_s17 = smov [#allocation11]  }
0x133c   : > { %p4328_p13 = scmp.ne.s32.totalorder %s5086_s29, %s4327_s12  ;;  %s4331_s0 = sshll.u32 %s4421_s17, 4  ;;  %s4332_s0 = int_to_ptr.vmem [resolvable:$false] %s4331_s0 }
0x133d   : > { %s4333_s26 = scalar_lea.vmem %s4332_s0, 512  ;;  %p4334_p8 = scmp.lt.s32.totalorder %s5086_s29, %s4332_s0 }
0x133e   : > { %p4329_p4 = pnand %p4328_p13, %p4517_p5  ;;  %p4335_p11 = scmp.lt.s32.totalorder %s4333_s26, %s4327_s12 }
0x1340   : > { %p4330_p7 = pneg %p4329_p4  ;;  %p4336_p0 = por %p4335_p11, %p4334_p8 }
0x1342   : > { %p4337_p1 = pnand %p4336_p0, %p4330_p7 }
0x139e   : > { %v3405_v47 = vpop.xlane.xlu1 %3404 }
0x139f   : > { %v3408_v30 = vmul.f32 0.0078125, %v3405_v47 }
0x13a1   : > { %v3410_v0 = vadd.f32 1e-05, %v3408_v30 }
0x13a2   : > { %v3407_v8 = vpop.xlane.xlu0 %3406 }
0x13a3   : > { %4193 = vrsqrt.f32 %v3410_v0  ;;  %v3409_v12 = vmul.f32 0.0078125, %v3407_v8 }
0x13a5   : > { %v3411_v49 = vadd.f32 1e-05, %v3409_v12 }
0x13a7   : > { %4195 = vrsqrt.f32 %v3411_v49 }
0x13b0   : > { %v4194_v50 = vpop.eup %4193 }
0x13b1   : > { %v3414_v41 = vmul.f32 %v4194_v50, %v3400_v59 }
0x13b3   : > { %v3420_v46 = vmul.f32 %v3685_v51, %v3414_v41 }
0x13b4   : > { %v4196_v53 = vpop.eup %4195 }
0x13b5   : > { %v3426_v55 = vadd.f32 %v3686_v52, %v3420_v46  ;;  %v3415_v45 = vmul.f32 %v4196_v53, %v3401_v18 }
0x13b7   : > { %v3421_v56 = vmul.f32 %v3685_v51, %v3415_v45  ;;  %3428 = vst [vmem:[%s435_s20] sm:$0xff] %v3426_v55 }
0x13b9   : > { %v3427_v57 = vadd.f32 %v3686_v52, %v3421_v56 }
0x13bb   : > { %3429 = vst [vmem:[%s435_s20 + $0x8] sm:$0xff] %v3427_v57 }
0x13bc   : > { %4340 = shalt.err (!%p4337_p1)
}
0x13bd   : > { %s4341_s15 = scalar_lea.hbm %s5084_s28, 256  ;;  %s4345_s18 = scalar_lea.hbm %s5138_s10, 512 }
0x13be   : > { %p4342_p2 = scmp.ne.s32.totalorder %s5084_s28, %s4341_s15  ;;  %p4346_p10 = scmp.lt.s32.totalorder %s5084_s28, %s5138_s10 }
0x13bf   : > { %p4347_p12 = scmp.lt.s32.totalorder %s4345_s18, %s4341_s15 }
0x13c0   : > { %p4343_p3 = pnand %p4342_p2, %p4517_p5 }
0x13c1   : > { %p4348_p13 = por %p4347_p12, %p4346_p10 }
0x13c2   : > { %p4344_p9 = pneg %p4343_p3 }
0x13c4   : > { %p4349_p4 = pnand %p4348_p13, %p4344_p9 }
0x13c6   : > { %4352 = shalt.err (!%p4349_p4)
}
0x13c7   : > { %s4422_s27 = smov 128   ;;  %s4423_s12 = smov 8  }
0x13c8   : > { %4035 = dma.vmem_to_hbm [thread:$0]  (%p4517_p5), %s5086_s29, 256, %s5084_s28, %s3436_s21, %s4422_s27, %s4422_s27, %s4423_s12  }
0x13c9 PF: > { %p4066_p7 = scmp.ge.s32.totalorder %s4403_s16, 2  ;;  %s3477_s17 = sand.u32 1, %s4391_s13  }
0x13ca   : > { %s3478_s0 = scalar_lea.sflag [#allocation4], %s3477_s17 }
0x13cb   : > { %p4052_p8 = pnand %p4066_p7, %p4521_p6 }
0x13cd   : > { %p4053_p11 = pneg %p4052_p8 }
0x13cf   : > { %4382 = dma.done.wait (%p4053_p11), %s3478_s0, 128  }
0x13d0   : > { %4384 = vsyncadd (%p4053_p11), %s3478_s0, 4294967168  ;;  %s3487_s26 = scalar_lea.sflag [#allocation12], %s3477_s17 }
0x13d1   : > { %4386 = dma.done.wait (%p4053_p11), %s3487_s26, 256  }
0x13d2   : > { %4388 = vsyncadd (%p4053_p11), %s3487_s26, 4294967040  ;;  %s5150_s23 = sld [smem:[#allocation18_spill]]  ;;  %p27_p5 = scmp.ge.s32.totalorder %s4504_s19, 4  }
0x13d3   : > { %s5151_s15 = sld [smem:[#allocation19_spill]]  ;;  %s5152_s13 = smov %s4395_s14 }
0x13d4   : > { %s5154_s16 = smov %s4504_s19  ;;  %29 = sbr.rel (!%p27_p5) target bundleno = 10 (0xa), region = 139 }
0x13d8   : > { %s5153_s14 = smov %s5150_s23 }
0x13d9   :  { %3492 = vsyncpa [#allocation3], 1 }
0x13da   :  { %3494 = vsyncpa [#allocation3 + $0x1], 1 }
0x13db   :  { %3495 = vsyncpa [#allocation6], 1 }
0x13dc   :  { %3496 = vsyncpa [#allocation9], 1 }
0x13dd   :  { %3497 = vsyncpa [#allocation4], 1 }
0x13de   :  { %3499 = vsyncpa [#allocation4 + $0x1], 1 }
0x13df   :  { %3500 = vsyncpa [#allocation12], 1 }
0x13e0   :  { %3502 = vsyncpa [#allocation12 + $0x1], 1 }

</bundles_post_ra>
